<compile_context>
chip_gen: v6e
topology: v6e:2x2x1
jax: 0.10.0
libtpu: 0.0.40
codegen_flags: <defaults>
</compile_context>

<pallas_src>
import functools

import numpy as np
import jax
import jax.numpy as jnp
from jax.experimental import pallas as pl
from jax.experimental.pallas import tpu as pltpu


def _residual_block_kernel(
    x_ref,      # (1, C, HW) f32   one batch sample, channel-major
    w1_ref,     # (C, 9C)    bf16  conv1 weight, transposed im2col layout
    b1_ref,     # (C, 1)     f32
    w2_ref,     # (C, 9C)    bf16  conv2 weight, transposed im2col layout
    b2_ref,     # (C, 1)     f32
    wse1_ref,   # (C, Cr)    f32   SE reduce weight
    bse1_ref,   # (1, Cr)    f32
    wse2_ref,   # (C, Cr)    f32   SE expand weight (transposed)
    bse2_ref,   # (C, 1)     f32
    g_ref,      # (5, HW)    f32   1-D Gaussian factor, replicated over lanes
    o_ref,      # (1, C, HW) f32   output
    pad_ref,    # VMEM scratch (C, HW + 2*PADL) f32  zero-haloed flat image
    col_ref,    # VMEM scratch (9C, HW) bf16         im2col buffer
    *, H, W, PADL,
):
    C = x_ref.shape[1]
    HW = H * W
    eps = 1e-5

    def leaky_relu(t):
        return jnp.where(t > 0, t, 0.2 * t)

    def instance_norm(t):
        # centered two-pass form (biased variance), matches InstanceNorm2d defaults
        m = jnp.mean(t, axis=1, keepdims=True)
        c = t - m
        v = jnp.mean(c * c, axis=1, keepdims=True)
        return c * jax.lax.rsqrt(v + eps)

    # w-coordinate of every flattened pixel, for masking row-wrapped lane shifts
    wpos = jax.lax.broadcasted_iota(jnp.int32, (1, HW), 1) % W

    def mask_w(t, off):
        # zero pixels whose horizontal source column (w + off) fell outside the row
        if off == 0:
            return t
        valid = jnp.logical_and(wpos + off >= 0, wpos + off <= W - 1)
        return jnp.where(valid, t, jnp.zeros_like(t))

    def tap(delta):
        # tap(delta)[:, p] == image[:, p + delta], zero outside [0, HW)
        return pad_ref[:, PADL + delta:PADL + delta + HW]

    def set_center(img):
        # interior write is a 128-lane-aligned, full-width, unmasked store
        pad_ref[:, PADL:PADL + HW] = img

    def conv3x3(w_ref, b_ref):
        # im2col in the transposed channel-major layout + ONE MXU matmul:
        #   col[t*C + ci, p] = image[ci, p + (dy-1)*W + (dx-1)]     (t = dy*3 + dx)
        #   out^T (C, HW)    = W^T (C, 9C) @ col (9C, HW)           f32 accumulation
        for t in range(9):
            dy, dx = t // 3, t % 3
            delta = (dy - 1) * W + (dx - 1)
            col_ref[t * C:(t + 1) * C, :] = (
                mask_w(tap(delta), dx - 1).astype(jnp.bfloat16))
        acc = jnp.dot(w_ref[...], col_ref[...],
                      preferred_element_type=jnp.float32)
        return acc + b_ref[...]

    # zero the halo ring every step (the interior is rewritten before every use;
    # per-step so it stays correct when the "parallel" axis is sharded across cores)
    pad_ref[:, 0:PADL] = jnp.zeros((C, PADL), jnp.float32)
    pad_ref[:, PADL + HW:PADL + HW + PADL] = jnp.zeros((C, PADL), jnp.float32)

    x = x_ref[0]                                                   # (C, HW) f32

    # ---- conv1 -> InstanceNorm -> LeakyReLU ----
    set_center(x)
    out = leaky_relu(instance_norm(conv3x3(w1_ref, b1_ref)))

    # ---- conv2 -> InstanceNorm ----
    set_center(out)
    out = instance_norm(conv3x3(w2_ref, b2_ref))

    # ---- squeeze-and-excite gate, fully on the VPU (C x Cr is too small for MXU) ----
    pooled = jnp.mean(out, axis=1, keepdims=True)                                # (C, 1)
    h = jnp.sum(wse1_ref[...] * pooled, axis=0, keepdims=True) + bse1_ref[...]   # (1, Cr)
    h = jnp.maximum(h, 0.0)
    se = jnp.sum(wse2_ref[...] * h, axis=1, keepdims=True) + bse2_ref[...]       # (C, 1)
    se = jax.nn.sigmoid(se)

    # ---- residual add (x re-read from the resident input block), then separable
    #      5x5 Gaussian: 5-tap vertical pass accumulated in registers and stored
    #      once, then a 5-tap horizontal pass ----
    set_center(out * se + x)
    v = g_ref[0:1, :] * tap(-2 * W)
    for d in range(1, 5):
        v = v + g_ref[d:d + 1, :] * tap((d - 2) * W)
    set_center(v)
    sm = g_ref[0:1, :] * mask_w(tap(-2), -2)
    for d in range(1, 5):
        sm = sm + g_ref[d:d + 1, :] * mask_w(tap(d - 2), d - 2)

    o_ref[0] = leaky_relu(sm)


def _vmem_limit_bytes():
    # Per-generation VMEM budget (v7x has 64 MiB/core vs 128 MiB on v5e/v6e).
    try:
        cap = pltpu.get_tpu_info().vmem_capacity_bytes
    except Exception:
        cap = 64 * 1024 * 1024
    return int(min(cap // 2, 64 * 1024 * 1024))


def residual_block_forward(x_nchw, params):
    """x_nchw: (N, C, H, W) float32 -> (N, C, H, W) float32 (matches the PyTorch module)."""
    N, C, H, W = x_nchw.shape
    Cr = params["wse1"].shape[1]
    HW = H * W
    PADL = 128                     # halo >= 2*W+2 and 128-lane-aligned interior offset

    # channel-major, lane-dense working layout (N, C, H*W): only free reshapes here.
    x = x_nchw.reshape(N, C, HW).astype(jnp.float32)

    # host-side weight prep: transposed im2col layout, bf16 MXU operands
    w1 = params["w1"].reshape(9 * C, C).T.astype(jnp.bfloat16)     # (C, 9C)
    w2 = params["w2"].reshape(9 * C, C).T.astype(jnp.bfloat16)     # (C, 9C)
    b1 = params["b1"].reshape(C, 1).astype(jnp.float32)
    b2 = params["b2"].reshape(C, 1).astype(jnp.float32)
    wse1 = params["wse1"].astype(jnp.float32)                      # (C, Cr)
    bse1 = params["bse1"].reshape(1, Cr).astype(jnp.float32)
    wse2 = params["wse2"].T.astype(jnp.float32)                    # (C, Cr)
    bse2 = params["bse2"].reshape(C, 1).astype(jnp.float32)
    gsm = jnp.broadcast_to(params["g1"].reshape(5, 1), (5, HW)).astype(jnp.float32)

    kernel = functools.partial(_residual_block_kernel, H=H, W=W, PADL=PADL)

    # One sample per step keeps >= 2 "parallel" steps (v7x megacore) at the demo N=2.
    # TODO(synk): pack several samples per step (block (B, C, HW)) once N is large.
    out = pl.pallas_call(
        kernel,
        out_shape=jax.ShapeDtypeStruct((N, C, HW), jnp.float32),
        grid=(N,),
        in_specs=[
            pl.BlockSpec((1, C, HW), lambda n: (n, 0, 0)),
            pl.BlockSpec((C, 9 * C), lambda n: (0, 0)),
            pl.BlockSpec((C, 1), lambda n: (0, 0)),
            pl.BlockSpec((C, 9 * C), lambda n: (0, 0)),
            pl.BlockSpec((C, 1), lambda n: (0, 0)),
            pl.BlockSpec((C, Cr), lambda n: (0, 0)),
            pl.BlockSpec((1, Cr), lambda n: (0, 0)),
            pl.BlockSpec((C, Cr), lambda n: (0, 0)),
            pl.BlockSpec((C, 1), lambda n: (0, 0)),
            pl.BlockSpec((5, HW), lambda n: (0, 0)),
        ],
        out_specs=pl.BlockSpec((1, C, HW), lambda n: (n, 0, 0)),
        scratch_shapes=[
            pltpu.VMEM((C, HW + 2 * PADL), jnp.float32),   # zero-haloed flat image
            pltpu.VMEM((9 * C, HW), jnp.bfloat16),         # im2col buffer
        ],
        compiler_params=pltpu.CompilerParams(
            dimension_semantics=("parallel",),
            vmem_limit_bytes=_vmem_limit_bytes(),
        ),
    )(x, w1, b1, w2, b2, wse1, bse1, wse2, bse2, gsm)

    return out.reshape(N, C, H, W)


def init_params(key, C):
    """Deterministic synthetic parameters matching ResidualBlock(channels=C)."""
    assert C % 16 == 0 and C >= 16, "SE bottleneck needs channels // 16 >= 1"
    Cr = C // 16
    ks = jax.random.split(key, 8)
    fan = 3 * 3 * C
    w1 = jax.random.normal(ks[0], (3, 3, C, C), jnp.float32) / np.sqrt(fan)
    b1 = 0.01 * jax.random.normal(ks[1], (1, C), jnp.float32)
    w2 = jax.random.normal(ks[2], (3, 3, C, C), jnp.float32) / np.sqrt(fan)
    b2 = 0.01 * jax.random.normal(ks[3], (1, C), jnp.float32)
    wse1 = jax.random.normal(ks[4], (C, Cr), jnp.float32) / np.sqrt(C)
    bse1 = 0.01 * jax.random.normal(ks[5], (1, Cr), jnp.float32)
    wse2 = jax.random.normal(ks[6], (Cr, C), jnp.float32) / np.sqrt(Cr)
    bse2 = 0.01 * jax.random.normal(ks[7], (1, C), jnp.float32)

    # Fixed Gaussian smoothing kernel (kernel_size=5, sigma=1.5).  The normalized 2-D
    # Gaussian factorizes exactly into the outer product of its normalized 1-D factor,
    # which the kernel exploits (separable 5 + 5 smoothing).
    ksz, sigma = 5, 1.5
    center = ksz // 2
    d = np.arange(ksz) - center
    g1 = np.exp(-(d ** 2) / (2 * sigma ** 2))
    g1 = g1 / g1.sum()                                   # (5,)
    g2d = np.outer(g1, g1)                               # == normalized 2-D Gaussian
    wsm = jnp.asarray(np.broadcast_to(g2d[:, :, None, None], (ksz, ksz, 1, C)),
                      jnp.float32)

    return dict(w1=w1, b1=b1, w2=w2, b2=b2,
                wse1=wse1, bse1=bse1, wse2=wse2, bse2=bse2,
                wsm=wsm, g1=jnp.asarray(g1, jnp.float32))


def reference_forward(x_nchw, p):
    """Pure-JAX f32 reference mirroring the PyTorch forward (for correctness check)."""
    C = x_nchw.shape[1]
    x = jnp.transpose(x_nchw, (0, 2, 3, 1))   # NHWC
    dn = ("NHWC", "HWIO", "NHWC")

    def conv(t, w, b):
        y = jax.lax.conv_general_dilated(
            t, w, (1, 1), "SAME", dimension_numbers=dn,
            precision=jax.lax.Precision.HIGHEST)
        return y + b.reshape(1, 1, 1, -1)

    def inorm(t):
        m = jnp.mean(t, axis=(1, 2), keepdims=True)
        v = jnp.mean((t - m) ** 2, axis=(1, 2), keepdims=True)
        return (t - m) * jax.lax.rsqrt(v + 1e-5)

    def lrelu(t):
        return jnp.where(t > 0, t, 0.2 * t)

    out = lrelu(inorm(conv(x, p["w1"], p["b1"])))
    out = inorm(conv(out, p["w2"], p["b2"]))
    pooled = jnp.mean(out, axis=(1, 2))                               # (N, C)
    h = jnp.maximum(pooled @ p["wse1"] + p["bse1"], 0.0)
    se = jax.nn.sigmoid(h @ p["wse2"] + p["bse2"])                    # (N, C)
    out = out * se[:, None, None, :]
    sm = jax.lax.conv_general_dilated(
        out + x, p["wsm"], (1, 1), "SAME", dimension_numbers=dn,
        feature_group_count=C, precision=jax.lax.Precision.HIGHEST)
    return jnp.transpose(lrelu(sm), (0, 3, 1, 2))


if __name__ == "__main__":
    N, C, H, W = 2, 32, 16, 16     # channels must be a multiple of 16 (SE bottleneck)
    key = jax.random.PRNGKey(0)
    kx, kp = jax.random.split(key)
    x = jax.random.normal(kx, (N, C, H, W), jnp.float32)
    params = init_params(kp, C)

    out = jax.block_until_ready(residual_block_forward(x, params))

    ref = reference_forward(x, params)
    # Conv matmuls run on the MXU with bf16 operands / f32 accumulation; the
    # tolerance covers bf16 activation+weight rounding vs. the f32 HIGHEST reference.
    np.testing.assert_allclose(np.asarray(out), np.asarray(ref), rtol=3e-2, atol=3e-2)
    print("KERNEL_OK")
</pallas_src>

<mosaic_0001>
module attributes {stable_mosaic.version = 11 : i64} {
  func.func @_residual_block_kernel(%arg0: i32, %arg1: memref<1x32x256xf32, #tpu.memory_space<vmem>>, %arg2: memref<32x288xbf16, #tpu.memory_space<vmem>>, %arg3: memref<32x1xf32, #tpu.memory_space<vmem>>, %arg4: memref<32x288xbf16, #tpu.memory_space<vmem>>, %arg5: memref<32x1xf32, #tpu.memory_space<vmem>>, %arg6: memref<32x2xf32, #tpu.memory_space<vmem>>, %arg7: memref<1x2xf32, #tpu.memory_space<vmem>>, %arg8: memref<32x2xf32, #tpu.memory_space<vmem>>, %arg9: memref<32x1xf32, #tpu.memory_space<vmem>>, %arg10: memref<5x256xf32, #tpu.memory_space<vmem>>, %arg11: memref<1x32x256xf32, #tpu.memory_space<vmem>>, %arg12: memref<32x512xf32, #tpu.memory_space<vmem>>, %arg13: memref<288x256xbf16, #tpu.memory_space<vmem>>) attributes {dimension_semantics = [#tpu.dimension_semantics<parallel>], iteration_bounds = array<i64: 2>, scalar_prefetch = 0 : i64, scratch_operands = 2 : i64, tpu.core_type = #tpu.core_type<tc>, window_params = [{transform_indices = @transform_0, window_bounds = array<i64: 1, 32, 256>}, {pipeline_mode = #tpu.pipeline_mode<synchronous>, transform_indices = @transform_1, window_bounds = array<i64: 32, 288>}, {pipeline_mode = #tpu.pipeline_mode<synchronous>, transform_indices = @transform_2, window_bounds = array<i64: 32, 1>}, {pipeline_mode = #tpu.pipeline_mode<synchronous>, transform_indices = @transform_3, window_bounds = array<i64: 32, 288>}, {pipeline_mode = #tpu.pipeline_mode<synchronous>, transform_indices = @transform_4, window_bounds = array<i64: 32, 1>}, {pipeline_mode = #tpu.pipeline_mode<synchronous>, transform_indices = @transform_5, window_bounds = array<i64: 32, 2>}, {pipeline_mode = #tpu.pipeline_mode<synchronous>, transform_indices = @transform_6, window_bounds = array<i64: 1, 2>}, {pipeline_mode = #tpu.pipeline_mode<synchronous>, transform_indices = @transform_7, window_bounds = array<i64: 32, 2>}, {pipeline_mode = #tpu.pipeline_mode<synchronous>, transform_indices = @transform_8, window_bounds = array<i64: 32, 1>}, {pipeline_mode = #tpu.pipeline_mode<synchronous>, transform_indices = @transform_9, window_bounds = array<i64: 5, 256>}, {transform_indices = @transform_10, window_bounds = array<i64: 1, 32, 256>}]} {
    %0 = tpu.iota {dimensions = array<i32: 1>} : vector<1x256xi32>
    %c16_i32 = arith.constant 16 : i32
    %c0_i32 = arith.constant 0 : i32
    %1 = arith.cmpi eq, %c16_i32, %c0_i32 : i32
    %c1_i32 = arith.constant 1 : i32
    %2 = arith.select %1, %c1_i32, %c16_i32 : i32
    %3 = vector.broadcast %2 : i32 to vector<1x256xi32>
    %4 = arith.remsi %0, %3 : vector<1x256xi32>
    %c0_i32_0 = arith.constant 0 : i32
    %5 = vector.broadcast %c0_i32_0 : i32 to vector<1x256xi32>
    %6 = arith.cmpi ne, %4, %5 : vector<1x256xi32>
    %c0_i32_1 = arith.constant 0 : i32
    %7 = vector.broadcast %c0_i32_1 : i32 to vector<1x256xi32>
    %8 = arith.cmpi slt, %4, %7 : vector<1x256xi32>
    %c0_i32_2 = arith.constant 0 : i32
    %9 = arith.cmpi slt, %2, %c0_i32_2 : i32
    %10 = vector.broadcast %9 : i1 to vector<1x256xi1>
    %11 = vector.broadcast %10 : vector<1x256xi1> to vector<1x256xi1>
    %12 = arith.xori %8, %11 : vector<1x256xi1>
    %13 = arith.andi %12, %6 : vector<1x256xi1>
    %14 = vector.broadcast %2 : i32 to vector<1x256xi32>
    %15 = arith.addi %4, %14 : vector<1x256xi32>
    %16 = arith.select %13, %15, %4 : vector<1x256xi1>, vector<1x256xi32>
    %cst = arith.constant 0.000000e+00 : f32
    %17 = vector.broadcast %cst : f32 to vector<32x128xf32>
    %c0 = arith.constant 0 : index
    %c0_3 = arith.constant 0 : index
    %18 = vector.load %arg12[%c0, %c0_3] : memref<32x512xf32, #tpu.memory_space<vmem>>, vector<32x128xf32>
    tpu.vector_store %arg12[%c0, %c0_3], %17 {strides = array<i32>} : memref<32x512xf32, #tpu.memory_space<vmem>>, vector<32x128xf32>,
    %cst_4 = arith.constant 0.000000e+00 : f32
    %19 = vector.broadcast %cst_4 : f32 to vector<32x128xf32>
    %c0_5 = arith.constant 0 : index
    %c384 = arith.constant 384 : index
    %20 = vector.load %arg12[%c0_5, %c384] : memref<32x512xf32, #tpu.memory_space<vmem>>, vector<32x128xf32>
    tpu.vector_store %arg12[%c0_5, %c384], %19 {strides = array<i32>} : memref<32x512xf32, #tpu.memory_space<vmem>>, vector<32x128xf32>,
    %c0_6 = arith.constant 0 : index
    %c0_7 = arith.constant 0 : index
    %c0_8 = arith.constant 0 : index
    %21 = vector.load %arg1[%c0_6, %c0_7, %c0_8] : memref<1x32x256xf32, #tpu.memory_space<vmem>>, vector<1x32x256xf32>
    %22 = vector.shape_cast %21 : vector<1x32x256xf32> to vector<32x256xf32>
    %c0_9 = arith.constant 0 : index
    %c128 = arith.constant 128 : index
    %23 = vector.load %arg12[%c0_9, %c128] : memref<32x512xf32, #tpu.memory_space<vmem>>, vector<32x256xf32>
    tpu.vector_store %arg12[%c0_9, %c128], %22 {strides = array<i32>} : memref<32x512xf32, #tpu.memory_space<vmem>>, vector<32x256xf32>,
    %c0_10 = arith.constant 0 : index
    %c111 = arith.constant 111 : index
    %24 = vector.load %arg12[%c0_10, %c111] : memref<32x512xf32, #tpu.memory_space<vmem>>, vector<32x256xf32>
    %c-1_i32 = arith.constant -1 : i32
    %25 = vector.broadcast %c-1_i32 : i32 to vector<1x256xi32>
    %26 = arith.addi %16, %25 : vector<1x256xi32>
    %c0_i32_11 = arith.constant 0 : i32
    %27 = vector.broadcast %c0_i32_11 : i32 to vector<1x256xi32>
    %28 = arith.cmpi sge, %26, %27 : vector<1x256xi32>
    %c-1_i32_12 = arith.constant -1 : i32
    %29 = vector.broadcast %c-1_i32_12 : i32 to vector<1x256xi32>
    %30 = arith.addi %16, %29 : vector<1x256xi32>
    %c15_i32 = arith.constant 15 : i32
    %31 = vector.broadcast %c15_i32 : i32 to vector<1x256xi32>
    %32 = arith.cmpi sle, %30, %31 : vector<1x256xi32>
    %33 = arith.andi %28, %32 : vector<1x256xi1>
    %cst_13 = arith.constant 0.000000e+00 : f32
    %34 = vector.broadcast %cst_13 : f32 to vector<32x256xf32>
    %35 = vector.shape_cast %33 : vector<1x256xi1> to vector<1x256xi1>
    %36 = vector.broadcast %35 : vector<1x256xi1> to vector<32x256xi1>
    %37 = arith.select %36, %24, %34 : vector<32x256xi1>, vector<32x256xf32>
    %38 = arith.truncf %37 : vector<32x256xf32> to vector<32x256xbf16>
    %c0_14 = arith.constant 0 : index
    %c0_15 = arith.constant 0 : index
    %39 = vector.load %arg13[%c0_14, %c0_15] : memref<288x256xbf16, #tpu.memory_space<vmem>>, vector<32x256xbf16>
    tpu.vector_store %arg13[%c0_14, %c0_15], %38 {strides = array<i32>} : memref<288x256xbf16, #tpu.memory_space<vmem>>, vector<32x256xbf16>,
    %c0_16 = arith.constant 0 : index
    %c112 = arith.constant 112 : index
    %40 = vector.load %arg12[%c0_16, %c112] : memref<32x512xf32, #tpu.memory_space<vmem>>, vector<32x256xf32>
    %41 = arith.truncf %40 : vector<32x256xf32> to vector<32x256xbf16>
    %c32 = arith.constant 32 : index
    %c0_17 = arith.constant 0 : index
    %42 = vector.load %arg13[%c32, %c0_17] : memref<288x256xbf16, #tpu.memory_space<vmem>>, vector<32x256xbf16>
    tpu.vector_store %arg13[%c32, %c0_17], %41 {strides = array<i32>} : memref<288x256xbf16, #tpu.memory_space<vmem>>, vector<32x256xbf16>,
    %c0_18 = arith.constant 0 : index
    %c113 = arith.constant 113 : index
    %43 = vector.load %arg12[%c0_18, %c113] : memref<32x512xf32, #tpu.memory_space<vmem>>, vector<32x256xf32>
    %c1_i32_19 = arith.constant 1 : i32
    %44 = vector.broadcast %c1_i32_19 : i32 to vector<1x256xi32>
    %45 = arith.addi %16, %44 : vector<1x256xi32>
    %c0_i32_20 = arith.constant 0 : i32
    %46 = vector.broadcast %c0_i32_20 : i32 to vector<1x256xi32>
    %47 = arith.cmpi sge, %45, %46 : vector<1x256xi32>
    %c1_i32_21 = arith.constant 1 : i32
    %48 = vector.broadcast %c1_i32_21 : i32 to vector<1x256xi32>
    %49 = arith.addi %16, %48 : vector<1x256xi32>
    %c15_i32_22 = arith.constant 15 : i32
    %50 = vector.broadcast %c15_i32_22 : i32 to vector<1x256xi32>
    %51 = arith.cmpi sle, %49, %50 : vector<1x256xi32>
    %52 = arith.andi %47, %51 : vector<1x256xi1>
    %cst_23 = arith.constant 0.000000e+00 : f32
    %53 = vector.broadcast %cst_23 : f32 to vector<32x256xf32>
    %54 = vector.shape_cast %52 : vector<1x256xi1> to vector<1x256xi1>
    %55 = vector.broadcast %54 : vector<1x256xi1> to vector<32x256xi1>
    %56 = arith.select %55, %43, %53 : vector<32x256xi1>, vector<32x256xf32>
    %57 = arith.truncf %56 : vector<32x256xf32> to vector<32x256xbf16>
    %c64 = arith.constant 64 : index
    %c0_24 = arith.constant 0 : index
    %58 = vector.load %arg13[%c64, %c0_24] : memref<288x256xbf16, #tpu.memory_space<vmem>>, vector<32x256xbf16>
    tpu.vector_store %arg13[%c64, %c0_24], %57 {strides = array<i32>} : memref<288x256xbf16, #tpu.memory_space<vmem>>, vector<32x256xbf16>,
    %c0_25 = arith.constant 0 : index
    %c127 = arith.constant 127 : index
    %59 = vector.load %arg12[%c0_25, %c127] : memref<32x512xf32, #tpu.memory_space<vmem>>, vector<32x256xf32>
    %c-1_i32_26 = arith.constant -1 : i32
    %60 = vector.broadcast %c-1_i32_26 : i32 to vector<1x256xi32>
    %61 = arith.addi %16, %60 : vector<1x256xi32>
    %c0_i32_27 = arith.constant 0 : i32
    %62 = vector.broadcast %c0_i32_27 : i32 to vector<1x256xi32>
    %63 = arith.cmpi sge, %61, %62 : vector<1x256xi32>
    %c-1_i32_28 = arith.constant -1 : i32
    %64 = vector.broadcast %c-1_i32_28 : i32 to vector<1x256xi32>
    %65 = arith.addi %16, %64 : vector<1x256xi32>
    %c15_i32_29 = arith.constant 15 : i32
    %66 = vector.broadcast %c15_i32_29 : i32 to vector<1x256xi32>
    %67 = arith.cmpi sle, %65, %66 : vector<1x256xi32>
    %68 = arith.andi %63, %67 : vector<1x256xi1>
    %cst_30 = arith.constant 0.000000e+00 : f32
    %69 = vector.broadcast %cst_30 : f32 to vector<32x256xf32>
    %70 = vector.shape_cast %68 : vector<1x256xi1> to vector<1x256xi1>
    %71 = vector.broadcast %70 : vector<1x256xi1> to vector<32x256xi1>
    %72 = arith.select %71, %59, %69 : vector<32x256xi1>, vector<32x256xf32>
    %73 = arith.truncf %72 : vector<32x256xf32> to vector<32x256xbf16>
    %c96 = arith.constant 96 : index
    %c0_31 = arith.constant 0 : index
    %74 = vector.load %arg13[%c96, %c0_31] : memref<288x256xbf16, #tpu.memory_space<vmem>>, vector<32x256xbf16>
    tpu.vector_store %arg13[%c96, %c0_31], %73 {strides = array<i32>} : memref<288x256xbf16, #tpu.memory_space<vmem>>, vector<32x256xbf16>,
    %c0_32 = arith.constant 0 : index
    %c128_33 = arith.constant 128 : index
    %75 = vector.load %arg12[%c0_32, %c128_33] : memref<32x512xf32, #tpu.memory_space<vmem>>, vector<32x256xf32>
    %76 = arith.truncf %75 : vector<32x256xf32> to vector<32x256xbf16>
    %c128_34 = arith.constant 128 : index
    %c0_35 = arith.constant 0 : index
    %77 = vector.load %arg13[%c128_34, %c0_35] : memref<288x256xbf16, #tpu.memory_space<vmem>>, vector<32x256xbf16>
    tpu.vector_store %arg13[%c128_34, %c0_35], %76 {strides = array<i32>} : memref<288x256xbf16, #tpu.memory_space<vmem>>, vector<32x256xbf16>,
    %c0_36 = arith.constant 0 : index
    %c129 = arith.constant 129 : index
    %78 = vector.load %arg12[%c0_36, %c129] : memref<32x512xf32, #tpu.memory_space<vmem>>, vector<32x256xf32>
    %c1_i32_37 = arith.constant 1 : i32
    %79 = vector.broadcast %c1_i32_37 : i32 to vector<1x256xi32>
    %80 = arith.addi %16, %79 : vector<1x256xi32>
    %c0_i32_38 = arith.constant 0 : i32
    %81 = vector.broadcast %c0_i32_38 : i32 to vector<1x256xi32>
    %82 = arith.cmpi sge, %80, %81 : vector<1x256xi32>
    %c1_i32_39 = arith.constant 1 : i32
    %83 = vector.broadcast %c1_i32_39 : i32 to vector<1x256xi32>
    %84 = arith.addi %16, %83 : vector<1x256xi32>
    %c15_i32_40 = arith.constant 15 : i32
    %85 = vector.broadcast %c15_i32_40 : i32 to vector<1x256xi32>
    %86 = arith.cmpi sle, %84, %85 : vector<1x256xi32>
    %87 = arith.andi %82, %86 : vector<1x256xi1>
    %cst_41 = arith.constant 0.000000e+00 : f32
    %88 = vector.broadcast %cst_41 : f32 to vector<32x256xf32>
    %89 = vector.shape_cast %87 : vector<1x256xi1> to vector<1x256xi1>
    %90 = vector.broadcast %89 : vector<1x256xi1> to vector<32x256xi1>
    %91 = arith.select %90, %78, %88 : vector<32x256xi1>, vector<32x256xf32>
    %92 = arith.truncf %91 : vector<32x256xf32> to vector<32x256xbf16>
    %c160 = arith.constant 160 : index
    %c0_42 = arith.constant 0 : index
    %93 = vector.load %arg13[%c160, %c0_42] : memref<288x256xbf16, #tpu.memory_space<vmem>>, vector<32x256xbf16>
    tpu.vector_store %arg13[%c160, %c0_42], %92 {strides = array<i32>} : memref<288x256xbf16, #tpu.memory_space<vmem>>, vector<32x256xbf16>,
    %c0_43 = arith.constant 0 : index
    %c143 = arith.constant 143 : index
    %94 = vector.load %arg12[%c0_43, %c143] : memref<32x512xf32, #tpu.memory_space<vmem>>, vector<32x256xf32>
    %c-1_i32_44 = arith.constant -1 : i32
    %95 = vector.broadcast %c-1_i32_44 : i32 to vector<1x256xi32>
    %96 = arith.addi %16, %95 : vector<1x256xi32>
    %c0_i32_45 = arith.constant 0 : i32
    %97 = vector.broadcast %c0_i32_45 : i32 to vector<1x256xi32>
    %98 = arith.cmpi sge, %96, %97 : vector<1x256xi32>
    %c-1_i32_46 = arith.constant -1 : i32
    %99 = vector.broadcast %c-1_i32_46 : i32 to vector<1x256xi32>
    %100 = arith.addi %16, %99 : vector<1x256xi32>
    %c15_i32_47 = arith.constant 15 : i32
    %101 = vector.broadcast %c15_i32_47 : i32 to vector<1x256xi32>
    %102 = arith.cmpi sle, %100, %101 : vector<1x256xi32>
    %103 = arith.andi %98, %102 : vector<1x256xi1>
    %cst_48 = arith.constant 0.000000e+00 : f32
    %104 = vector.broadcast %cst_48 : f32 to vector<32x256xf32>
    %105 = vector.shape_cast %103 : vector<1x256xi1> to vector<1x256xi1>
    %106 = vector.broadcast %105 : vector<1x256xi1> to vector<32x256xi1>
    %107 = arith.select %106, %94, %104 : vector<32x256xi1>, vector<32x256xf32>
    %108 = arith.truncf %107 : vector<32x256xf32> to vector<32x256xbf16>
    %c192 = arith.constant 192 : index
    %c0_49 = arith.constant 0 : index
    %109 = vector.load %arg13[%c192, %c0_49] : memref<288x256xbf16, #tpu.memory_space<vmem>>, vector<32x256xbf16>
    tpu.vector_store %arg13[%c192, %c0_49], %108 {strides = array<i32>} : memref<288x256xbf16, #tpu.memory_space<vmem>>, vector<32x256xbf16>,
    %c0_50 = arith.constant 0 : index
    %c144 = arith.constant 144 : index
    %110 = vector.load %arg12[%c0_50, %c144] : memref<32x512xf32, #tpu.memory_space<vmem>>, vector<32x256xf32>
    %111 = arith.truncf %110 : vector<32x256xf32> to vector<32x256xbf16>
    %c224 = arith.constant 224 : index
    %c0_51 = arith.constant 0 : index
    %112 = vector.load %arg13[%c224, %c0_51] : memref<288x256xbf16, #tpu.memory_space<vmem>>, vector<32x256xbf16>
    tpu.vector_store %arg13[%c224, %c0_51], %111 {strides = array<i32>} : memref<288x256xbf16, #tpu.memory_space<vmem>>, vector<32x256xbf16>,
    %c0_52 = arith.constant 0 : index
    %c145 = arith.constant 145 : index
    %113 = vector.load %arg12[%c0_52, %c145] : memref<32x512xf32, #tpu.memory_space<vmem>>, vector<32x256xf32>
    %c1_i32_53 = arith.constant 1 : i32
    %114 = vector.broadcast %c1_i32_53 : i32 to vector<1x256xi32>
    %115 = arith.addi %16, %114 : vector<1x256xi32>
    %c0_i32_54 = arith.constant 0 : i32
    %116 = vector.broadcast %c0_i32_54 : i32 to vector<1x256xi32>
    %117 = arith.cmpi sge, %115, %116 : vector<1x256xi32>
    %c1_i32_55 = arith.constant 1 : i32
    %118 = vector.broadcast %c1_i32_55 : i32 to vector<1x256xi32>
    %119 = arith.addi %16, %118 : vector<1x256xi32>
    %c15_i32_56 = arith.constant 15 : i32
    %120 = vector.broadcast %c15_i32_56 : i32 to vector<1x256xi32>
    %121 = arith.cmpi sle, %119, %120 : vector<1x256xi32>
    %122 = arith.andi %117, %121 : vector<1x256xi1>
    %cst_57 = arith.constant 0.000000e+00 : f32
    %123 = vector.broadcast %cst_57 : f32 to vector<32x256xf32>
    %124 = vector.shape_cast %122 : vector<1x256xi1> to vector<1x256xi1>
    %125 = vector.broadcast %124 : vector<1x256xi1> to vector<32x256xi1>
    %126 = arith.select %125, %113, %123 : vector<32x256xi1>, vector<32x256xf32>
    %127 = arith.truncf %126 : vector<32x256xf32> to vector<32x256xbf16>
    %c256 = arith.constant 256 : index
    %c0_58 = arith.constant 0 : index
    %128 = vector.load %arg13[%c256, %c0_58] : memref<288x256xbf16, #tpu.memory_space<vmem>>, vector<32x256xbf16>
    tpu.vector_store %arg13[%c256, %c0_58], %127 {strides = array<i32>} : memref<288x256xbf16, #tpu.memory_space<vmem>>, vector<32x256xbf16>,
    %c0_59 = arith.constant 0 : index
    %c0_60 = arith.constant 0 : index
    %129 = vector.load %arg2[%c0_59, %c0_60] : memref<32x288xbf16, #tpu.memory_space<vmem>>, vector<32x288xbf16>
    %c0_61 = arith.constant 0 : index
    %c0_62 = arith.constant 0 : index
    %130 = vector.load %arg13[%c0_61, %c0_62] : memref<288x256xbf16, #tpu.memory_space<vmem>>, vector<288x256xbf16>
    %cst_63 = arith.constant dense<0.000000e+00> : vector<32x256xf32>
    %131 = tpu.matmul %129, %130, %cst_63 {dimension_numbers = #tpu.dot_dimension_numbers<[1], [0], [0], [1], [0, 0, 1, 1], [], []>} : vector<32x288xbf16>, vector<288x256xbf16>, vector<32x256xf32> -> vector<32x256xf32>
    %c0_64 = arith.constant 0 : index
    %c0_65 = arith.constant 0 : index
    %132 = vector.load %arg3[%c0_64, %c0_65] : memref<32x1xf32, #tpu.memory_space<vmem>>, vector<32x1xf32>
    %133 = vector.broadcast %132 : vector<32x1xf32> to vector<32x256xf32>
    %134 = arith.addf %131, %133 : vector<32x256xf32>
    %cst_66 = arith.constant dense<0.000000e+00> : vector<32xf32>
    %135 = vector.multi_reduction <add>, %134, %cst_66 [1] : vector<32x256xf32> to vector<32xf32>
    %136 = vector.shape_cast %135 : vector<32xf32> to vector<32x1xf32>
    %cst_67 = arith.constant 2.560000e+02 : f32
    %137 = vector.broadcast %cst_67 : f32 to vector<32x1xf32>
    %138 = arith.divf %136, %137 : vector<32x1xf32>
    %139 = vector.broadcast %138 : vector<32x1xf32> to vector<32x256xf32>
    %140 = arith.subf %134, %139 : vector<32x256xf32>
    %141 = arith.mulf %140, %140 : vector<32x256xf32>
    %cst_68 = arith.constant dense<0.000000e+00> : vector<32xf32>
    %142 = vector.multi_reduction <add>, %141, %cst_68 [1] : vector<32x256xf32> to vector<32xf32>
    %143 = vector.shape_cast %142 : vector<32xf32> to vector<32x1xf32>
    %cst_69 = arith.constant 2.560000e+02 : f32
    %144 = vector.broadcast %cst_69 : f32 to vector<32x1xf32>
    %145 = arith.divf %143, %144 : vector<32x1xf32>
    %cst_70 = arith.constant 9.99999974E-6 : f32
    %146 = vector.broadcast %cst_70 : f32 to vector<32x1xf32>
    %147 = arith.addf %145, %146 : vector<32x1xf32>
    %148 = math.rsqrt %147 : vector<32x1xf32>
    %149 = vector.broadcast %148 : vector<32x1xf32> to vector<32x256xf32>
    %150 = arith.mulf %140, %149 : vector<32x256xf32>
    %cst_71 = arith.constant 0.000000e+00 : f32
    %151 = vector.broadcast %cst_71 : f32 to vector<32x256xf32>
    %152 = arith.cmpf ogt, %150, %151 : vector<32x256xf32>
    %cst_72 = arith.constant 2.000000e-01 : f32
    %153 = vector.broadcast %cst_72 : f32 to vector<32x256xf32>
    %154 = arith.mulf %153, %150 : vector<32x256xf32>
    %155 = arith.select %152, %150, %154 : vector<32x256xi1>, vector<32x256xf32>
    %c0_73 = arith.constant 0 : index
    %c128_74 = arith.constant 128 : index
    %156 = vector.load %arg12[%c0_73, %c128_74] : memref<32x512xf32, #tpu.memory_space<vmem>>, vector<32x256xf32>
    tpu.vector_store %arg12[%c0_73, %c128_74], %155 {strides = array<i32>} : memref<32x512xf32, #tpu.memory_space<vmem>>, vector<32x256xf32>,
    %c0_75 = arith.constant 0 : index
    %c111_76 = arith.constant 111 : index
    %157 = vector.load %arg12[%c0_75, %c111_76] : memref<32x512xf32, #tpu.memory_space<vmem>>, vector<32x256xf32>
    %c-1_i32_77 = arith.constant -1 : i32
    %158 = vector.broadcast %c-1_i32_77 : i32 to vector<1x256xi32>
    %159 = arith.addi %16, %158 : vector<1x256xi32>
    %c0_i32_78 = arith.constant 0 : i32
    %160 = vector.broadcast %c0_i32_78 : i32 to vector<1x256xi32>
    %161 = arith.cmpi sge, %159, %160 : vector<1x256xi32>
    %c-1_i32_79 = arith.constant -1 : i32
    %162 = vector.broadcast %c-1_i32_79 : i32 to vector<1x256xi32>
    %163 = arith.addi %16, %162 : vector<1x256xi32>
    %c15_i32_80 = arith.constant 15 : i32
    %164 = vector.broadcast %c15_i32_80 : i32 to vector<1x256xi32>
    %165 = arith.cmpi sle, %163, %164 : vector<1x256xi32>
    %166 = arith.andi %161, %165 : vector<1x256xi1>
    %cst_81 = arith.constant 0.000000e+00 : f32
    %167 = vector.broadcast %cst_81 : f32 to vector<32x256xf32>
    %168 = vector.shape_cast %166 : vector<1x256xi1> to vector<1x256xi1>
    %169 = vector.broadcast %168 : vector<1x256xi1> to vector<32x256xi1>
    %170 = arith.select %169, %157, %167 : vector<32x256xi1>, vector<32x256xf32>
    %171 = arith.truncf %170 : vector<32x256xf32> to vector<32x256xbf16>
    %c0_82 = arith.constant 0 : index
    %c0_83 = arith.constant 0 : index
    %172 = vector.load %arg13[%c0_82, %c0_83] : memref<288x256xbf16, #tpu.memory_space<vmem>>, vector<32x256xbf16>
    tpu.vector_store %arg13[%c0_82, %c0_83], %171 {strides = array<i32>} : memref<288x256xbf16, #tpu.memory_space<vmem>>, vector<32x256xbf16>,
    %c0_84 = arith.constant 0 : index
    %c112_85 = arith.constant 112 : index
    %173 = vector.load %arg12[%c0_84, %c112_85] : memref<32x512xf32, #tpu.memory_space<vmem>>, vector<32x256xf32>
    %174 = arith.truncf %173 : vector<32x256xf32> to vector<32x256xbf16>
    %c32_86 = arith.constant 32 : index
    %c0_87 = arith.constant 0 : index
    %175 = vector.load %arg13[%c32_86, %c0_87] : memref<288x256xbf16, #tpu.memory_space<vmem>>, vector<32x256xbf16>
    tpu.vector_store %arg13[%c32_86, %c0_87], %174 {strides = array<i32>} : memref<288x256xbf16, #tpu.memory_space<vmem>>, vector<32x256xbf16>,
    %c0_88 = arith.constant 0 : index
    %c113_89 = arith.constant 113 : index
    %176 = vector.load %arg12[%c0_88, %c113_89] : memref<32x512xf32, #tpu.memory_space<vmem>>, vector<32x256xf32>
    %c1_i32_90 = arith.constant 1 : i32
    %177 = vector.broadcast %c1_i32_90 : i32 to vector<1x256xi32>
    %178 = arith.addi %16, %177 : vector<1x256xi32>
    %c0_i32_91 = arith.constant 0 : i32
    %179 = vector.broadcast %c0_i32_91 : i32 to vector<1x256xi32>
    %180 = arith.cmpi sge, %178, %179 : vector<1x256xi32>
    %c1_i32_92 = arith.constant 1 : i32
    %181 = vector.broadcast %c1_i32_92 : i32 to vector<1x256xi32>
    %182 = arith.addi %16, %181 : vector<1x256xi32>
    %c15_i32_93 = arith.constant 15 : i32
    %183 = vector.broadcast %c15_i32_93 : i32 to vector<1x256xi32>
    %184 = arith.cmpi sle, %182, %183 : vector<1x256xi32>
    %185 = arith.andi %180, %184 : vector<1x256xi1>
    %cst_94 = arith.constant 0.000000e+00 : f32
    %186 = vector.broadcast %cst_94 : f32 to vector<32x256xf32>
    %187 = vector.shape_cast %185 : vector<1x256xi1> to vector<1x256xi1>
    %188 = vector.broadcast %187 : vector<1x256xi1> to vector<32x256xi1>
    %189 = arith.select %188, %176, %186 : vector<32x256xi1>, vector<32x256xf32>
    %190 = arith.truncf %189 : vector<32x256xf32> to vector<32x256xbf16>
    %c64_95 = arith.constant 64 : index
    %c0_96 = arith.constant 0 : index
    %191 = vector.load %arg13[%c64_95, %c0_96] : memref<288x256xbf16, #tpu.memory_space<vmem>>, vector<32x256xbf16>
    tpu.vector_store %arg13[%c64_95, %c0_96], %190 {strides = array<i32>} : memref<288x256xbf16, #tpu.memory_space<vmem>>, vector<32x256xbf16>,
    %c0_97 = arith.constant 0 : index
    %c127_98 = arith.constant 127 : index
    %192 = vector.load %arg12[%c0_97, %c127_98] : memref<32x512xf32, #tpu.memory_space<vmem>>, vector<32x256xf32>
    %c-1_i32_99 = arith.constant -1 : i32
    %193 = vector.broadcast %c-1_i32_99 : i32 to vector<1x256xi32>
    %194 = arith.addi %16, %193 : vector<1x256xi32>
    %c0_i32_100 = arith.constant 0 : i32
    %195 = vector.broadcast %c0_i32_100 : i32 to vector<1x256xi32>
    %196 = arith.cmpi sge, %194, %195 : vector<1x256xi32>
    %c-1_i32_101 = arith.constant -1 : i32
    %197 = vector.broadcast %c-1_i32_101 : i32 to vector<1x256xi32>
    %198 = arith.addi %16, %197 : vector<1x256xi32>
    %c15_i32_102 = arith.constant 15 : i32
    %199 = vector.broadcast %c15_i32_102 : i32 to vector<1x256xi32>
    %200 = arith.cmpi sle, %198, %199 : vector<1x256xi32>
    %201 = arith.andi %196, %200 : vector<1x256xi1>
    %cst_103 = arith.constant 0.000000e+00 : f32
    %202 = vector.broadcast %cst_103 : f32 to vector<32x256xf32>
    %203 = vector.shape_cast %201 : vector<1x256xi1> to vector<1x256xi1>
    %204 = vector.broadcast %203 : vector<1x256xi1> to vector<32x256xi1>
    %205 = arith.select %204, %192, %202 : vector<32x256xi1>, vector<32x256xf32>
    %206 = arith.truncf %205 : vector<32x256xf32> to vector<32x256xbf16>
    %c96_104 = arith.constant 96 : index
    %c0_105 = arith.constant 0 : index
    %207 = vector.load %arg13[%c96_104, %c0_105] : memref<288x256xbf16, #tpu.memory_space<vmem>>, vector<32x256xbf16>
    tpu.vector_store %arg13[%c96_104, %c0_105], %206 {strides = array<i32>} : memref<288x256xbf16, #tpu.memory_space<vmem>>, vector<32x256xbf16>,
    %c0_106 = arith.constant 0 : index
    %c128_107 = arith.constant 128 : index
    %208 = vector.load %arg12[%c0_106, %c128_107] : memref<32x512xf32, #tpu.memory_space<vmem>>, vector<32x256xf32>
    %209 = arith.truncf %208 : vector<32x256xf32> to vector<32x256xbf16>
    %c128_108 = arith.constant 128 : index
    %c0_109 = arith.constant 0 : index
    %210 = vector.load %arg13[%c128_108, %c0_109] : memref<288x256xbf16, #tpu.memory_space<vmem>>, vector<32x256xbf16>
    tpu.vector_store %arg13[%c128_108, %c0_109], %209 {strides = array<i32>} : memref<288x256xbf16, #tpu.memory_space<vmem>>, vector<32x256xbf16>,
    %c0_110 = arith.constant 0 : index
    %c129_111 = arith.constant 129 : index
    %211 = vector.load %arg12[%c0_110, %c129_111] : memref<32x512xf32, #tpu.memory_space<vmem>>, vector<32x256xf32>
    %c1_i32_112 = arith.constant 1 : i32
    %212 = vector.broadcast %c1_i32_112 : i32 to vector<1x256xi32>
    %213 = arith.addi %16, %212 : vector<1x256xi32>
    %c0_i32_113 = arith.constant 0 : i32
    %214 = vector.broadcast %c0_i32_113 : i32 to vector<1x256xi32>
    %215 = arith.cmpi sge, %213, %214 : vector<1x256xi32>
    %c1_i32_114 = arith.constant 1 : i32
    %216 = vector.broadcast %c1_i32_114 : i32 to vector<1x256xi32>
    %217 = arith.addi %16, %216 : vector<1x256xi32>
    %c15_i32_115 = arith.constant 15 : i32
    %218 = vector.broadcast %c15_i32_115 : i32 to vector<1x256xi32>
    %219 = arith.cmpi sle, %217, %218 : vector<1x256xi32>
    %220 = arith.andi %215, %219 : vector<1x256xi1>
    %cst_116 = arith.constant 0.000000e+00 : f32
    %221 = vector.broadcast %cst_116 : f32 to vector<32x256xf32>
    %222 = vector.shape_cast %220 : vector<1x256xi1> to vector<1x256xi1>
    %223 = vector.broadcast %222 : vector<1x256xi1> to vector<32x256xi1>
    %224 = arith.select %223, %211, %221 : vector<32x256xi1>, vector<32x256xf32>
    %225 = arith.truncf %224 : vector<32x256xf32> to vector<32x256xbf16>
    %c160_117 = arith.constant 160 : index
    %c0_118 = arith.constant 0 : index
    %226 = vector.load %arg13[%c160_117, %c0_118] : memref<288x256xbf16, #tpu.memory_space<vmem>>, vector<32x256xbf16>
    tpu.vector_store %arg13[%c160_117, %c0_118], %225 {strides = array<i32>} : memref<288x256xbf16, #tpu.memory_space<vmem>>, vector<32x256xbf16>,
    %c0_119 = arith.constant 0 : index
    %c143_120 = arith.constant 143 : index
    %227 = vector.load %arg12[%c0_119, %c143_120] : memref<32x512xf32, #tpu.memory_space<vmem>>, vector<32x256xf32>
    %c-1_i32_121 = arith.constant -1 : i32
    %228 = vector.broadcast %c-1_i32_121 : i32 to vector<1x256xi32>
    %229 = arith.addi %16, %228 : vector<1x256xi32>
    %c0_i32_122 = arith.constant 0 : i32
    %230 = vector.broadcast %c0_i32_122 : i32 to vector<1x256xi32>
    %231 = arith.cmpi sge, %229, %230 : vector<1x256xi32>
    %c-1_i32_123 = arith.constant -1 : i32
    %232 = vector.broadcast %c-1_i32_123 : i32 to vector<1x256xi32>
    %233 = arith.addi %16, %232 : vector<1x256xi32>
    %c15_i32_124 = arith.constant 15 : i32
    %234 = vector.broadcast %c15_i32_124 : i32 to vector<1x256xi32>
    %235 = arith.cmpi sle, %233, %234 : vector<1x256xi32>
    %236 = arith.andi %231, %235 : vector<1x256xi1>
    %cst_125 = arith.constant 0.000000e+00 : f32
    %237 = vector.broadcast %cst_125 : f32 to vector<32x256xf32>
    %238 = vector.shape_cast %236 : vector<1x256xi1> to vector<1x256xi1>
    %239 = vector.broadcast %238 : vector<1x256xi1> to vector<32x256xi1>
    %240 = arith.select %239, %227, %237 : vector<32x256xi1>, vector<32x256xf32>
    %241 = arith.truncf %240 : vector<32x256xf32> to vector<32x256xbf16>
    %c192_126 = arith.constant 192 : index
    %c0_127 = arith.constant 0 : index
    %242 = vector.load %arg13[%c192_126, %c0_127] : memref<288x256xbf16, #tpu.memory_space<vmem>>, vector<32x256xbf16>
    tpu.vector_store %arg13[%c192_126, %c0_127], %241 {strides = array<i32>} : memref<288x256xbf16, #tpu.memory_space<vmem>>, vector<32x256xbf16>,
    %c0_128 = arith.constant 0 : index
    %c144_129 = arith.constant 144 : index
    %243 = vector.load %arg12[%c0_128, %c144_129] : memref<32x512xf32, #tpu.memory_space<vmem>>, vector<32x256xf32>
    %244 = arith.truncf %243 : vector<32x256xf32> to vector<32x256xbf16>
    %c224_130 = arith.constant 224 : index
    %c0_131 = arith.constant 0 : index
    %245 = vector.load %arg13[%c224_130, %c0_131] : memref<288x256xbf16, #tpu.memory_space<vmem>>, vector<32x256xbf16>
    tpu.vector_store %arg13[%c224_130, %c0_131], %244 {strides = array<i32>} : memref<288x256xbf16, #tpu.memory_space<vmem>>, vector<32x256xbf16>,
    %c0_132 = arith.constant 0 : index
    %c145_133 = arith.constant 145 : index
    %246 = vector.load %arg12[%c0_132, %c145_133] : memref<32x512xf32, #tpu.memory_space<vmem>>, vector<32x256xf32>
    %c1_i32_134 = arith.constant 1 : i32
    %247 = vector.broadcast %c1_i32_134 : i32 to vector<1x256xi32>
    %248 = arith.addi %16, %247 : vector<1x256xi32>
    %c0_i32_135 = arith.constant 0 : i32
    %249 = vector.broadcast %c0_i32_135 : i32 to vector<1x256xi32>
    %250 = arith.cmpi sge, %248, %249 : vector<1x256xi32>
    %c1_i32_136 = arith.constant 1 : i32
    %251 = vector.broadcast %c1_i32_136 : i32 to vector<1x256xi32>
    %252 = arith.addi %16, %251 : vector<1x256xi32>
    %c15_i32_137 = arith.constant 15 : i32
    %253 = vector.broadcast %c15_i32_137 : i32 to vector<1x256xi32>
    %254 = arith.cmpi sle, %252, %253 : vector<1x256xi32>
    %255 = arith.andi %250, %254 : vector<1x256xi1>
    %cst_138 = arith.constant 0.000000e+00 : f32
    %256 = vector.broadcast %cst_138 : f32 to vector<32x256xf32>
    %257 = vector.shape_cast %255 : vector<1x256xi1> to vector<1x256xi1>
    %258 = vector.broadcast %257 : vector<1x256xi1> to vector<32x256xi1>
    %259 = arith.select %258, %246, %256 : vector<32x256xi1>, vector<32x256xf32>
    %260 = arith.truncf %259 : vector<32x256xf32> to vector<32x256xbf16>
    %c256_139 = arith.constant 256 : index
    %c0_140 = arith.constant 0 : index
    %261 = vector.load %arg13[%c256_139, %c0_140] : memref<288x256xbf16, #tpu.memory_space<vmem>>, vector<32x256xbf16>
    tpu.vector_store %arg13[%c256_139, %c0_140], %260 {strides = array<i32>} : memref<288x256xbf16, #tpu.memory_space<vmem>>, vector<32x256xbf16>,
    %c0_141 = arith.constant 0 : index
    %c0_142 = arith.constant 0 : index
    %262 = vector.load %arg4[%c0_141, %c0_142] : memref<32x288xbf16, #tpu.memory_space<vmem>>, vector<32x288xbf16>
    %c0_143 = arith.constant 0 : index
    %c0_144 = arith.constant 0 : index
    %263 = vector.load %arg13[%c0_143, %c0_144] : memref<288x256xbf16, #tpu.memory_space<vmem>>, vector<288x256xbf16>
    %cst_145 = arith.constant dense<0.000000e+00> : vector<32x256xf32>
    %264 = tpu.matmul %262, %263, %cst_145 {dimension_numbers = #tpu.dot_dimension_numbers<[1], [0], [0], [1], [0, 0, 1, 1], [], []>} : vector<32x288xbf16>, vector<288x256xbf16>, vector<32x256xf32> -> vector<32x256xf32>
    %c0_146 = arith.constant 0 : index
    %c0_147 = arith.constant 0 : index
    %265 = vector.load %arg5[%c0_146, %c0_147] : memref<32x1xf32, #tpu.memory_space<vmem>>, vector<32x1xf32>
    %266 = vector.broadcast %265 : vector<32x1xf32> to vector<32x256xf32>
    %267 = arith.addf %264, %266 : vector<32x256xf32>
    %cst_148 = arith.constant dense<0.000000e+00> : vector<32xf32>
    %268 = vector.multi_reduction <add>, %267, %cst_148 [1] : vector<32x256xf32> to vector<32xf32>
    %269 = vector.shape_cast %268 : vector<32xf32> to vector<32x1xf32>
    %cst_149 = arith.constant 2.560000e+02 : f32
    %270 = vector.broadcast %cst_149 : f32 to vector<32x1xf32>
    %271 = arith.divf %269, %270 : vector<32x1xf32>
    %272 = vector.broadcast %271 : vector<32x1xf32> to vector<32x256xf32>
    %273 = arith.subf %267, %272 : vector<32x256xf32>
    %274 = arith.mulf %273, %273 : vector<32x256xf32>
    %cst_150 = arith.constant dense<0.000000e+00> : vector<32xf32>
    %275 = vector.multi_reduction <add>, %274, %cst_150 [1] : vector<32x256xf32> to vector<32xf32>
    %276 = vector.shape_cast %275 : vector<32xf32> to vector<32x1xf32>
    %cst_151 = arith.constant 2.560000e+02 : f32
    %277 = vector.broadcast %cst_151 : f32 to vector<32x1xf32>
    %278 = arith.divf %276, %277 : vector<32x1xf32>
    %cst_152 = arith.constant 9.99999974E-6 : f32
    %279 = vector.broadcast %cst_152 : f32 to vector<32x1xf32>
    %280 = arith.addf %278, %279 : vector<32x1xf32>
    %281 = math.rsqrt %280 : vector<32x1xf32>
    %282 = vector.broadcast %281 : vector<32x1xf32> to vector<32x256xf32>
    %283 = arith.mulf %273, %282 : vector<32x256xf32>
    %cst_153 = arith.constant dense<0.000000e+00> : vector<32xf32>
    %284 = vector.multi_reduction <add>, %283, %cst_153 [1] : vector<32x256xf32> to vector<32xf32>
    %285 = vector.shape_cast %284 : vector<32xf32> to vector<32x1xf32>
    %cst_154 = arith.constant 2.560000e+02 : f32
    %286 = vector.broadcast %cst_154 : f32 to vector<32x1xf32>
    %287 = arith.divf %285, %286 : vector<32x1xf32>
    %c0_155 = arith.constant 0 : index
    %c0_156 = arith.constant 0 : index
    %288 = vector.load %arg6[%c0_155, %c0_156] : memref<32x2xf32, #tpu.memory_space<vmem>>, vector<32x2xf32>
    %289 = vector.broadcast %287 : vector<32x1xf32> to vector<32x2xf32>
    %290 = arith.mulf %288, %289 : vector<32x2xf32>
    %cst_157 = arith.constant dense<0.000000e+00> : vector<2xf32>
    %291 = vector.multi_reduction <add>, %290, %cst_157 [0] : vector<32x2xf32> to vector<2xf32>
    %292 = vector.shape_cast %291 : vector<2xf32> to vector<1x2xf32>
    %c0_158 = arith.constant 0 : index
    %c0_159 = arith.constant 0 : index
    %293 = vector.load %arg7[%c0_158, %c0_159] : memref<1x2xf32, #tpu.memory_space<vmem>>, vector<1x2xf32>
    %294 = arith.addf %292, %293 : vector<1x2xf32>
    %cst_160 = arith.constant 0.000000e+00 : f32
    %295 = vector.broadcast %cst_160 : f32 to vector<1x2xf32>
    %296 = arith.maximumf %294, %295 : vector<1x2xf32>
    %c0_161 = arith.constant 0 : index
    %c0_162 = arith.constant 0 : index
    %297 = vector.load %arg8[%c0_161, %c0_162] : memref<32x2xf32, #tpu.memory_space<vmem>>, vector<32x2xf32>
    %298 = vector.broadcast %296 : vector<1x2xf32> to vector<32x2xf32>
    %299 = arith.mulf %297, %298 : vector<32x2xf32>
    %cst_163 = arith.constant dense<0.000000e+00> : vector<32xf32>
    %300 = vector.multi_reduction <add>, %299, %cst_163 [1] : vector<32x2xf32> to vector<32xf32>
    %301 = vector.shape_cast %300 : vector<32xf32> to vector<32x1xf32>
    %c0_164 = arith.constant 0 : index
    %c0_165 = arith.constant 0 : index
    %302 = vector.load %arg9[%c0_164, %c0_165] : memref<32x1xf32, #tpu.memory_space<vmem>>, vector<32x1xf32>
    %303 = arith.addf %301, %302 : vector<32x1xf32>
    %304 = arith.negf %303 : vector<32x1xf32>
    %305 = math.exp %304 : vector<32x1xf32>
    %cst_166 = arith.constant 1.000000e+00 : f32
    %306 = vector.broadcast %cst_166 : f32 to vector<32x1xf32>
    %307 = arith.addf %306, %305 : vector<32x1xf32>
    %308 = arith.divf %306, %307 : vector<32x1xf32>
    %309 = vector.broadcast %308 : vector<32x1xf32> to vector<32x256xf32>
    %310 = arith.mulf %283, %309 : vector<32x256xf32>
    %311 = arith.addf %310, %22 : vector<32x256xf32>
    %c0_167 = arith.constant 0 : index
    %c128_168 = arith.constant 128 : index
    %312 = vector.load %arg12[%c0_167, %c128_168] : memref<32x512xf32, #tpu.memory_space<vmem>>, vector<32x256xf32>
    tpu.vector_store %arg12[%c0_167, %c128_168], %311 {strides = array<i32>} : memref<32x512xf32, #tpu.memory_space<vmem>>, vector<32x256xf32>,
    %c0_169 = arith.constant 0 : index
    %c0_170 = arith.constant 0 : index
    %313 = vector.load %arg10[%c0_169, %c0_170] : memref<5x256xf32, #tpu.memory_space<vmem>>, vector<1x256xf32>
    %c0_171 = arith.constant 0 : index
    %c96_172 = arith.constant 96 : index
    %314 = vector.load %arg12[%c0_171, %c96_172] : memref<32x512xf32, #tpu.memory_space<vmem>>, vector<32x256xf32>
    %315 = vector.broadcast %313 : vector<1x256xf32> to vector<32x256xf32>
    %316 = arith.mulf %315, %314 : vector<32x256xf32>
    %c1 = arith.constant 1 : index
    %c0_173 = arith.constant 0 : index
    %317 = vector.load %arg10[%c1, %c0_173] : memref<5x256xf32, #tpu.memory_space<vmem>>, vector<1x256xf32>
    %c0_174 = arith.constant 0 : index
    %c112_175 = arith.constant 112 : index
    %318 = vector.load %arg12[%c0_174, %c112_175] : memref<32x512xf32, #tpu.memory_space<vmem>>, vector<32x256xf32>
    %319 = vector.broadcast %317 : vector<1x256xf32> to vector<32x256xf32>
    %320 = arith.mulf %319, %318 : vector<32x256xf32>
    %321 = arith.addf %316, %320 : vector<32x256xf32>
    %c2 = arith.constant 2 : index
    %c0_176 = arith.constant 0 : index
    %322 = vector.load %arg10[%c2, %c0_176] : memref<5x256xf32, #tpu.memory_space<vmem>>, vector<1x256xf32>
    %c0_177 = arith.constant 0 : index
    %c128_178 = arith.constant 128 : index
    %323 = vector.load %arg12[%c0_177, %c128_178] : memref<32x512xf32, #tpu.memory_space<vmem>>, vector<32x256xf32>
    %324 = vector.broadcast %322 : vector<1x256xf32> to vector<32x256xf32>
    %325 = arith.mulf %324, %323 : vector<32x256xf32>
    %326 = arith.addf %321, %325 : vector<32x256xf32>
    %c3 = arith.constant 3 : index
    %c0_179 = arith.constant 0 : index
    %327 = vector.load %arg10[%c3, %c0_179] : memref<5x256xf32, #tpu.memory_space<vmem>>, vector<1x256xf32>
    %c0_180 = arith.constant 0 : index
    %c144_181 = arith.constant 144 : index
    %328 = vector.load %arg12[%c0_180, %c144_181] : memref<32x512xf32, #tpu.memory_space<vmem>>, vector<32x256xf32>
    %329 = vector.broadcast %327 : vector<1x256xf32> to vector<32x256xf32>
    %330 = arith.mulf %329, %328 : vector<32x256xf32>
    %331 = arith.addf %326, %330 : vector<32x256xf32>
    %c4 = arith.constant 4 : index
    %c0_182 = arith.constant 0 : index
    %332 = vector.load %arg10[%c4, %c0_182] : memref<5x256xf32, #tpu.memory_space<vmem>>, vector<1x256xf32>
    %c0_183 = arith.constant 0 : index
    %c160_184 = arith.constant 160 : index
    %333 = vector.load %arg12[%c0_183, %c160_184] : memref<32x512xf32, #tpu.memory_space<vmem>>, vector<32x256xf32>
    %334 = vector.broadcast %332 : vector<1x256xf32> to vector<32x256xf32>
    %335 = arith.mulf %334, %333 : vector<32x256xf32>
    %336 = arith.addf %331, %335 : vector<32x256xf32>
    %c0_185 = arith.constant 0 : index
    %c128_186 = arith.constant 128 : index
    %337 = vector.load %arg12[%c0_185, %c128_186] : memref<32x512xf32, #tpu.memory_space<vmem>>, vector<32x256xf32>
    tpu.vector_store %arg12[%c0_185, %c128_186], %336 {strides = array<i32>} : memref<32x512xf32, #tpu.memory_space<vmem>>, vector<32x256xf32>,
    %c0_187 = arith.constant 0 : index
    %c0_188 = arith.constant 0 : index
    %338 = vector.load %arg10[%c0_187, %c0_188] : memref<5x256xf32, #tpu.memory_space<vmem>>, vector<1x256xf32>
    %c0_189 = arith.constant 0 : index
    %c126 = arith.constant 126 : index
    %339 = vector.load %arg12[%c0_189, %c126] : memref<32x512xf32, #tpu.memory_space<vmem>>, vector<32x256xf32>
    %c-2_i32 = arith.constant -2 : i32
    %340 = vector.broadcast %c-2_i32 : i32 to vector<1x256xi32>
    %341 = arith.addi %16, %340 : vector<1x256xi32>
    %c0_i32_190 = arith.constant 0 : i32
    %342 = vector.broadcast %c0_i32_190 : i32 to vector<1x256xi32>
    %343 = arith.cmpi sge, %341, %342 : vector<1x256xi32>
    %c-2_i32_191 = arith.constant -2 : i32
    %344 = vector.broadcast %c-2_i32_191 : i32 to vector<1x256xi32>
    %345 = arith.addi %16, %344 : vector<1x256xi32>
    %c15_i32_192 = arith.constant 15 : i32
    %346 = vector.broadcast %c15_i32_192 : i32 to vector<1x256xi32>
    %347 = arith.cmpi sle, %345, %346 : vector<1x256xi32>
    %348 = arith.andi %343, %347 : vector<1x256xi1>
    %cst_193 = arith.constant 0.000000e+00 : f32
    %349 = vector.broadcast %cst_193 : f32 to vector<32x256xf32>
    %350 = vector.shape_cast %348 : vector<1x256xi1> to vector<1x256xi1>
    %351 = vector.broadcast %350 : vector<1x256xi1> to vector<32x256xi1>
    %352 = arith.select %351, %339, %349 : vector<32x256xi1>, vector<32x256xf32>
    %353 = vector.broadcast %338 : vector<1x256xf32> to vector<32x256xf32>
    %354 = arith.mulf %353, %352 : vector<32x256xf32>
    %c1_194 = arith.constant 1 : index
    %c0_195 = arith.constant 0 : index
    %355 = vector.load %arg10[%c1_194, %c0_195] : memref<5x256xf32, #tpu.memory_space<vmem>>, vector<1x256xf32>
    %c0_196 = arith.constant 0 : index
    %c127_197 = arith.constant 127 : index
    %356 = vector.load %arg12[%c0_196, %c127_197] : memref<32x512xf32, #tpu.memory_space<vmem>>, vector<32x256xf32>
    %c-1_i32_198 = arith.constant -1 : i32
    %357 = vector.broadcast %c-1_i32_198 : i32 to vector<1x256xi32>
    %358 = arith.addi %16, %357 : vector<1x256xi32>
    %c0_i32_199 = arith.constant 0 : i32
    %359 = vector.broadcast %c0_i32_199 : i32 to vector<1x256xi32>
    %360 = arith.cmpi sge, %358, %359 : vector<1x256xi32>
    %c-1_i32_200 = arith.constant -1 : i32
    %361 = vector.broadcast %c-1_i32_200 : i32 to vector<1x256xi32>
    %362 = arith.addi %16, %361 : vector<1x256xi32>
    %c15_i32_201 = arith.constant 15 : i32
    %363 = vector.broadcast %c15_i32_201 : i32 to vector<1x256xi32>
    %364 = arith.cmpi sle, %362, %363 : vector<1x256xi32>
    %365 = arith.andi %360, %364 : vector<1x256xi1>
    %cst_202 = arith.constant 0.000000e+00 : f32
    %366 = vector.broadcast %cst_202 : f32 to vector<32x256xf32>
    %367 = vector.shape_cast %365 : vector<1x256xi1> to vector<1x256xi1>
    %368 = vector.broadcast %367 : vector<1x256xi1> to vector<32x256xi1>
    %369 = arith.select %368, %356, %366 : vector<32x256xi1>, vector<32x256xf32>
    %370 = vector.broadcast %355 : vector<1x256xf32> to vector<32x256xf32>
    %371 = arith.mulf %370, %369 : vector<32x256xf32>
    %372 = arith.addf %354, %371 : vector<32x256xf32>
    %c2_203 = arith.constant 2 : index
    %c0_204 = arith.constant 0 : index
    %373 = vector.load %arg10[%c2_203, %c0_204] : memref<5x256xf32, #tpu.memory_space<vmem>>, vector<1x256xf32>
    %c0_205 = arith.constant 0 : index
    %c128_206 = arith.constant 128 : index
    %374 = vector.load %arg12[%c0_205, %c128_206] : memref<32x512xf32, #tpu.memory_space<vmem>>, vector<32x256xf32>
    %375 = vector.broadcast %373 : vector<1x256xf32> to vector<32x256xf32>
    %376 = arith.mulf %375, %374 : vector<32x256xf32>
    %377 = arith.addf %372, %376 : vector<32x256xf32>
    %c3_207 = arith.constant 3 : index
    %c0_208 = arith.constant 0 : index
    %378 = vector.load %arg10[%c3_207, %c0_208] : memref<5x256xf32, #tpu.memory_space<vmem>>, vector<1x256xf32>
    %c0_209 = arith.constant 0 : index
    %c129_210 = arith.constant 129 : index
    %379 = vector.load %arg12[%c0_209, %c129_210] : memref<32x512xf32, #tpu.memory_space<vmem>>, vector<32x256xf32>
    %c1_i32_211 = arith.constant 1 : i32
    %380 = vector.broadcast %c1_i32_211 : i32 to vector<1x256xi32>
    %381 = arith.addi %16, %380 : vector<1x256xi32>
    %c0_i32_212 = arith.constant 0 : i32
    %382 = vector.broadcast %c0_i32_212 : i32 to vector<1x256xi32>
    %383 = arith.cmpi sge, %381, %382 : vector<1x256xi32>
    %c1_i32_213 = arith.constant 1 : i32
    %384 = vector.broadcast %c1_i32_213 : i32 to vector<1x256xi32>
    %385 = arith.addi %16, %384 : vector<1x256xi32>
    %c15_i32_214 = arith.constant 15 : i32
    %386 = vector.broadcast %c15_i32_214 : i32 to vector<1x256xi32>
    %387 = arith.cmpi sle, %385, %386 : vector<1x256xi32>
    %388 = arith.andi %383, %387 : vector<1x256xi1>
    %cst_215 = arith.constant 0.000000e+00 : f32
    %389 = vector.broadcast %cst_215 : f32 to vector<32x256xf32>
    %390 = vector.shape_cast %388 : vector<1x256xi1> to vector<1x256xi1>
    %391 = vector.broadcast %390 : vector<1x256xi1> to vector<32x256xi1>
    %392 = arith.select %391, %379, %389 : vector<32x256xi1>, vector<32x256xf32>
    %393 = vector.broadcast %378 : vector<1x256xf32> to vector<32x256xf32>
    %394 = arith.mulf %393, %392 : vector<32x256xf32>
    %395 = arith.addf %377, %394 : vector<32x256xf32>
    %c4_216 = arith.constant 4 : index
    %c0_217 = arith.constant 0 : index
    %396 = vector.load %arg10[%c4_216, %c0_217] : memref<5x256xf32, #tpu.memory_space<vmem>>, vector<1x256xf32>
    %c0_218 = arith.constant 0 : index
    %c130 = arith.constant 130 : index
    %397 = vector.load %arg12[%c0_218, %c130] : memref<32x512xf32, #tpu.memory_space<vmem>>, vector<32x256xf32>
    %c2_i32 = arith.constant 2 : i32
    %398 = vector.broadcast %c2_i32 : i32 to vector<1x256xi32>
    %399 = arith.addi %16, %398 : vector<1x256xi32>
    %c0_i32_219 = arith.constant 0 : i32
    %400 = vector.broadcast %c0_i32_219 : i32 to vector<1x256xi32>
    %401 = arith.cmpi sge, %399, %400 : vector<1x256xi32>
    %c2_i32_220 = arith.constant 2 : i32
    %402 = vector.broadcast %c2_i32_220 : i32 to vector<1x256xi32>
    %403 = arith.addi %16, %402 : vector<1x256xi32>
    %c15_i32_221 = arith.constant 15 : i32
    %404 = vector.broadcast %c15_i32_221 : i32 to vector<1x256xi32>
    %405 = arith.cmpi sle, %403, %404 : vector<1x256xi32>
    %406 = arith.andi %401, %405 : vector<1x256xi1>
    %cst_222 = arith.constant 0.000000e+00 : f32
    %407 = vector.broadcast %cst_222 : f32 to vector<32x256xf32>
    %408 = vector.shape_cast %406 : vector<1x256xi1> to vector<1x256xi1>
    %409 = vector.broadcast %408 : vector<1x256xi1> to vector<32x256xi1>
    %410 = arith.select %409, %397, %407 : vector<32x256xi1>, vector<32x256xf32>
    %411 = vector.broadcast %396 : vector<1x256xf32> to vector<32x256xf32>
    %412 = arith.mulf %411, %410 : vector<32x256xf32>
    %413 = arith.addf %395, %412 : vector<32x256xf32>
    %cst_223 = arith.constant 0.000000e+00 : f32
    %414 = vector.broadcast %cst_223 : f32 to vector<32x256xf32>
    %415 = arith.cmpf ogt, %413, %414 : vector<32x256xf32>
    %cst_224 = arith.constant 2.000000e-01 : f32
    %416 = vector.broadcast %cst_224 : f32 to vector<32x256xf32>
    %417 = arith.mulf %416, %413 : vector<32x256xf32>
    %418 = arith.select %415, %413, %417 : vector<32x256xi1>, vector<32x256xf32>
    %c0_225 = arith.constant 0 : index
    %c0_226 = arith.constant 0 : index
    %c0_227 = arith.constant 0 : index
    %419 = vector.load %arg11[%c0_225, %c0_226, %c0_227] : memref<1x32x256xf32, #tpu.memory_space<vmem>>, vector<1x32x256xf32>
    %420 = vector.shape_cast %419 : vector<1x32x256xf32> to vector<32x256xf32>
    %421 = vector.shape_cast %418 : vector<32x256xf32> to vector<1x32x256xf32>
    tpu.vector_store %arg11[%c0_225, %c0_226, %c0_227], %421 {strides = array<i32>} : memref<1x32x256xf32, #tpu.memory_space<vmem>>, vector<1x32x256xf32>,
    return
  }
  func.func @transform_0(%arg0: i32) -> (i32, i32, i32) {
    %c0_i32 = arith.constant 0 : i32
    %c0_i32_0 = arith.constant 0 : i32
    %c0_i32_1 = arith.constant 0 : i32
    return %arg0, %c0_i32, %c0_i32_0 : i32, i32, i32
  }
  func.func @transform_1(%arg0: i32) -> (i32, i32) {
    %c0_i32 = arith.constant 0 : i32
    %c0_i32_0 = arith.constant 0 : i32
    %c0_i32_1 = arith.constant 0 : i32
    return %c0_i32, %c0_i32_0 : i32, i32
  }
  func.func @transform_2(%arg0: i32) -> (i32, i32) {
    %c0_i32 = arith.constant 0 : i32
    %c0_i32_0 = arith.constant 0 : i32
    %c0_i32_1 = arith.constant 0 : i32
    return %c0_i32, %c0_i32_0 : i32, i32
  }
  func.func @transform_3(%arg0: i32) -> (i32, i32) {
    %c0_i32 = arith.constant 0 : i32
    %c0_i32_0 = arith.constant 0 : i32
    %c0_i32_1 = arith.constant 0 : i32
    return %c0_i32, %c0_i32_0 : i32, i32
  }
  func.func @transform_4(%arg0: i32) -> (i32, i32) {
    %c0_i32 = arith.constant 0 : i32
    %c0_i32_0 = arith.constant 0 : i32
    %c0_i32_1 = arith.constant 0 : i32
    return %c0_i32, %c0_i32_0 : i32, i32
  }
  func.func @transform_5(%arg0: i32) -> (i32, i32) {
    %c0_i32 = arith.constant 0 : i32
    %c0_i32_0 = arith.constant 0 : i32
    %c0_i32_1 = arith.constant 0 : i32
    return %c0_i32, %c0_i32_0 : i32, i32
  }
  func.func @transform_6(%arg0: i32) -> (i32, i32) {
    %c0_i32 = arith.constant 0 : i32
    %c0_i32_0 = arith.constant 0 : i32
    %c0_i32_1 = arith.constant 0 : i32
    return %c0_i32, %c0_i32_0 : i32, i32
  }
  func.func @transform_7(%arg0: i32) -> (i32, i32) {
    %c0_i32 = arith.constant 0 : i32
    %c0_i32_0 = arith.constant 0 : i32
    %c0_i32_1 = arith.constant 0 : i32
    return %c0_i32, %c0_i32_0 : i32, i32
  }
  func.func @transform_8(%arg0: i32) -> (i32, i32) {
    %c0_i32 = arith.constant 0 : i32
    %c0_i32_0 = arith.constant 0 : i32
    %c0_i32_1 = arith.constant 0 : i32
    return %c0_i32, %c0_i32_0 : i32, i32
  }
  func.func @transform_9(%arg0: i32) -> (i32, i32) {
    %c0_i32 = arith.constant 0 : i32
    %c0_i32_0 = arith.constant 0 : i32
    %c0_i32_1 = arith.constant 0 : i32
    return %c0_i32, %c0_i32_0 : i32, i32
  }
  func.func @transform_10(%arg0: i32) -> (i32, i32, i32) {
    %c0_i32 = arith.constant 0 : i32
    %c0_i32_0 = arith.constant 0 : i32
    %c0_i32_1 = arith.constant 0 : i32
    return %arg0, %c0_i32, %c0_i32_0 : i32, i32, i32
  }
}

</mosaic_0001>

<bundles_post_ra>
// kernel: tpu_custom_call.1
= control target key start
LH: loop header
LB: loop body
LE: loop exit
PB: predicated region body
PF: predicated region fallthrough
CT: control target
= control target key end

     0   :  { %s6841_s0 = inlined_call_operand.vmem [shape: f32[2,32,256], index: 0, kind: input, shape index: {}]   ;;  %s6842_s1 = inlined_call_operand.hbm [shape: bf16[32,288], index: 1, kind: input, shape index: {}]   ;;  %s6843_s2 = inlined_call_operand.vmem [shape: f32[32,1], index: 2, kind: input, shape index: {}]   ;;  %s6844_s3 = inlined_call_operand.hbm [shape: bf16[32,288], index: 3, kind: input, shape index: {}]   ;;  %s6845_s4 = inlined_call_operand.vmem [shape: f32[32,1], index: 4, kind: input, shape index: {}]   ;;  %s6846_s5 = inlined_call_operand.vmem [shape: f32[32,2], index: 5, kind: input, shape index: {}]   ;;  %s6847_s6 = inlined_call_operand.vmem [shape: f32[1,2], index: 6, kind: input, shape index: {}]   ;;  %s6848_s7 = inlined_call_operand.vmem [shape: f32[32,2], index: 7, kind: input, shape index: {}]   ;;  %s6849_s8 = inlined_call_operand.vmem [shape: f32[32,1], index: 8, kind: input, shape index: {}]   ;;  %s6850_s9 = inlined_call_operand.vmem [shape: f32[5,256], index: 9, kind: input, shape index: {}]   ;;  %s6851_s10 = inlined_call_operand.hbm [shape: f32[2,32,256], index: 10, kind: output, shape index: {}]  }
   0x1   :  { %6877 = sst [smem:[#allocation13_spill]] %s6841_s0 }
   0x2   :  { %6878 = sst [smem:[#allocation14_spill]] %s6842_s1 }
   0x3   :  { %15 = vsyncpa [#allocation5], 0 }
   0x4   :  { %16 = vsyncpa [#allocation8], 0 }
   0x5   :  { %17 = vsyncpa [#allocation6], 0 }
   0x6   :  { %19 = vsyncpa [#allocation6 + $0x1], 0  ;;  %s5314_s13 = smov 0   ;;  %s5316_s14 = smov 0  }
   0x7   :  { %s5318_s15 = smov 0   ;;  %s5320_s16 = smov 0  }
   0x8 LB: > { %s5335_s17 = sadd.s32 4294967295, %s5236_s16   ;;  %s4046_s18 = sadd.s32 4294967294, %s5236_s16   ;;  %s5236_s16 = sphi %s5320_s16, %s6967_s16   ;;  %s5232_s15 = sphi %s5318_s15, %s6966_s15   ;;  %s5228_s14 = sphi %s5316_s14, %s6965_s14   ;;  %s5224_s13 = sphi %s5314_s13, %s6964_s13  }
   0x9   : > { %s5339_s19 = sadd.s32 1, %s5236_s16   ;;  %s247_s20 = sadd.s32 1, %s5232_s15 }
   0xa   : > { %s244_s21 = ssub.s32 %s5236_s16, %s5339_s19  ;;  %p257_p0 = scmp.ne.s32.totalorder %s5232_s15, %s5228_s14 }
   0xb   : > { %p245_p1 = scmp.eq.s32.totalorder %s244_s21, 0  ;;  %p258_p2 = scmp.eq.s32.totalorder %s5335_s17, 1 }
   0xc   : > { %p263_p3 = scmp.ne.s32.totalorder %s5228_s14, %s5224_s13  ;;  %p264_p4 = scmp.eq.s32.totalorder %s4046_s18, 1 }
   0xd   : > { %s5350_s22 = scalar_select %p245_p1, %s5232_s15, %s247_s20  }
   0xe   : > { %p5352_p5 = por %p258_p2, %p257_p0  ;;  %p5356_p6 = por %p264_p4, %p263_p3 }
   0xf   : > { %p4047_p7 = scmp.ge.s32.totalorder %s5236_s16, 1  ;;  %p271_p8 = scmp.lt.s32.totalorder %s5236_s16, 3 }
  0x10   : > { %s6880_s24 = scalar_select %p5356_p6, 1, 0 }
  0x11   : > { %p6852_p9 = scmp.eq.s32.totalorder %s5335_s17, 0  ;;  %p5363_p10 = pnand %p4047_p7, %p271_p8 }
  0x12   : > { %s5238_s26 = smov [#allocation4]   ;;  %s5239_s29 = smov [#allocation7]  }
  0x13   : > { %s283_s27 = sshll.u32 %s5238_s26, 4  ;;  %p4550_p11 = pneg %p5363_p10  ;;  %s284_s27 = int_to_ptr.vmem [resolvable:$true] %s283_s27 }
  0x14   : > { %s299_s30 = sshll.u32 %s5239_s29, 4  ;;  %s5127_s11 = scalar_lea.vmem %s284_s27, 768  ;;  %s300_s30 = int_to_ptr.vmem [resolvable:$true] %s299_s30 }
  0x15   : > { %p5371_p12 = pnand %p6852_p9, %p4550_p11  ;;  %p5128_p0 = scmp.ne.s32.totalorder %s284_s27, %s5127_s11 }
  0x16   : > { %p5135_p3 = scmp.lt.s32.totalorder %s284_s27, %s284_s27  ;;  %p5136_p4 = scmp.lt.s32.totalorder %s5127_s11, %s5127_s11 }
  0x17   : > { %p5118_p13 = pneg %p5371_p12 }
  0x18   : > { %p5137_p7 = por %p5136_p4, %p5135_p3 }
  0x19   : > { %p5130_p1 = pnand %p5128_p0, %p5118_p13 }
  0x1b   : > { %p5131_p2 = pneg %p5130_p1 }
  0x1d   : > { %p5138_p8 = pnand %p5137_p7, %p5131_p2 }
  0x1f   : > { %5141 = shalt.err (!%p5138_p8)
}
  0x20   : > { %s5240_s12 = smov 192   ;;  %s5241_s18 = smov 12  }
  0x21   : > { %s6883_s1 = sld [smem:[#allocation14_spill]]  ;;  %s5153_s26 = scalar_lea.vmem %s300_s30, 768 }
  0x22   : > { %p5154_p11 = scmp.ne.s32.totalorder %s300_s30, %s5153_s26  ;;  %p5161_p9 = scmp.lt.s32.totalorder %s300_s30, %s300_s30 }
  0x23   : > { %p5162_p6 = scmp.lt.s32.totalorder %s5153_s26, %s5153_s26 }
  0x24   : > { %p5156_p0 = pnand %p5154_p11, %p5118_p13 }
  0x25   : > { %p5163_p3 = por %p5162_p6, %p5161_p9 }
  0x26   : > { %p5157_p1 = pneg %p5156_p0 }
  0x27   : > { %4553 = dma.hbm_to_vmem [thread:$0]  (!%p5371_p12), %s6883_s1, 768, %s284_s27, [#allocation5], %s5240_s12, %s5240_s12, %s5241_s18  }
  0x28   : > { %p5164_p2 = pnand %p5163_p3, %p5157_p1 }
  0x2a   : > { %5167 = shalt.err (!%p5164_p2)
}
  0x2b   : > { %4556 = dma.hbm_to_vmem [thread:$0]  (!%p5371_p12), %s6844_s3, 768, %s300_s30, [#allocation8], %s5240_s12, %s5240_s12, %s5241_s18  }
  0x2c   : > { %341 = sbr.rel (%p5363_p10) target bundleno = 2380 (0x94c), region = 60  ;;  %p6884_p4 = scmp.eq.s32.totalorder (!%p5363_p10), %s5335_s17, 0 }
  0x31   : > { %5211 = dma.done.wait (%p6884_p4), [#allocation5], 768   ;;  %p6885_p13 = pmov %p6884_p4 }
  0x32   : > { %p6886_p7 = pmov %p6884_p4 }
  0x33   : > { %5213 = vsyncadd (%p6885_p13), [#allocation5], 4294966528 }
  0x34   : > { %5215 = dma.done.wait (%p6886_p7), [#allocation8], 768   ;;  %p6887_p6 = pmov %p6884_p4 }
  0x35   : > { %p383_p9 = scmp.lt.s32.totalorder %s5335_s17, 1  ;;  %v5242_v0 = vmov 0.0   ;;  %s6873_s28 = smov 1   ;;  %v5247_v21 = vmov 0.0|0.0   ;;  %v5062_v32 = vld [vmem:[#allocation4 + $0x4] ss:$12 sps:$4 sm:$0xff]   ;;  %v389_v34 = vlaneseq }
  0x36   : > { %5217 = vsyncadd (%p6887_p6), [#allocation8], 4294966528  ;;  %4619 = vrot.lane.b32.xlu1 %v5242_v0, %s6873_s28  ;;  %s6888_s0 = sld [smem:[#allocation13_spill]]  ;;  %s6863_s20 = smov 15   ;;  %1594 = vmatprep.mubr.bf16.mxu0 %v5062_v32  ;;  %v5252_v33 = vmov 0   ;;  %v1324_v36 = vld [vmem:[%s6843_s2 + $0x18] sm:$0xff] }
  0x37   : > { %s384_s27 = scalar_select %p383_p9, %s5335_s17, 1  ;;  %1647 = vmatprep.mubr.bf16.mxu1 %v5252_v33  ;;  %4799 = vset.pattern.permute.xlu1 %v5252_v33  ;;  %v390_v35 = vand.u32 127, %v389_v34  ;;  %v1323_v37 = vld [vmem:[%s6843_s2 + $0x10] sm:$0xff]  ;;  %v1321_v39 = vld [vmem:[%s6843_s2] sm:$0xff]  ;;  %v1322_v40 = vld [vmem:[%s6843_s2 + $0x8] sm:$0xff]  ;;  %vm800_vm0 = vcmask 7168  }
  0x38   : > { %s6861_s21 = smov 16   ;;  %s6859_s26 = smov 17   ;;  %4798 = vset.pattern.permute.xlu0 %v5252_v33  ;;  %vm699_vm5 = vcmask 121856   ;;  %vm621_vm10 = vcmask 1043456   ;;  %vm623_vm11 = vcmask 130048   ;;  %vm500_vm12 = vcmask 138240  }
  0x39   : > { %s4250_s25 = sshll.u32 %s384_s27, 6  ;;  %s6857_s29 = smov 112   ;;  %v391_v38 = vadd.s32 128, %v390_v35  ;;  %v5558_v44 = vand.u32 15, %v390_v35  ;;  %vm1160_vm13 = vcmask 916480   ;;  %vm6872_vm14 = vcmask 924672  }
  0x3a   : > { %4624 = vrot.lane.b32.xlu1 %v5242_v0, %s6873_s28  ;;  %s6855_s11 = smov 113   ;;  %s6853_s27 = smov 127   ;;  %vm6871_vm15 = vcmask 1039360  }
  0x3b   : > { %v5556_v42 = vand.u32 15, %v391_v38  ;;  %v5564_v48 = vadd.s32 4294967295, %v5558_v44  ;;  %s5254_s1 = smov 96  }
  0x3c   : > { %s5410_s18 = scalar_lea.vmem %s6888_s0, %s4250_s25  ;;  %s5251_s25 = smov 111  }
  0x3d   : > { %v5415_v1 = vld [vmem:[%s5410_s18 + $0x20] sm:$0xff]  ;;  %v5418_v2 = vld [vmem:[%s5410_s18 + $0x28] sm:$0xff]  ;;  %v5429_v6 = vld [vmem:[%s5410_s18 + $0x30] sm:$0xff]  ;;  %v5561_v46 = vadd.s32 4294967295, %v5556_v42  ;;  %vm6868_vm2 = vcmp.ge.s32.totalorder %v5564_v48, 0  ;;  %v5569_v60 = vadd.s32 1, %v5556_v42 }
  0x3e   : > { %v5421_v3 = vld [vmem:[%s5410_s18] sm:$0xff]  ;;  %v4628_v4 = vpack.i.bf16 %v5418_v2, %v5415_v1  ;;  %v5426_v5 = vld [vmem:[%s5410_s18 + $0x8] sm:$0xff]  ;;  %v5432_v7 = vld [vmem:[%s5410_s18 + $0x38] sm:$0xff]  ;;  %v4259_v13 = vpack.c.bf16 %v5415_v1, %v5242_v0  ;;  %v4261_v14 = vpack.c.bf16 %v5429_v6, %v5242_v0  ;;  %v4260_v15 = vpack.c.bf16 %v5418_v2, %v5418_v2  ;;  %s6875_s0 = smov 32  }
  0x3f   : > { %v4638_v8 = vpack.i.bf16 %v5426_v5, %v5421_v3  ;;  %v5437_v9 = vld [vmem:[%s5410_s18 + $0x10] sm:$0xff]  ;;  %v5440_v10 = vld [vmem:[%s5410_s18 + $0x18] sm:$0xff]  ;;  %v4633_v11 = vpack.i.bf16 %v5432_v7, %v5429_v6  ;;  %v4256_v16 = vpack.c.bf16 %v5426_v5, %v5426_v5  ;;  %v4262_v17 = vpack.c.bf16 %v5432_v7, %v5432_v7  ;;  %vm5586_vm4 = vmpackc.low %vm6868_vm2, %vm6868_vm2 }
  0x40   : > { %4629 = vrot.lane.b32.xlu0 %v4628_v4, %s6873_s28  ;;  %v4643_v12 = vpack.i.bf16 %v5440_v10, %v5437_v9  ;;  %v4258_v18 = vpack.c.bf16 %v5440_v10, %v5440_v10  ;;  %v4255_v19 = vpack.c.bf16 %v5421_v3, %v5242_v0  ;;  %v4257_v20 = vpack.c.bf16 %v5437_v9, %v5242_v0 }
  0x41   : > { %4639 = vrot.lane.b32.xlu1 %v4638_v8, %s6873_s28  ;;  %v4273_v22 = vpack.c.bf16 %v5418_v2, %v5415_v1  ;;  %v4274_v23 = vpack.c.bf16 %v5432_v7, %v5429_v6  ;;  %v4271_v24 = vpack.c.bf16 %v5426_v5, %v5421_v3  ;;  %v4713_v25 = vpack.i.bf16 %v5242_v0, %v5432_v7 }
  0x42   : > { %v4272_v26 = vpack.c.bf16 %v5440_v10, %v5437_v9  ;;  %v4723_v27 = vpack.i.bf16 %v5242_v0, %v5426_v5  ;;  %v4708_v28 = vpack.i.bf16 %v5242_v0, %v5418_v2  ;;  %v4733_v29 = vpack.i.bf16 %v5437_v9, %v5421_v3 }
  0x43   : > { %v4718_v30 = vpack.i.bf16 %v5429_v6, %v5415_v1  ;;  %v4728_v31 = vpack.i.bf16 %v5242_v0, %v5440_v10  ;;  %vm6867_vm1 = vcmp.ge.s32.totalorder %v5561_v46, 0  ;;  %vm6866_vm6 = vcmp.le.s32.totalorder %v5569_v60, 15 }
  0x44   : > { %4634 = vrot.lane.b32.xlu0 %v4633_v11, %s6873_s28  ;;  %vm5576_vm3 = vmpackc.low %vm6867_vm1, %vm6867_vm1 }
  0x45   : > { %4654 = vrot.lane.b32.xlu1 %v4633_v11, %s6863_s20  ;;  %vm5610_vm7 = vmpackc.low %vm6866_vm6, %vm6866_vm6  ;;  %vm6869_vm6 = vcmask 261120  }
  0x48   : > { %4644 = vrot.lane.b32.xlu0 %v4643_v12, %s6873_s28 }
  0x49   : > { %4664 = vrot.lane.b32.xlu1 %v4638_v8, %s6863_s20 }
  0x4c   : > { %4649 = vrot.lane.b32.xlu0 %v4628_v4, %s6863_s20 }
  0x4d   : > { %605 = vrot.lane.b32.xlu1 %v4259_v13, %s6861_s21 }
  0x50   : > { %4659 = vrot.lane.b32.xlu0 %v5242_v0, %s6863_s20 }
  0x51   : > { %609 = vrot.lane.b32.xlu1 %v4261_v14, %s6861_s21 }
  0x54   : > { %4669 = vrot.lane.b32.xlu0 %v4643_v12, %s6863_s20 }
  0x55   : > { %4674 = vrot.lane.b32.xlu1 %v5242_v0, %s6863_s20  ;;  %s6897_s20 = smov 15  }
  0x58   : > { %607 = vrot.lane.b32.xlu0 %v4260_v15, %s6861_s21 }
  0x59   : > { %599 = vrot.lane.b32.xlu1 %v4256_v16, %s6861_s21 }
  0x5c   : > { %611 = vrot.lane.b32.xlu0 %v4262_v17, %s6861_s21 }
  0x5d   : > { %603 = vrot.lane.b32.xlu1 %v4258_v18, %s6861_s21 }
  0x60   : > { %597 = vrot.lane.b32.xlu0 %v4255_v19, %s6861_s21 }
  0x61   : > { %4684 = vrot.lane.b32.xlu1 %v4633_v11, %s6859_s26 }
  0x64   : > { %601 = vrot.lane.b32.xlu0 %v4257_v20, %s6861_s21  ;;  %s6898_s21 = smov 16  }
  0x65   : > { %4694 = vrot.lane.b32.xlu1 %v4638_v8, %s6859_s26 }
  0x68   : > { %4679 = vrot.lane.b32.xlu0 %v4628_v4, %s6859_s26 }
  0x69   : > { %4704 = vrot.lane.b32.xlu1 %v5242_v0, %s6859_s26 }
  0x6c   : > { %4689 = vrot.lane.b32.xlu0 %v5242_v0, %s6859_s26 }
  0x6d   : > { %1145 = vrot.lane.b32.xlu1 %v5247_v21, %s6857_s29 }
  0x70   : > { %4699 = vrot.lane.b32.xlu0 %v4643_v12, %s6859_s26  ;;  %s6899_s26 = smov 17  }
  0x71   : > { %1149 = vrot.lane.b32.xlu1 %v5247_v21, %s6857_s29 }
  0x74   : > { %1143 = vrot.lane.b32.xlu0 %v4273_v22, %s6857_s29 }
  0x75   : > { %1137 = vrot.lane.b32.xlu1 %v5247_v21, %s6857_s29 }
  0x78   : > { %1147 = vrot.lane.b32.xlu0 %v4274_v23, %s6857_s29 }
  0x79   : > { %1141 = vrot.lane.b32.xlu1 %v5247_v21, %s6857_s29 }
  0x7c   : > { %1135 = vrot.lane.b32.xlu0 %v4271_v24, %s6857_s29 }
  0x7d   : > { %4714 = vrot.lane.b32.xlu1 %v4713_v25, %s6855_s11 }
  0x80   : > { %1139 = vrot.lane.b32.xlu0 %v4272_v26, %s6857_s29  ;;  %s6900_s29 = smov 112  }
  0x81   : > { %4724 = vrot.lane.b32.xlu1 %v4723_v27, %s6855_s11 }
  0x84   : > { %4709 = vrot.lane.b32.xlu0 %v4708_v28, %s6855_s11 }
  0x85   : > { %4734 = vrot.lane.b32.xlu1 %v4733_v29, %s6855_s11 }
  0x88   : > { %4719 = vrot.lane.b32.xlu0 %v4718_v30, %s6855_s11 }
  0x89   : > { %4744 = vrot.lane.b32.xlu1 %v4713_v25, %s6853_s27 }
  0x8c   : > { %4729 = vrot.lane.b32.xlu0 %v4728_v31, %s6855_s11  ;;  %s6901_s11 = smov 113  }
  0x8d   : > { %4754 = vrot.lane.b32.xlu1 %v4723_v27, %s6853_s27 }
  0x90   : > { %4739 = vrot.lane.b32.xlu0 %v4708_v28, %s6853_s27 }
  0x91   : > { %4764 = vrot.lane.b32.xlu1 %v4733_v29, %s6853_s27 }
  0x94   : > { %4749 = vrot.lane.b32.xlu0 %v4718_v30, %s6853_s27 }
  0x95   : > { %4774 = vrot.lane.b32.xlu1 %v4713_v25, %s5251_s25 }
  0x98   : > { %4759 = vrot.lane.b32.xlu0 %v4728_v31, %s6853_s27  ;;  %s6902_s27 = smov 127  }
  0x99   : > { %4784 = vrot.lane.b32.xlu1 %v4723_v27, %s5251_s25 }
  0x9c   : > { %4769 = vrot.lane.b32.xlu0 %v4708_v28, %s5251_s25 }
  0x9d   : > { %4794 = vrot.lane.b32.xlu1 %v4733_v29, %s5251_s25  ;;  %v5599_v29 = vadd.s32 1, %v5558_v44 }
  0x9f   : > { %vm6865_vm8 = vcmp.le.s32.totalorder %v5599_v29, 15 }
  0xa0   : > { %4779 = vrot.lane.b32.xlu0 %v4718_v30, %s5251_s25  ;;  %vm5622_vm9 = vmpackc.low %vm6865_vm8, %vm6865_vm8  ;;  %vm6870_vm8 = vcmask 908288  }
  0xa1   : > { %1342 = vperm.xlu1 %4799, %v1324_v36  }
  0xa4   : > { %4789 = vrot.lane.b32.xlu0 %v4728_v31, %s5251_s25 }
  0xa5   : > { %1327 = vperm.xlu1 %4799, %v1321_v39  }
  0xa8   : > { %1337 = vperm.xlu0 %4798, %v1323_v37   ;;  %v4620_v41 = vpop.permute.xlu1 %4619 }
  0xa9   : > { %v4621_v49 = vunpack.i.l.bf16 %v4620_v41  ;;  %v4622_v54 = vunpack.i.h.bf16 %v4620_v41 }
  0xac   : > { %1332 = vperm.xlu0 %4798, %v1322_v40   ;;  %v4625_v43 = vpop.permute.xlu1 %4624 }
  0xad   : > { %v4626_v58 = vunpack.i.l.bf16 %v4625_v43  ;;  %v4627_v11 = vunpack.i.h.bf16 %v4625_v43 }
  0xb2   : > { %v4630_v45 = vpop.permute.xlu0 %4629 }
  0xb3   : > { %v4640_v47 = vpop.permute.xlu1 %4639  ;;  %v4632_v50 = vunpack.i.h.bf16 %v4630_v45  ;;  %v4631_v51 = vunpack.i.l.bf16 %v4630_v45 }
  0xb4   : > { %v4642_v52 = vunpack.i.h.bf16 %v4640_v47  ;;  %v4641_v59 = vunpack.i.l.bf16 %v4640_v47 }
  0xb5   : > { %v806_v61 = vsel %vm800_vm0, %v4631_v51, %v4632_v50  ;;  %v805_v4 = vsel %vm800_vm0, %v4621_v49, %v4631_v51 }
  0xb6   : > { %v4635_v53 = vpop.permute.xlu0 %4634  ;;  %v802_v12 = vsel %vm800_vm0, %v4641_v59, %v4642_v52  ;;  %v801_v23 = vsel %vm800_vm0, %v4626_v58, %v4641_v59 }
  0xb7   : > { %v4637_v55 = vunpack.i.h.bf16 %v4635_v53  ;;  %v4636_v56 = vunpack.i.l.bf16 %v4635_v53  ;;  %v4655_v57 = vpop.permute.xlu1 %4654 }
  0xb8   : > { %v4657_v17 = vunpack.i.h.bf16 %v4655_v57  ;;  %v4656_v18 = vunpack.i.l.bf16 %v4655_v57 }
  0xb9   : > { %v808_v62 = vsel %vm800_vm0, %v4636_v56, %v4637_v55  ;;  %v807_v8 = vsel %vm800_vm0, %v4622_v54, %v4636_v56 }
  0xba   : > { %v4645_v13 = vpop.permute.xlu0 %4644  ;;  %v4369_v14 = vpack.c.bf16 %v808_v62, %v806_v61  ;;  %v4372_v16 = vpack.c.bf16 %v807_v8, %v805_v4  ;;  %v707_v30 = vsel %vm699_vm5, %v4656_v18, %v4657_v17 }
  0xbb   : > { %v4647_v19 = vunpack.i.h.bf16 %v4645_v13  ;;  %v4646_v20 = vunpack.i.l.bf16 %v4645_v13  ;;  %v4665_v22 = vpop.permute.xlu1 %4664 }
  0xbc   : > { %4370 = vmatprep.subr.msk.bf16.mxu0 %vm5576_vm3, %v4369_v14  ;;  %v4667_v45 = vunpack.i.h.bf16 %v4665_v22  ;;  %v4666_v47 = vunpack.i.l.bf16 %v4665_v22 }
  0xbd   : > { %v803_v24 = vsel %vm800_vm0, %v4627_v11, %v4646_v20  ;;  %v804_v25 = vsel %vm800_vm0, %v4646_v20, %v4647_v19  ;;  %4373 = vmatpush1.bf16.msk.msra.mxu0 %vm5586_vm4, %v4372_v16 }
  0xbe   : > { %v4650_v26 = vpop.permute.xlu0 %4649  ;;  %v4375_v27 = vpack.c.bf16 %v804_v25, %v802_v12  ;;  %v4378_v28 = vpack.c.bf16 %v803_v24, %v801_v23  ;;  %v701_v59 = vsel %vm699_vm5, %v4666_v47, %v4667_v45 }
  0xbf   : > { %v4652_v31 = vunpack.i.h.bf16 %v4650_v26  ;;  %v4651_v32 = vunpack.i.l.bf16 %v4650_v26  ;;  %v606_v35 = vpop.permute.xlu1 %605 }
  0xc0   : > { %4376 = vmatprep.subr.msk.bf16.mxu0 %vm5576_vm3, %v4375_v27  ;;  %v617_v16 = vrot.slane %v606_v35, 4 }
  0xc1   : > { %v705_v36 = vsel %vm699_vm5, %v4651_v32, %v4652_v31  ;;  %4379 = vmatpush1.bf16.msk.msra.mxu0 %vm5586_vm4, %v4378_v28 }
  0xc2   : > { %v4660_v38 = vpop.permute.xlu0 %4659  ;;  %v4381_v39 = vpack.c.bf16 %v707_v30, %v705_v36 }
  0xc3   : > { %v4662_v40 = vunpack.i.h.bf16 %v4660_v38  ;;  %v4661_v41 = vunpack.i.l.bf16 %v4660_v38  ;;  %v610_v43 = vpop.permute.xlu1 %609 }
  0xc4   : > { %4382 = vmatprep.subr.msk.bf16.mxu0 %vm5610_vm7, %v4381_v39 }
  0xc5   : > { %v704_v49 = vsel %vm699_vm5, %v4661_v41, %v4651_v32  ;;  %v706_v50 = vsel %vm699_vm5, %v4662_v40, %v4656_v18  ;;  %v619_v18 = vrot.slane %v610_v43, 4 }
  0xc6   : > { %v4670_v52 = vpop.permute.xlu0 %4669  ;;  %v4384_v53 = vpack.c.bf16 %v706_v50, %v704_v49 }
  0xc7   : > { %v4672_v54 = vunpack.i.h.bf16 %v4670_v52  ;;  %v4671_v55 = vunpack.i.l.bf16 %v4670_v52  ;;  %v4675_v56 = vpop.permute.xlu1 %4674 }
  0xc8   : > { %v4677_v57 = vunpack.i.h.bf16 %v4675_v56  ;;  %v4676_v58 = vunpack.i.l.bf16 %v4675_v56  ;;  %4385 = vmatpush1.bf16.msk.msra.mxu0 %vm5622_vm9, %v4384_v53 }
  0xc9   : > { %v703_v61 = vsel %vm699_vm5, %v4671_v55, %v4672_v54 }
  0xca   : > { %v702_v62 = vsel %vm699_vm5, %v4677_v57, %v4671_v55  ;;  %v700_v4 = vsel %vm699_vm5, %v4676_v58, %v4666_v47  ;;  %v608_v8 = vpop.permute.xlu0 %607  ;;  %v4387_v11 = vpack.c.bf16 %v703_v61, %v701_v59 }
  0xcb   : > { %v618_v12 = vrot.slane %v608_v8, 4  ;;  %v4390_v13 = vpack.c.bf16 %v702_v62, %v700_v4  ;;  %v600_v14 = vpop.permute.xlu1 %599 }
  0xcc   : > { %4388 = vmatprep.subr.msk.bf16.mxu0 %vm5610_vm7, %v4387_v11  ;;  %v614_v27 = vrot.slane %v600_v14, 4 }
  0xcd   : > { %4391 = vmatpush1.bf16.msk.msra.mxu0 %vm5622_vm9, %v4390_v13  ;;  %v627_v19 = vsel %vm621_vm10, %v617_v16, %v618_v12 }
  0xce   : > { %v612_v17 = vpop.permute.xlu0 %611  ;;  %v628_v25 = vsel %vm623_vm11, %v606_v35, %v627_v19 }
  0xcf   : > { %v620_v20 = vrot.slane %v612_v17, 4  ;;  %v604_v22 = vpop.permute.xlu1 %603 }
  0xd0   : > { %v616_v36 = vrot.slane %v604_v22, 4 }
  0xd1   : > { %v629_v23 = vsel %vm621_vm10, %v619_v18, %v620_v20 }
  0xd2   : > { %v598_v24 = vpop.permute.xlu0 %597  ;;  %v630_v26 = vsel %vm623_vm11, %v610_v43, %v629_v23 }
  0xd3   : > { %v613_v28 = vrot.slane %v598_v24, 4  ;;  %v4114_v30 = vcombine.high %v628_v25, %v630_v26  ;;  %v4113_v31 = vcombine.low %v628_v25, %v630_v26  ;;  %v4685_v32 = vpop.permute.xlu1 %4684 }
  0xd4   : > { %v4687_v39 = vunpack.i.h.bf16 %v4685_v32  ;;  %v4686_v40 = vunpack.i.l.bf16 %v4685_v32 }
  0xd5   : > { %1570 = vmatprep.subr.bf16.mxu0 %v4114_v30  ;;  %v622_v41 = vsel %vm621_vm10, %v613_v28, %v614_v27 }
  0xd6   : > { %1571 = vmatpush1.bf16.msra.mxu0 %v4113_v31  ;;  %v602_v38 = vpop.permute.xlu0 %601  ;;  %v624_v43 = vsel %vm623_vm11, %v598_v24, %v622_v41  ;;  %v508_v50 = vsel %vm500_vm12, %v4686_v40, %v4687_v39 }
  0xd7   : > { %v615_v45 = vrot.slane %v602_v38, 4  ;;  %v4695_v47 = vpop.permute.xlu1 %4694 }
  0xd8   : > { %v4697_v11 = vunpack.i.h.bf16 %v4695_v47  ;;  %v4696_v12 = vunpack.i.l.bf16 %v4695_v47 }
  0xd9   : > { %v625_v35 = vsel %vm621_vm10, %v615_v45, %v616_v36 }
  0xda   : > { %v626_v49 = vsel %vm623_vm11, %v602_v38, %v625_v35  ;;  %v4680_v52 = vpop.permute.xlu0 %4679  ;;  %v502_v24 = vsel %vm500_vm12, %v4696_v12, %v4697_v11 }
  0xdb   : > { %v4682_v53 = vunpack.i.h.bf16 %v4680_v52  ;;  %v4681_v54 = vunpack.i.l.bf16 %v4680_v52  ;;  %v4112_v55 = vcombine.high %v624_v43, %v626_v49  ;;  %v4111_v56 = vcombine.low %v624_v43, %v626_v49  ;;  %v4705_v57 = vpop.permute.xlu1 %4704 }
  0xdc   : > { %v4707_v16 = vunpack.i.h.bf16 %v4705_v57  ;;  %v4706_v17 = vunpack.i.l.bf16 %v4705_v57 }
  0xdd   : > { %v506_v58 = vsel %vm500_vm12, %v4681_v54, %v4682_v53  ;;  %1572 = vmatprep.subr.bf16.mxu0 %v4112_v55 }
  0xde   : > { %1573 = vmatpush1.bf16.msra.mxu0 %v4111_v56  ;;  %v4690_v59 = vpop.permute.xlu0 %4689  ;;  %v4393_v61 = vpack.c.bf16 %v508_v50, %v506_v58  ;;  %v501_v25 = vsel %vm500_vm12, %v4706_v17, %v4696_v12 }
  0xdf   : > { %v4692_v62 = vunpack.i.h.bf16 %v4690_v59  ;;  %v4691_v4 = vunpack.i.l.bf16 %v4690_v59  ;;  %v1146_v8 = vpop.permute.xlu1 %1145 }
  0xe0   : > { %4394 = vmatprep.subr.msk.bf16.mxu0 %vm5576_vm3, %v4393_v61  ;;  %v1156_v32 = vrot.slane %v1146_v8, 4 }
  0xe1   : > { %v507_v13 = vsel %vm500_vm12, %v4692_v62, %v4686_v40  ;;  %v505_v14 = vsel %vm500_vm12, %v4691_v4, %v4681_v54 }
  0xe2   : > { %v4700_v18 = vpop.permute.xlu0 %4699  ;;  %v4396_v19 = vpack.c.bf16 %v507_v13, %v505_v14 }
  0xe3   : > { %v4702_v20 = vunpack.i.h.bf16 %v4700_v18  ;;  %v4701_v22 = vunpack.i.l.bf16 %v4700_v18  ;;  %v1150_v23 = vpop.permute.xlu1 %1149 }
  0xe4   : > { %4397 = vmatpush1.bf16.msk.msra.mxu0 %vm5586_vm4, %v4396_v19  ;;  %v1158_v39 = vrot.slane %v1150_v23, 4 }
  0xe5   : > { %v503_v26 = vsel %vm500_vm12, %v4707_v16, %v4701_v22  ;;  %v504_v27 = vsel %vm500_vm12, %v4701_v22, %v4702_v20 }
  0xe6   : > { %v1144_v28 = vpop.permute.xlu0 %1143  ;;  %v4399_v30 = vpack.c.bf16 %v504_v27, %v502_v24  ;;  %v4402_v31 = vpack.c.bf16 %v503_v26, %v501_v25 }
  0xe7   : > { %v1155_v36 = vrot.slane %v1144_v28, 4  ;;  %v1138_v38 = vpop.permute.xlu1 %1137 }
  0xe8   : > { %4400 = vmatprep.subr.msk.bf16.mxu0 %vm5576_vm3, %v4399_v30  ;;  %v1152_v52 = vrot.slane %v1138_v38, 4 }
  0xe9   : > { %4403 = vmatpush1.bf16.msk.msra.mxu0 %vm5586_vm4, %v4402_v31  ;;  %v1164_v41 = vsel %vm621_vm10, %v1155_v36, %v1156_v32 }
  0xea   : > { %v1148_v40 = vpop.permute.xlu0 %1147  ;;  %v1165_v43 = vsel %vm1160_vm13, %v1144_v28, %v1164_v41 }
  0xeb   : > { %v1157_v45 = vrot.slane %v1148_v40, 4  ;;  %v1142_v47 = vpop.permute.xlu1 %1141 }
  0xec   : > { %v1154_v57 = vrot.slane %v1142_v47, 4 }
  0xed   : > { %v1166_v35 = vsel %vm621_vm10, %v1157_v45, %v1158_v39 }
  0xee   : > { %v1167_v49 = vsel %vm1160_vm13, %v1148_v40, %v1166_v35  ;;  %v1136_v50 = vpop.permute.xlu0 %1135 }
  0xef   : > { %v1151_v53 = vrot.slane %v1136_v50, 4  ;;  %v4138_v54 = vcombine.high %v1165_v43, %v1167_v49  ;;  %v4137_v55 = vcombine.low %v1165_v43, %v1167_v49  ;;  %v4715_v56 = vpop.permute.xlu1 %4714 }
  0xf0   : > { %v4717_v59 = vunpack.i.h.bf16 %v4715_v56  ;;  %v4716_v61 = vunpack.i.l.bf16 %v4715_v56 }
  0xf1   : > { %1578 = vmatprep.subr.bf16.mxu0 %v4138_v54  ;;  %v1159_v62 = vsel %vm621_vm10, %v1151_v53, %v1152_v52 }
  0xf2   : > { %v1140_v58 = vpop.permute.xlu0 %1139  ;;  %1579 = vmatpush2.bf16.msra.mxu0 %v4137_v55  ;;  %v1161_v12 = vsel %vm1160_vm13, %v1136_v50, %v1159_v62  ;;  %v1046_v14 = vsel %vm6872_vm14, %v4716_v61, %v4717_v59 }
  0xf3   : > { %v1153_v4 = vrot.slane %v1140_v58, 4  ;;  %v4725_v8 = vpop.permute.xlu1 %4724 }
  0xf4   : > { %v4727_v30 = vunpack.i.h.bf16 %v4725_v8  ;;  %v4726_v31 = vunpack.i.l.bf16 %v4725_v8 }
  0xf5   : > { %v1162_v11 = vsel %vm621_vm10, %v1153_v4, %v1154_v57 }
  0xf6   : > { %v1163_v13 = vsel %vm1160_vm13, %v1140_v58, %v1162_v11  ;;  %v4710_v16 = vpop.permute.xlu0 %4709  ;;  %v1040_v50 = vsel %vm6872_vm14, %v4726_v31, %v4727_v30 }
  0xf7   : > { %v4712_v17 = vunpack.i.h.bf16 %v4710_v16  ;;  %v4711_v18 = vunpack.i.l.bf16 %v4710_v16  ;;  %v4136_v19 = vcombine.high %v1161_v12, %v1163_v13  ;;  %v4135_v20 = vcombine.low %v1161_v12, %v1163_v13  ;;  %v4735_v22 = vpop.permute.xlu1 %4734 }
  0xf8   : > { %v4737_v38 = vunpack.i.h.bf16 %v4735_v22  ;;  %v4736_v39 = vunpack.i.l.bf16 %v4735_v22 }
  0xf9   : > { %v1044_v23 = vsel %vm6872_vm14, %v4711_v18, %v4712_v17  ;;  %1580 = vmatprep.subr.bf16.mxu0 %v4136_v19 }
  0xfa   : > { %v4720_v24 = vpop.permute.xlu0 %4719  ;;  %1581 = vmatpush2.bf16.msra.mxu0 %v4135_v20  ;;  %v4405_v25 = vpack.c.bf16 %v1046_v14, %v1044_v23  ;;  %v1039_v52 = vsel %vm6872_vm14, %v4736_v39, %v4726_v31 }
  0xfb   : > { %v4722_v26 = vunpack.i.h.bf16 %v4720_v24  ;;  %v4721_v27 = vunpack.i.l.bf16 %v4720_v24  ;;  %v4745_v28 = vpop.permute.xlu1 %4744 }
  0xfc   : > { %4406 = vmatprep.subr.msk.bf16.mxu0 %vm5576_vm3, %v4405_v25  ;;  %v4747_v35 = vunpack.i.h.bf16 %v4745_v28  ;;  %v4746_v43 = vunpack.i.l.bf16 %v4745_v28 }
  0xfd   : > { %v1045_v32 = vsel %vm6872_vm14, %v4722_v26, %v4716_v61  ;;  %v1043_v36 = vsel %vm6872_vm14, %v4721_v27, %v4711_v18 }
  0xfe   : > { %v4730_v40 = vpop.permute.xlu0 %4729  ;;  %v4408_v41 = vpack.c.bf16 %v1045_v32, %v1043_v36  ;;  %v945_v58 = vsel %vm6871_vm15, %v4746_v43, %v4747_v35 }
  0xff   : > { %v4732_v45 = vunpack.i.h.bf16 %v4730_v40  ;;  %v4731_v47 = vunpack.i.l.bf16 %v4730_v40  ;;  %v4755_v49 = vpop.permute.xlu1 %4754 }
 0x100   : > { %4409 = vmatpush2.bf16.msk.msra.mxu0 %vm5586_vm4, %v4408_v41  ;;  %v4757_v16 = vunpack.i.h.bf16 %v4755_v49  ;;  %v4756_v17 = vunpack.i.l.bf16 %v4755_v49 }
 0x101   : > { %v1041_v53 = vsel %vm6872_vm14, %v4737_v38, %v4731_v47  ;;  %v1042_v54 = vsel %vm6872_vm14, %v4731_v47, %v4732_v45  ;;  %v4355_v45 = vpack.c.bf16 %v5432_v7, %v5418_v2  ;;  %v4353_v2 = vpack.c.bf16 %v5440_v10, %v5426_v5 }
 0x102   : > { %v4740_v55 = vpop.permute.xlu0 %4739  ;;  %v4411_v56 = vpack.c.bf16 %v1042_v54, %v1040_v50  ;;  %v4414_v57 = vpack.c.bf16 %v1041_v53, %v1039_v52  ;;  %v939_v31 = vsel %vm6871_vm15, %v4756_v17, %v4757_v16  ;;  %v4354_v50 = vpack.c.bf16 %v5429_v6, %v5415_v1 }
 0x103   : > { %v4742_v59 = vunpack.i.h.bf16 %v4740_v55  ;;  %v4741_v61 = vunpack.i.l.bf16 %v4740_v55  ;;  %v4765_v62 = vpop.permute.xlu1 %4764 }
 0x104   : > { %4412 = vmatprep.subr.msk.bf16.mxu0 %vm5576_vm3, %v4411_v56  ;;  %v4767_v20 = vunpack.i.h.bf16 %v4765_v62  ;;  %v4766_v22 = vunpack.i.l.bf16 %v4765_v62 }
 0x105   : > { %v943_v4 = vsel %vm6871_vm15, %v4741_v61, %v4742_v59  ;;  %4415 = vmatpush2.bf16.msk.msra.mxu0 %vm5586_vm4, %v4414_v57 }
 0x106   : > { %v4750_v8 = vpop.permute.xlu0 %4749  ;;  %v4417_v11 = vpack.c.bf16 %v945_v58, %v943_v4  ;;  %v938_v32 = vsel %vm6871_vm15, %v4766_v22, %v4756_v17  ;;  %v4352_v58 = vpack.c.bf16 %v5437_v9, %v5421_v3  ;;  %v5063_v17 = vld [vmem:[#allocation4 + $0x8] ss:$12 sps:$4 sm:$0xff]  }
 0x107   : > { %v4752_v12 = vunpack.i.h.bf16 %v4750_v8  ;;  %v4751_v13 = vunpack.i.l.bf16 %v4750_v8  ;;  %v4775_v14 = vpop.permute.xlu1 %4774  ;;  %v5060_v8 = vld [vmem:[#allocation4] ss:$12 sps:$4 sm:$0xff]  }
 0x108   : > { %4418 = vmatprep.subr.msk.bf16.mxu0 %vm5610_vm7, %v4417_v11  ;;  %v4777_v27 = vunpack.i.h.bf16 %v4775_v14  ;;  %v4776_v28 = vunpack.i.l.bf16 %v4775_v14 }
 0x109   : > { %v944_v18 = vsel %vm6871_vm15, %v4752_v12, %v4746_v43  ;;  %v942_v19 = vsel %vm6871_vm15, %v4751_v13, %v4741_v61  ;;  %v5064_v13 = vld [vmem:[#allocation4 + $0x1c] ss:$12 sps:$4 sm:$0xff]  }
 0x10a   : > { %v4760_v23 = vpop.permute.xlu0 %4759  ;;  %v4420_v24 = vpack.c.bf16 %v944_v18, %v942_v19  ;;  %v1232_v43 = vsel %vm6870_vm8, %v4776_v28, %v4777_v27  ;;  %v5066_v18 = vld [vmem:[#allocation4 + $0x18] ss:$12 sps:$4 sm:$0xff]   ;;  %v5067_v19 = vld [vmem:[#allocation4 + $0x20] ss:$12 sps:$4 sm:$0xff]  }
 0x10b   : > { %v4762_v25 = vunpack.i.h.bf16 %v4760_v23  ;;  %v4761_v26 = vunpack.i.l.bf16 %v4760_v23  ;;  %v4785_v30 = vpop.permute.xlu1 %4784 }
 0x10c   : > { %4421 = vmatpush2.bf16.msk.msra.mxu0 %vm5622_vm9, %v4420_v24  ;;  %v4787_v56 = vunpack.i.h.bf16 %v4785_v30  ;;  %v4786_v57 = vunpack.i.l.bf16 %v4785_v30 }
 0x10d   : > { %v940_v36 = vsel %vm6871_vm15, %v4767_v20, %v4761_v26  ;;  %v941_v38 = vsel %vm6871_vm15, %v4761_v26, %v4762_v25 }
 0x10e   : > { %v4770_v39 = vpop.permute.xlu0 %4769  ;;  %v4423_v40 = vpack.c.bf16 %v941_v38, %v939_v31  ;;  %v4426_v41 = vpack.c.bf16 %v940_v36, %v938_v32  ;;  %v1226_v11 = vsel %vm6870_vm8, %v4786_v57, %v4787_v56 }
 0x10f   : > { %v4772_v47 = vunpack.i.h.bf16 %v4770_v39  ;;  %v4771_v35 = vunpack.i.l.bf16 %v4770_v39  ;;  %v4795_v53 = vpop.permute.xlu1 %4794 }
 0x110   : > { %4424 = vmatprep.subr.msk.bf16.mxu0 %vm5610_vm7, %v4423_v40  ;;  %v4797_v59 = vunpack.i.h.bf16 %v4795_v53  ;;  %v4796_v61 = vunpack.i.l.bf16 %v4795_v53 }
 0x111   : > { %4427 = vmatpush2.bf16.msk.msra.mxu0 %vm5622_vm9, %v4426_v41  ;;  %v1230_v49 = vsel %vm6870_vm8, %v4771_v35, %v4772_v47 }
 0x112   : > { %v4780_v52 = vpop.permute.xlu0 %4779  ;;  %1590 = vmatprep.subr.bf16.mxu0 %v4355_v45  ;;  %v4429_v54 = vpack.c.bf16 %v1232_v43, %v1230_v49  ;;  %v1225_v3 = vsel %vm6870_vm8, %v4796_v61, %v4786_v57 }
 0x113   : > { %v4782_v7 = vunpack.i.h.bf16 %v4780_v52  ;;  %v4781_v55 = vunpack.i.l.bf16 %v4780_v52 }
 0x114   : > { %4430 = vmatprep.subr.msk.bf16.mxu1 %vm5610_vm7, %v4429_v54 }
 0x115   : > { %1591 = vmatpush2.bf16.msra.mxu0 %v4354_v50  ;;  %v1229_v1 = vsel %vm6870_vm8, %v4781_v55, %v4771_v35  ;;  %v1231_v6 = vsel %vm6870_vm8, %v4782_v7, %v4776_v28 }
 0x116   : > { %v4790_v62 = vpop.permute.xlu0 %4789  ;;  %1592 = vmatprep.subr.bf16.mxu0 %v4353_v2  ;;  %v4432_v5 = vpack.c.bf16 %v1231_v6, %v1229_v1 }
 0x117   : > { %v4792_v10 = vunpack.i.h.bf16 %v4790_v62  ;;  %v4791_v4 = vunpack.i.l.bf16 %v4790_v62 }
 0x118   : > { %4433 = vmatpush1.bf16.msk.msra.mxu1 %vm5622_vm9, %v4432_v5 }
 0x119   : > { %v1227_v9 = vsel %vm6870_vm8, %v4797_v59, %v4791_v4  ;;  %v1228_v12 = vsel %vm6870_vm8, %v4791_v4, %v4792_v10  ;;  %1593 = vmatpush2.bf16.msra.mxu0 %v4352_v58 }
 0x11a   : > { %v4435_v14 = vpack.c.bf16 %v1228_v12, %v1226_v11  ;;  %v4438_v16 = vpack.c.bf16 %v1227_v9, %v1225_v3 }
 0x11c   : > { %1595 = vmatmul.mubr.bf16.vlgmr.msra.gmra.mxu0 %v5060_v8  ;;  %4436 = vmatprep.subr.msk.bf16.mxu1 %vm5610_vm7, %v4435_v14  ;;  %v1343_v31 = vpop.permute.xlu1 %1342 }
 0x11d   : > { %4439 = vmatpush1.bf16.msk.msra.mxu1 %vm5622_vm9, %v4438_v16  ;;  %1604 = vmatprep.mubr.bf16.mxu0 %v5064_v13 }
 0x120   : > { %4143 = vmatmul.mubr.msk.bf16.vlgmr.msra.gmra.mxu1 %vm6869_vm6, %v5063_v17  ;;  %v1328_v43 = vpop.permute.xlu1 %1327 }
 0x121   : > { %1657 = vmatprep.mubr.bf16.mxu1 %v5252_v33 }
 0x123   : > { %v1338_v27 = vpop.permute.xlu0 %1337 }
 0x124   : > { %1605 = vmatmul.mubr.bf16.gmra.mxu0 %v5066_v18 }
 0x125   : > { %2938 = vmatprep.mubr.bf16.mxu0 %v5252_v33 }
 0x127   : > { %v1333_v41 = vpop.permute.xlu0 %1332 }
 0x128   : > { %4144 = vmatmul.mubr.msk.bf16.gmra.mxu1 %vm6869_vm6, %v5067_v19 }
 0x1dc   : > { %v1596_v20 = vpop.f32.mrf.mxu0 }
 0x1dd   : > { %v1597_v57 = vadd.f32 %v1596_v20, %v1328_v43 }
 0x1de   : > { %v1598_v22 = vpop.f32.mrf.mxu0 }
 0x1df   : > { %v1599_v59 = vadd.f32 %v1598_v22, %v1328_v43 }
 0x1e0   : > { %v1600_v23 = vpop.f32.mrf.mxu0  ;;  %v1649_v24 = vpop.f32.mrf.mxu1 }
 0x1e1   : > { %v1601_v53 = vadd.f32 %v1600_v23, %v1333_v41  ;;  %v1650_v4 = vadd.f32 %v1649_v24, %v1597_v57 }
 0x1e2   : > { %v1602_v25 = vpop.f32.mrf.mxu0  ;;  %v1651_v26 = vpop.f32.mrf.mxu1 }
 0x1e3   : > { %v1603_v49 = vadd.f32 %v1602_v25, %v1333_v41  ;;  %v1652_v62 = vadd.f32 %v1651_v26, %v1599_v59 }
 0x1e4   : > { %v1606_v28 = vpop.f32.mrf.mxu0  ;;  %v1653_v30 = vpop.f32.mrf.mxu1 }
 0x1e5   : > { %v1607_v38 = vadd.f32 %v1606_v28, %v1338_v27  ;;  %v1654_v61 = vadd.f32 %v1653_v30, %v1601_v53  ;;  %v1668_v8 = vadd.f32 %v1652_v62, %v1650_v4 }
 0x1e6   : > { %v1608_v32 = vpop.f32.mrf.mxu0  ;;  %v1655_v36 = vpop.f32.mrf.mxu1 }
 0x1e7   : > { %v1609_v45 = vadd.f32 %v1608_v32, %v1338_v27  ;;  %v1656_v2 = vadd.f32 %v1655_v36, %v1603_v49 }
 0x1e8   : > { %v1610_v39 = vpop.f32.mrf.mxu0  ;;  %v1659_v40 = vpop.f32.mrf.mxu1 }
 0x1e9   : > { %v1660_v50 = vadd.f32 %v1659_v40, %v1607_v38  ;;  %v1611_v7 = vadd.f32 %v1610_v39, %v1343_v31  ;;  %v1671_v10 = vadd.f32 %v1656_v2, %v1654_v61 }
 0x1ea   : > { %v1612_v47 = vpop.f32.mrf.mxu0  ;;  %v1661_v35 = vpop.f32.mrf.mxu1 }
 0x1eb   : > { %v1662_v52 = vadd.f32 %v1661_v35, %v1609_v45  ;;  %v1613_v55 = vadd.f32 %v1612_v47, %v1343_v31 }
 0x1ec   : > { %v1663_v54 = vpop.f32.mrf.mxu1 }
 0x1ed   : > { %v1674_v56 = vadd.f32 %v1662_v52, %v1660_v50  ;;  %v1664_v1 = vadd.f32 %v1663_v54, %v1611_v7 }
 0x1ee   : > { %v1665_v58 = vpop.f32.mrf.mxu1 }
 0x1ef   : > { %v1666_v6 = vadd.f32 %v1665_v58, %v1613_v55  ;;  %1675 = vadd.xlane.f32.xlu1 %v1674_v56 }
 0x1f1   : > { %v1677_v5 = vadd.f32 %v1666_v6, %v1664_v1 }
 0x1f3   : > { %1678 = vadd.xlane.f32.xlu0 %v1677_v5  ;;  %1672 = vadd.xlane.f32.xlu1 %v1671_v10 }
 0x1f7   : > { %1669 = vadd.xlane.f32.xlu0 %v1668_v8 }
 0x278   : > { %v1676_v11 = vpop.xlane.xlu1 %1675 }
 0x279   : > { %v1683_v3 = vmul.f32 0.00390625, %v1676_v11 }
 0x27b   : > { %v5728_v9 = vsub.f32 %v1660_v50, %v1683_v3  ;;  %v5730_v12 = vsub.f32 %v1662_v52, %v1683_v3 }
 0x27c   : > { %v1679_v13 = vpop.xlane.xlu0 %1678  ;;  %v1673_v14 = vpop.xlane.xlu1 %1672 }
 0x27d   : > { %v1684_v16 = vmul.f32 0.00390625, %v1679_v13  ;;  %v1682_v17 = vmul.f32 0.00390625, %v1673_v14  ;;  %v1697_v18 = vmul.f32 %v5728_v9, %v5728_v9  ;;  %v1698_v19 = vmul.f32 %v5730_v12, %v5730_v12 }
 0x27f   : > { %v1691_v20 = vsub.f32 %v1664_v1, %v1684_v16  ;;  %v1692_v22 = vsub.f32 %v1666_v6, %v1684_v16  ;;  %v1687_v23 = vsub.f32 %v1654_v61, %v1682_v17  ;;  %v1688_v24 = vsub.f32 %v1656_v2, %v1682_v17 }
 0x280   : > { %v1670_v25 = vpop.xlane.xlu0 %1669  ;;  %v1707_v26 = vadd.f32 %v1698_v19, %v1697_v18 }
 0x281   : > { %v1681_v27 = vmul.f32 0.00390625, %v1670_v25  ;;  %v1699_v28 = vmul.f32 %v1691_v20, %v1691_v20  ;;  %v1700_v30 = vmul.f32 %v1692_v22, %v1692_v22  ;;  %v1695_v31 = vmul.f32 %v1687_v23, %v1687_v23 }
 0x282   : > { %1708 = vadd.xlane.f32.xlu0 %v1707_v26  ;;  %v1696_v39 = vmul.f32 %v1688_v24, %v1688_v24 }
 0x283   : > { %v1685_v32 = vsub.f32 %v1650_v4, %v1681_v27  ;;  %v1686_v36 = vsub.f32 %v1652_v62, %v1681_v27  ;;  %v1710_v38 = vadd.f32 %v1700_v30, %v1699_v28 }
 0x284   : > { %v1704_v45 = vadd.f32 %v1696_v39, %v1695_v31 }
 0x285   : > { %1711 = vadd.xlane.f32.xlu1 %v1710_v38  ;;  %v1693_v40 = vmul.f32 %v1685_v32, %v1685_v32  ;;  %v1694_v41 = vmul.f32 %v1686_v36, %v1686_v36 }
 0x287   : > { %v1701_v47 = vadd.f32 %v1694_v41, %v1693_v40 }
 0x289   : > { %1705 = vadd.xlane.f32.xlu1 %v1704_v45  ;;  %1702 = vadd.xlane.f32.xlu0 %v1701_v47 }
 0x29a   : > { %4801 = vrot.lane.b32.xlu1 %v5242_v0, %s6873_s28 }
 0x29e   : > { %4811 = vrot.lane.b32.xlu1 %v5242_v0, %s6897_s20 }
 0x29f   : > { %4806 = vrot.lane.b32.xlu0 %v5242_v0, %s6873_s28 }
 0x2a3   : > { %4816 = vrot.lane.b32.xlu0 %v5242_v0, %s6897_s20 }
 0x30b   : > { %v1709_v35 = vpop.xlane.xlu0 %1708 }
 0x30c   : > { %v1715_v50 = vmul.f32 0.00390625, %v1709_v35 }
 0x30e   : > { %v1712_v43 = vpop.xlane.xlu1 %1711  ;;  %v1719_v57 = vadd.f32 1e-05, %v1715_v50 }
 0x30f   : > { %v1716_v49 = vmul.f32 0.00390625, %v1712_v43 }
 0x311   : > { %v1720_v52 = vadd.f32 1e-05, %v1716_v49 }
 0x312   : > { %v1706_v53 = vpop.xlane.xlu1 %1705  ;;  %v1703_v54 = vpop.xlane.xlu0 %1702 }
 0x313   : > { %v1714_v2 = vmul.f32 0.00390625, %v1706_v53  ;;  %v1713_v7 = vmul.f32 0.00390625, %v1703_v54  ;;  %5076 = vrsqrt.f32 %v1720_v52 }
 0x315   : > { %v1718_v55 = vadd.f32 1e-05, %v1714_v2  ;;  %v1717_v56 = vadd.f32 1e-05, %v1713_v7 }
 0x317   : > { %5078 = vrsqrt.f32 %v1718_v55 }
 0x318   : > { %5080 = vrsqrt.f32 %v1717_v56 }
 0x319   : > { %5082 = vrsqrt.f32 %v1719_v57 }
 0x320   : > { %v5077_v58 = vpop.eup %5076 }
 0x321   : > { %v1731_v4 = vmul.f32 %v5077_v58, %v1691_v20  ;;  %v1732_v8 = vmul.f32 %v5077_v58, %v1692_v22 }
 0x323   : > { %vm1739_vm15 = vcmp.gt.f32.partialorder %v1731_v4, 0.0  ;;  %vm1740_vm14 = vcmp.gt.f32.partialorder %v1732_v8, 0.0 }
 0x324   : > { %v5079_v59 = vpop.eup %5078 }
 0x325   : > { %v5081_v61 = vpop.eup %5080  ;;  %v1727_v1 = vmul.f32 %v5079_v59, %v1687_v23  ;;  %v1728_v6 = vmul.f32 %v5079_v59, %v1688_v24  ;;  %v1747_v23 = vmul.f32 0.2, %v1731_v4  ;;  %v1748_v24 = vmul.f32 0.2, %v1732_v8 }
 0x326   : > { %v1725_v62 = vmul.f32 %v5081_v61, %v1685_v32  ;;  %v1726_v5 = vmul.f32 %v5081_v61, %v1686_v36  ;;  %v5083_v10 = vpop.eup %5082 }
 0x327   : > { %v1743_v11 = vmul.f32 0.2, %v1727_v1  ;;  %v1744_v3 = vmul.f32 0.2, %v1728_v6  ;;  %vm1735_vm6 = vcmp.gt.f32.partialorder %v1727_v1, 0.0  ;;  %vm1736_vm8 = vcmp.gt.f32.partialorder %v1728_v6, 0.0 }
 0x328   : > { %vm1733_vm1 = vcmp.gt.f32.partialorder %v1725_v62, 0.0  ;;  %vm1734_vm2 = vcmp.gt.f32.partialorder %v1726_v5, 0.0  ;;  %v1741_v13 = vmul.f32 0.2, %v1725_v62  ;;  %v1742_v14 = vmul.f32 0.2, %v1726_v5 }
 0x329   : > { %v1729_v16 = vmul.f32 %v5083_v10, %v5728_v9  ;;  %v1730_v17 = vmul.f32 %v5083_v10, %v5730_v12  ;;  %v5754_v25 = vsel %vm1735_vm6, %v1727_v1, %v1743_v11  ;;  %v5756_v26 = vsel %vm1736_vm8, %v1728_v6, %v1744_v3  ;;  %v5070_v1 = vld [vmem:[#allocation7 + $0x4] ss:$12 sps:$4 sm:$0xff]   ;;  %v2614_v6 = vld [vmem:[%s6845_s4 + $0x8] sm:$0xff] }
 0x32a   : > { %v5746_v18 = vsel %vm1733_vm1, %v1725_v62, %v1741_v13  ;;  %v5748_v19 = vsel %vm1734_vm2, %v1726_v5, %v1742_v14  ;;  %v4830_v27 = vpack.i.bf16 %v5756_v26, %v5754_v25  ;;  %v5766_v30 = vsel %vm1739_vm15, %v1731_v4, %v1747_v23  ;;  %2885 = vmatprep.mubr.bf16.mxu1 %v5070_v1  ;;  %v2613_v62 = vld [vmem:[%s6845_s4] sm:$0xff]  ;;  %v2616_v5 = vld [vmem:[%s6845_s4 + $0x18] sm:$0xff]  ;;  %v2615_v10 = vld [vmem:[%s6845_s4 + $0x10] sm:$0xff]  ;;  %v4802_v4 = vpop.permute.xlu1 %4801 }
 0x32b   : > { %v4820_v20 = vpack.i.bf16 %v5748_v19, %v5746_v18  ;;  %v4299_v22 = vpack.c.bf16 %v5746_v18, %v5242_v0  ;;  %vm1737_vm1 = vcmp.gt.f32.partialorder %v1729_v16, 0.0  ;;  %v1745_v9 = vmul.f32 0.2, %v1729_v16 }
 0x32c   : > { %v1746_v12 = vmul.f32 0.2, %v1730_v17  ;;  %vm1738_vm2 = vcmp.gt.f32.partialorder %v1730_v17, 0.0  ;;  %v5764_v28 = vpack.i.bf16 %v5754_v25, %v5746_v18  ;;  %v5768_v31 = vsel %vm1740_vm14, %v1732_v8, %v1748_v24  ;;  %v4807_v8 = vpop.permute.xlu0 %4806 }
 0x32d   : > { %4821 = vrot.lane.b32.xlu0 %v4820_v20, %s6873_s28  ;;  %1909 = vrot.lane.b32.xlu1 %v4299_v22, %s6898_s21  ;;  %v5772_v32 = vsel %vm1737_vm1, %v1729_v16, %v1745_v9  ;;  %v4300_v38 = vpack.c.bf16 %v5748_v19, %v5748_v19  ;;  %v4453_v41 = vpack.c.bf16 %v5756_v26, %v5748_v19 }
 0x32e   : > { %v5774_v36 = vsel %vm1738_vm2, %v1730_v17, %v1746_v12  ;;  %v4454_v40 = vpack.c.bf16 %v5766_v30, %v5772_v32  ;;  %v4452_v45 = vpack.c.bf16 %v5754_v25, %v5746_v18  ;;  %v4302_v47 = vpack.c.bf16 %v5756_v26, %v5756_v26  ;;  %v5885_v11 = vpop.permute.xlu1 %4811 }
 0x32f   : > { %v4455_v39 = vpack.c.bf16 %v5768_v31, %v5774_v36  ;;  %v4301_v35 = vpack.c.bf16 %v5754_v25, %v5242_v0  ;;  %v4840_v43 = vpack.i.bf16 %v5774_v36, %v5772_v32  ;;  %v4303_v49 = vpack.c.bf16 %v5772_v32, %v5242_v0 }
 0x330   : > { %v4304_v50 = vpack.c.bf16 %v5774_v36, %v5774_v36  ;;  %v4855_v52 = vpack.i.bf16 %v5768_v31, %v5766_v30  ;;  %v4305_v53 = vpack.c.bf16 %v5766_v30, %v5242_v0  ;;  %v4306_v54 = vpack.c.bf16 %v5768_v31, %v5768_v31  ;;  %v5887_v3 = vpop.permute.xlu0 %4816 }
 0x331   : > { %4826 = vrot.lane.b32.xlu0 %v4820_v20, %s6897_s20  ;;  %4831 = vrot.lane.b32.xlu1 %v4830_v27, %s6873_s28  ;;  %v4317_v2 = vpack.c.bf16 %v5774_v36, %v5772_v32  ;;  %v4315_v7 = vpack.c.bf16 %v5748_v19, %v5746_v18  ;;  %v4316_v55 = vpack.c.bf16 %v5756_v26, %v5754_v25  ;;  %vm6911_vm2 = vcmask 1039360   ;;  %v5075_v18 = vld [vmem:[#allocation7 + $0x20] ss:$12 sps:$4 sm:$0xff]  }
 0x332   : > { %v4318_v56 = vpack.c.bf16 %v5768_v31, %v5766_v30  ;;  %v4895_v57 = vpack.i.bf16 %v5242_v0, %v5768_v31  ;;  %v4890_v58 = vpack.i.bf16 %v5242_v0, %v5774_v36  ;;  %v4905_v59 = vpack.i.bf16 %v5242_v0, %v5748_v19  ;;  %v5072_v19 = vld [vmem:[#allocation7 + $0x1c] ss:$12 sps:$4 sm:$0xff]  }
 0x333   : > { %v4900_v61 = vpack.i.bf16 %v5766_v30, %v5772_v32 }
 0x335   : > { %1911 = vrot.lane.b32.xlu0 %v4300_v38, %s6898_s21  ;;  %4836 = vrot.lane.b32.xlu1 %v4830_v27, %s6897_s20 }
 0x339   : > { %1915 = vrot.lane.b32.xlu0 %v4302_v47, %s6898_s21  ;;  %1913 = vrot.lane.b32.xlu1 %v4301_v35, %s6898_s21 }
 0x33d   : > { %4841 = vrot.lane.b32.xlu0 %v4840_v43, %s6873_s28  ;;  %4846 = vrot.lane.b32.xlu1 %v4840_v43, %s6897_s20 }
 0x341   : > { %1917 = vrot.lane.b32.xlu0 %v4303_v49, %s6898_s21  ;;  %4851 = vrot.lane.b32.xlu1 %v4840_v43, %s6899_s26 }
 0x345   : > { %4866 = vrot.lane.b32.xlu0 %v4820_v20, %s6899_s26  ;;  %1919 = vrot.lane.b32.xlu1 %v4304_v50, %s6898_s21 }
 0x349   : > { %4876 = vrot.lane.b32.xlu0 %v5242_v0, %s6899_s26  ;;  %4856 = vrot.lane.b32.xlu1 %v4855_v52, %s6873_s28  ;;  %s6929_s28 = smov 1  }
 0x34d   : > { %4881 = vrot.lane.b32.xlu0 %v4855_v52, %s6897_s20  ;;  %4861 = vrot.lane.b32.xlu1 %v5242_v0, %s6899_s26 }
 0x351   : > { %4886 = vrot.lane.b32.xlu0 %v4855_v52, %s6899_s26  ;;  %4871 = vrot.lane.b32.xlu1 %v4830_v27, %s6899_s26  ;;  %s5257_s26 = smov [#allocation9]  }
 0x355   : > { %1921 = vrot.lane.b32.xlu0 %v4305_v53, %s6898_s21  ;;  %1923 = vrot.lane.b32.xlu1 %v4306_v54, %s6898_s21 }
 0x359   : > { %2439 = vrot.lane.b32.xlu0 %v5247_v21, %s6900_s29  ;;  %2437 = vrot.lane.b32.xlu1 %v4317_v2, %s6900_s29 }
 0x35d   : > { %2443 = vrot.lane.b32.xlu0 %v5247_v21, %s6900_s29  ;;  %2429 = vrot.lane.b32.xlu1 %v4315_v7, %s6900_s29  ;;  %v4804_v7 = vunpack.i.h.bf16 %v4802_v4 }
 0x361   : > { %2431 = vrot.lane.b32.xlu0 %v5247_v21, %s6900_s29  ;;  %2433 = vrot.lane.b32.xlu1 %v4316_v55, %s6900_s29  ;;  %v4803_v55 = vunpack.i.l.bf16 %v4802_v4 }
 0x365   : > { %2435 = vrot.lane.b32.xlu0 %v5247_v21, %s6900_s29  ;;  %2441 = vrot.lane.b32.xlu1 %v4318_v56, %s6900_s29  ;;  %v4910_v21 = vpack.i.bf16 %v5242_v0, %v5756_v26 }
 0x369   : > { %4896 = vrot.lane.b32.xlu0 %v4895_v57, %s6901_s11  ;;  %4891 = vrot.lane.b32.xlu1 %v4890_v58, %s6901_s11 }
 0x36d   : > { %4906 = vrot.lane.b32.xlu0 %v4905_v59, %s6901_s11  ;;  %4901 = vrot.lane.b32.xlu1 %v4900_v61, %s6901_s11 }
 0x371   : > { %4916 = vrot.lane.b32.xlu0 %v5764_v28, %s6901_s11  ;;  %4911 = vrot.lane.b32.xlu1 %v4910_v21, %s6901_s11  ;;  %s5172_s11 = sshll.u32 %s5257_s26, 4  ;;  %s5173_s11 = int_to_ptr.vmem [resolvable:$false] %s5172_s11 }
 0x375   : > { %4926 = vrot.lane.b32.xlu0 %v4895_v57, %s6902_s27  ;;  %4921 = vrot.lane.b32.xlu1 %v4890_v58, %s6902_s27 }
 0x379   : > { %4936 = vrot.lane.b32.xlu0 %v4905_v59, %s6902_s27  ;;  %4931 = vrot.lane.b32.xlu1 %v4900_v61, %s6902_s27 }
 0x37d   : > { %4946 = vrot.lane.b32.xlu0 %v5764_v28, %s6902_s27  ;;  %4941 = vrot.lane.b32.xlu1 %v4910_v21, %s6902_s27 }
 0x381   : > { %4956 = vrot.lane.b32.xlu0 %v4895_v57, %s5251_s25  ;;  %4951 = vrot.lane.b32.xlu1 %v4890_v58, %s5251_s25 }
 0x385   : > { %4966 = vrot.lane.b32.xlu0 %v4905_v59, %s5251_s25  ;;  %4961 = vrot.lane.b32.xlu1 %v4900_v61, %s5251_s25 }
 0x389   : > { %4976 = vrot.lane.b32.xlu0 %v5764_v28, %s5251_s25  ;;  %4971 = vrot.lane.b32.xlu1 %v4910_v21, %s5251_s25  ;;  %s6930_s25 = smov 32  }
 0x38d   : > { %2624 = vperm.xlu0 %4798, %v2614_v6   ;;  %2619 = vperm.xlu1 %4799, %v2613_v62   ;;  %v4809_v6 = vunpack.i.h.bf16 %v4807_v8 }
 0x391   : > { %2634 = vperm.xlu0 %4798, %v2616_v5   ;;  %2629 = vperm.xlu1 %4799, %v2615_v10  }
 0x39f   : > { %v5889_v13 = vpop.permute.xlu1 %1909  ;;  %v4822_v14 = vpop.permute.xlu0 %4821 }
 0x3a0   : > { %v4824_v52 = vunpack.i.h.bf16 %v4822_v14  ;;  %v4823_v53 = vunpack.i.l.bf16 %v4822_v14 }
 0x3a2   : > { %v2098_v62 = vsel %vm800_vm0, %v4823_v53, %v4824_v52 }
 0x3a3   : > { %v4832_v16 = vpop.permute.xlu1 %4831  ;;  %v5891_v17 = vpop.permute.xlu0 %4826 }
 0x3a4   : > { %v4834_v35 = vunpack.i.h.bf16 %v4832_v16  ;;  %v4833_v43 = vunpack.i.l.bf16 %v4832_v16 }
 0x3a6   : > { %v2100_v58 = vsel %vm800_vm0, %v4833_v43, %v4834_v35 }
 0x3a7   : > { %v5893_v20 = vpop.permute.xlu1 %4836  ;;  %v5895_v22 = vpop.permute.xlu0 %1911 }
 0x3a8   : > { %v4839_v52 = vunpack.i.h.bf16 %v5893_v20 }
 0x3ab   : > { %v5897_v23 = vpop.permute.xlu1 %1913  ;;  %v5899_v24 = vpop.permute.xlu0 %1915 }
 0x3af   : > { %v5901_v9 = vpop.permute.xlu1 %4846  ;;  %v4842_v12 = vpop.permute.xlu0 %4841 }
 0x3b0   : > { %v4844_v49 = vunpack.i.h.bf16 %v4842_v12  ;;  %v4843_v50 = vunpack.i.l.bf16 %v4842_v12  ;;  %v4849_v16 = vunpack.i.h.bf16 %v5901_v9  ;;  %v4848_v12 = vunpack.i.l.bf16 %v5901_v9 }
 0x3b1   : > { %v4814_v9 = vunpack.i.h.bf16 %v5885_v11 }
 0x3b2   : > { %v2101_v59 = vsel %vm800_vm0, %v4803_v55, %v4843_v50  ;;  %v2102_v61 = vsel %vm800_vm0, %v4843_v50, %v4844_v49  ;;  %v4808_v55 = vunpack.i.l.bf16 %v4807_v8  ;;  %v2099_v49 = vsel %vm800_vm0, %v4809_v6, %v4833_v43 }
 0x3b3   : > { %v5903_v27 = vpop.permute.xlu1 %4851  ;;  %v5905_v28 = vpop.permute.xlu0 %1917  ;;  %v4475_v50 = vpack.c.bf16 %v2100_v58, %v2098_v62  ;;  %v4829_v8 = vunpack.i.h.bf16 %v5891_v17  ;;  %v4828_v43 = vunpack.i.l.bf16 %v5891_v17  ;;  %v4819_v62 = vunpack.i.h.bf16 %v5887_v3 }
 0x3b7   : > { %v5907_v38 = vpop.permute.xlu1 %1919  ;;  %v5909_v47 = vpop.permute.xlu0 %4866 }
 0x3bb   : > { %v4857_v54 = vpop.permute.xlu1 %4856  ;;  %v5911_v2 = vpop.permute.xlu0 %4876 }
 0x3bc   : > { %v4859_v56 = vunpack.i.h.bf16 %v4857_v54  ;;  %v4858_v57 = vunpack.i.l.bf16 %v4857_v54 }
 0x3be   : > { %v2103_v21 = vsel %vm800_vm0, %v4804_v7, %v4858_v57  ;;  %v2104_v1 = vsel %vm800_vm0, %v4858_v57, %v4859_v56  ;;  %v4838_v7 = vunpack.i.l.bf16 %v5893_v20  ;;  %v2097_v57 = vsel %vm800_vm0, %v4808_v55, %v4823_v53 }
 0x3bf   : > { %v4472_v5 = vpack.c.bf16 %v2103_v21, %v2101_v59  ;;  %v5919_v10 = vpop.permute.xlu1 %4861  ;;  %v4882_v14 = vpop.permute.xlu0 %4881  ;;  %v4469_v4 = vpack.c.bf16 %v2104_v1, %v2102_v61  ;;  %v4478_v20 = vpack.c.bf16 %v2099_v49, %v2097_v57  ;;  %v2002_v61 = vsel %vm699_vm5, %v4848_v12, %v4849_v16 }
 0x3c0   : > { %v4884_v35 = vunpack.i.h.bf16 %v4882_v14  ;;  %v4883_v54 = vunpack.i.l.bf16 %v4882_v14  ;;  %v1930_v21 = vrot.slane %v5907_v38, 4  ;;  %v4813_v1 = vunpack.i.l.bf16 %v5885_v11 }
 0x3c1   : > { %4470 = vmatprep.subr.msk.bf16.mxu1 %vm5576_vm3, %v4469_v4  ;;  %v2000_v17 = vsel %vm699_vm5, %v4838_v7, %v4839_v52  ;;  %v1998_v14 = vsel %vm699_vm5, %v4828_v43, %v4829_v8  ;;  %v1927_v4 = vrot.slane %v5897_v23, 4  ;;  %v1928_v38 = vrot.slane %v5899_v24, 4 }
 0x3c2   : > { %v2004_v56 = vsel %vm699_vm5, %v4883_v54, %v4884_v35  ;;  %4473 = vmatpush1.bf16.msk.msra.mxu1 %vm5586_vm4, %v4472_v5  ;;  %v2003_v53 = vsel %vm699_vm5, %v4814_v9, %v4883_v54  ;;  %v1929_v5 = vrot.slane %v5905_v28, 4  ;;  %v2001_v11 = vsel %vm699_vm5, %v4813_v1, %v4848_v12 }
 0x3c3   : > { %v5935_v59 = vpop.permute.xlu1 %4871  ;;  %v5937_v58 = vpop.permute.xlu0 %4886  ;;  %4476 = vmatprep.subr.msk.bf16.mxu1 %vm5576_vm3, %v4475_v50  ;;  %v4481_v6 = vpack.c.bf16 %v2004_v56, %v2002_v61  ;;  %v4484_v55 = vpack.c.bf16 %v2003_v53, %v2001_v11  ;;  %v4818_v52 = vunpack.i.l.bf16 %v5887_v3  ;;  %v1999_v56 = vsel %vm699_vm5, %v4819_v62, %v4838_v7 }
 0x3c4   : > { %v1937_v54 = vsel %vm621_vm10, %v1929_v5, %v1930_v21  ;;  %v1926_v9 = vrot.slane %v5895_v22, 4  ;;  %v4487_v57 = vpack.c.bf16 %v2000_v17, %v1998_v14  ;;  %v1925_v24 = vrot.slane %v5889_v13, 4 }
 0x3c5   : > { %v1997_v8 = vsel %vm699_vm5, %v4818_v52, %v4828_v43  ;;  %v1938_v61 = vsel %vm623_vm11, %v5905_v28, %v1937_v54  ;;  %v4888_v43 = vunpack.i.l.bf16 %v5937_v58  ;;  %v4854_v5 = vunpack.i.h.bf16 %v5903_v27 }
 0x3c6   : > { %4479 = vmatpush1.bf16.msk.msra.mxu1 %vm5586_vm4, %v4478_v20  ;;  %v1935_v20 = vsel %vm621_vm10, %v1927_v4, %v1928_v38  ;;  %v4490_v21 = vpack.c.bf16 %v1999_v56, %v1997_v8  ;;  %v1933_v53 = vsel %vm621_vm10, %v1925_v24, %v1926_v9  ;;  %v4853_v14 = vunpack.i.l.bf16 %v5903_v27 }
 0x3c7   : > { %v1924_v16 = vpop.permute.xlu1 %1923  ;;  %v1922_v35 = vpop.permute.xlu0 %1921  ;;  %4482 = vmatprep.subr.msk.bf16.mxu1 %vm5610_vm7, %v4481_v6  ;;  %v4889_v6 = vunpack.i.h.bf16 %v5937_v58  ;;  %v1936_v28 = vsel %vm623_vm11, %v5897_v23, %v1935_v20  ;;  %v1934_v38 = vsel %vm623_vm11, %v5889_v13, %v1933_v53  ;;  %v4864_v58 = vunpack.i.h.bf16 %v5919_v10 }
 0x3c8   : > { %v1932_v49 = vrot.slane %v1924_v16, 4  ;;  %v1931_v50 = vrot.slane %v1922_v35, 4  ;;  %v4200_v11 = vcombine.high %v1934_v38, %v1936_v28  ;;  %v4863_v16 = vunpack.i.l.bf16 %v5919_v10 }
 0x3c9   : > { %v4873_v23 = vunpack.i.l.bf16 %v5935_v59  ;;  %v1820_v54 = vsel %vm500_vm12, %v4888_v43, %v4889_v6  ;;  %v4868_v27 = vunpack.i.l.bf16 %v5909_v47  ;;  %v1818_v13 = vsel %vm500_vm12, %v4853_v14, %v4854_v5 }
 0x3ca   : > { %v1939_v12 = vsel %vm621_vm10, %v1931_v50, %v1932_v49  ;;  %4485 = vmatpush1.bf16.msk.msra.mxu1 %vm5622_vm9, %v4484_v55  ;;  %v4869_v55 = vunpack.i.h.bf16 %v5909_v47  ;;  %v1819_v52 = vsel %vm500_vm12, %v4864_v58, %v4888_v43  ;;  %v4199_v56 = vcombine.low %v1934_v38, %v1936_v28 }
 0x3cb   : > { %v1940_v3 = vsel %vm623_vm11, %v1922_v35, %v1939_v12  ;;  %v5969_v7 = vpop.permute.xlu1 %2437  ;;  %v2440_v22 = vpop.permute.xlu0 %2439  ;;  %4488 = vmatprep.subr.msk.bf16.mxu1 %vm5610_vm7, %v4487_v57  ;;  %v4874_v35 = vunpack.i.h.bf16 %v5935_v59  ;;  %v4493_v57 = vpack.c.bf16 %v1820_v54, %v1818_v13  ;;  %v1817_v59 = vsel %vm500_vm12, %v4863_v16, %v4853_v14 }
 0x3cc   : > { %v4202_v1 = vcombine.high %v1938_v61, %v1940_v3  ;;  %v4201_v4 = vcombine.low %v1938_v61, %v1940_v3  ;;  %v2449_v10 = vrot.slane %v5969_v7, 4  ;;  %v2450_v9 = vrot.slane %v2440_v22, 4 }
 0x3cd   : > { %v1816_v24 = vsel %vm500_vm12, %v4873_v23, %v4874_v35  ;;  %v1814_v12 = vsel %vm500_vm12, %v4868_v27, %v4869_v55  ;;  %v4879_v47 = vunpack.i.h.bf16 %v5911_v2  ;;  %v4878_v8 = vunpack.i.l.bf16 %v5911_v2 }
 0x3ce   : > { %4491 = vmatpush1.bf16.msk.msra.mxu1 %vm5622_vm9, %v4490_v21  ;;  %v4496_v20 = vpack.c.bf16 %v1819_v52, %v1817_v59  ;;  %v2457_v43 = vsel %vm621_vm10, %v2449_v10, %v2450_v9  ;;  %v4499_v5 = vpack.c.bf16 %v1816_v24, %v1814_v12  ;;  %vm6903_vm5 = vcmask 924672  }
 0x3cf   : > { %v5980_v62 = vpop.permute.xlu1 %2429  ;;  %v2444_v17 = vpop.permute.xlu0 %2443  ;;  %2861 = vmatprep.subr.bf16.mxu1 %v4202_v1  ;;  %v1815_v6 = vsel %vm500_vm12, %v4879_v47, %v4873_v23  ;;  %v2458_v35 = vsel %vm1160_vm13, %v5969_v7, %v2457_v43  ;;  %vm6904_vm6 = vmmov %vm6903_vm5 }
 0x3d0   : > { %v2452_v21 = vrot.slane %v2444_v17, 4  ;;  %v2445_v17 = vrot.slane %v5980_v62, 4  ;;  %vm6905_vm8 = vmmov %vm6903_vm5 }
 0x3d1   : > { %vm6908_vm14 = vmmov %vm6903_vm5 }
 0x3d2   : > { %2862 = vmatpush1.bf16.msra.mxu1 %v4201_v4  ;;  %v1813_v4 = vsel %vm500_vm12, %v4878_v8, %v4868_v27  ;;  %vm6907_vm12 = vmmov %vm6903_vm5 }
 0x3d3   : > { %v2434_v49 = vpop.permute.xlu1 %2433  ;;  %v2432_v50 = vpop.permute.xlu0 %2431  ;;  %2863 = vmatprep.subr.bf16.mxu1 %v4200_v11  ;;  %v4502_v16 = vpack.c.bf16 %v1815_v6, %v1813_v4  ;;  %vm6909_vm15 = vmmov %vm6903_vm5 }
 0x3d4   : > { %v2447_v22 = vrot.slane %v2434_v49, 4  ;;  %v2446_v28 = vrot.slane %v2432_v50, 4  ;;  %vm6910_vm1 = vmmov %vm6903_vm5 }
 0x3d6   : > { %2864 = vmatpush1.bf16.msra.mxu1 %v4199_v56  ;;  %v2453_v23 = vsel %vm621_vm10, %v2445_v17, %v2446_v28 }
 0x3d7   : > { %v2442_v61 = vpop.permute.xlu1 %2441  ;;  %v2436_v3 = vpop.permute.xlu0 %2435  ;;  %4494 = vmatprep.subr.msk.bf16.mxu1 %vm5576_vm3, %v4493_v57  ;;  %v2454_v7 = vsel %vm1160_vm13, %v5980_v62, %v2453_v23 }
 0x3d8   : > { %v2451_v1 = vrot.slane %v2442_v61, 4  ;;  %v2448_v53 = vrot.slane %v2436_v3, 4 }
 0x3da   : > { %v2459_v14 = vsel %vm621_vm10, %v2451_v1, %v2452_v21  ;;  %v2455_v2 = vsel %vm621_vm10, %v2447_v22, %v2448_v53  ;;  %4497 = vmatpush1.bf16.msk.msra.mxu1 %vm5586_vm4, %v4496_v20  ;;  %vm6906_vm10 = vmmov %vm6903_vm5 }
 0x3db   : > { %v2460_v38 = vsel %vm1160_vm13, %v2442_v61, %v2459_v14  ;;  %v4892_v58 = vpop.permute.xlu1 %4891  ;;  %v4897_v11 = vpop.permute.xlu0 %4896  ;;  %4500 = vmatprep.subr.msk.bf16.mxu1 %vm5576_vm3, %v4499_v5  ;;  %v2456_v55 = vsel %vm1160_vm13, %v2434_v49, %v2455_v2 }
 0x3dc   : > { %v4226_v54 = vcombine.high %v2458_v35, %v2460_v38  ;;  %v4894_v50 = vunpack.i.h.bf16 %v4892_v58  ;;  %v4893_v27 = vunpack.i.l.bf16 %v4892_v58  ;;  %v4899_v13 = vunpack.i.h.bf16 %v4897_v11 }
 0x3dd   : > { %v4898_v52 = vunpack.i.l.bf16 %v4897_v11  ;;  %v4225_v9 = vcombine.low %v2458_v35, %v2460_v38  ;;  %v4224_v24 = vcombine.high %v2454_v7, %v2456_v55  ;;  %v4223_v3 = vcombine.low %v2454_v7, %v2456_v55 }
 0x3de   : > { %4503 = vmatpush1.bf16.msk.msra.mxu1 %vm5586_vm4, %v4502_v16  ;;  %v2338_v12 = vsel %vm6903_vm5, %v4893_v27, %v4894_v50  ;;  %vm6912_vm5 = vmmov %vm6911_vm2 }
 0x3df   : > { %v4902_v56 = vpop.permute.xlu1 %4901  ;;  %v4907_v10 = vpop.permute.xlu0 %4906  ;;  %2869 = vmatprep.subr.bf16.mxu1 %v4226_v54  ;;  %v2340_v49 = vsel %vm6904_vm6, %v4898_v52, %v4899_v13  ;;  %vm6913_vm6 = vmmov %vm6911_vm2 }
 0x3e0   : > { %v4904_v57 = vunpack.i.h.bf16 %v4902_v56  ;;  %v4903_v59 = vunpack.i.l.bf16 %v4902_v56  ;;  %v4909_v47 = vunpack.i.h.bf16 %v4907_v10  ;;  %v4908_v8 = vunpack.i.l.bf16 %v4907_v10 }
 0x3e1   : > { %v4505_v43 = vpack.c.bf16 %v2340_v49, %v2338_v12 }
 0x3e2   : > { %2870 = vmatpush2.bf16.msra.mxu1 %v4225_v9  ;;  %v2337_v21 = vsel %vm6905_vm8, %v4903_v59, %v4893_v27  ;;  %v2339_v22 = vsel %vm6906_vm10, %v4904_v57, %v4898_v52  ;;  %v2334_v14 = vsel %vm6908_vm14, %v4908_v8, %v4909_v47  ;;  %vm6914_vm8 = vmmov %vm6911_vm2 }
 0x3e3   : > { %v4912_v20 = vpop.permute.xlu1 %4911  ;;  %v4917_v61 = vpop.permute.xlu0 %4916  ;;  %2871 = vmatprep.subr.bf16.mxu1 %v4224_v24  ;;  %v4508_v5 = vpack.c.bf16 %v2339_v22, %v2337_v21  ;;  %vm6916_vm10 = vmmov %vm6911_vm2 }
 0x3e4   : > { %v4914_v1 = vunpack.i.h.bf16 %v4912_v20  ;;  %v4913_v53 = vunpack.i.l.bf16 %v4912_v20  ;;  %v4919_v6 = vunpack.i.h.bf16 %v4917_v61  ;;  %v4918_v62 = vunpack.i.l.bf16 %v4917_v61  ;;  %vm6918_vm14 = vmmov %vm6911_vm2 }
 0x3e6   : > { %v2336_v28 = vsel %vm6907_vm12, %v4913_v53, %v4914_v1  ;;  %2872 = vmatpush2.bf16.msra.mxu1 %v4223_v3  ;;  %v2335_v16 = vsel %vm6909_vm15, %v4919_v6, %v4913_v53  ;;  %v2333_v35 = vsel %vm6910_vm1, %v4918_v62, %v4908_v8  ;;  %vm6917_vm12 = vmmov %vm6911_vm2 }
 0x3e7   : > { %v4922_v2 = vpop.permute.xlu1 %4921  ;;  %v4927_v4 = vpop.permute.xlu0 %4926  ;;  %4506 = vmatprep.subr.msk.bf16.mxu1 %vm5576_vm3, %v4505_v43  ;;  %v4511_v23 = vpack.c.bf16 %v2336_v28, %v2334_v14  ;;  %v4514_v13 = vpack.c.bf16 %v2335_v16, %v2333_v35 }
 0x3e8   : > { %v4924_v17 = vunpack.i.h.bf16 %v4922_v2  ;;  %v4923_v38 = vunpack.i.l.bf16 %v4922_v2  ;;  %v4929_v58 = vunpack.i.h.bf16 %v4927_v4  ;;  %v4928_v11 = vunpack.i.l.bf16 %v4927_v4 }
 0x3ea   : > { %v2238_v54 = vsel %vm6911_vm2, %v4923_v38, %v4924_v17  ;;  %v2240_v55 = vsel %vm6912_vm5, %v4928_v11, %v4929_v58  ;;  %4509 = vmatpush2.bf16.msk.msra.mxu1 %vm5586_vm4, %v4508_v5 }
 0x3eb   : > { %v4932_v50 = vpop.permute.xlu1 %4931  ;;  %v4937_v27 = vpop.permute.xlu0 %4936  ;;  %4512 = vmatprep.subr.msk.bf16.mxu1 %vm5576_vm3, %v4511_v23  ;;  %v4517_v10 = vpack.c.bf16 %v2240_v55, %v2238_v54  ;;  %vm6915_vm3 = vmmov %vm6911_vm2 }
 0x3ec   : > { %v4934_v52 = vunpack.i.h.bf16 %v4932_v50  ;;  %v4933_v56 = vunpack.i.l.bf16 %v4932_v50  ;;  %v4939_v59 = vunpack.i.h.bf16 %v4937_v27  ;;  %v4938_v7 = vunpack.i.l.bf16 %v4937_v27 }
 0x3ee   : > { %v2237_v9 = vsel %vm6913_vm6, %v4933_v56, %v4923_v38  ;;  %v2239_v57 = vsel %vm6914_vm8, %v4934_v52, %v4928_v11  ;;  %4515 = vmatpush2.bf16.msk.msra.mxu1 %vm5586_vm4, %v4514_v13  ;;  %v2234_v61 = vsel %vm6915_vm3, %v4938_v7, %v4939_v59  ;;  %vm6919_vm4 = vcmask 908288   ;;  %v5068_v52 = vld [vmem:[#allocation7] ss:$12 sps:$4 sm:$0xff]  }
 0x3ef   : > { %v4520_v24 = vpack.c.bf16 %v2239_v57, %v2237_v9  ;;  %v4942_v12 = vpop.permute.xlu1 %4941  ;;  %v4947_v49 = vpop.permute.xlu0 %4946  ;;  %4518 = vmatprep.subr.msk.bf16.mxu1 %vm5610_vm7, %v4517_v10  ;;  %vm6920_vm15 = vmmov %vm6919_vm4  ;;  %v5071_v10 = vld [vmem:[#allocation7 + $0x8] ss:$12 sps:$4 sm:$0xff]   ;;  %v5074_v9 = vld [vmem:[#allocation7 + $0x18] ss:$12 sps:$4 sm:$0xff]  }
 0x3f0   : > { %v4944_v63 = vunpack.i.h.bf16 %v4942_v12  ;;  %v4943_v47 = vunpack.i.l.bf16 %v4942_v12  ;;  %v4949_v8 = vunpack.i.h.bf16 %v4947_v49  ;;  %v4948_v20 = vunpack.i.l.bf16 %v4947_v49  ;;  %vm6921_vm1 = vmmov %vm6919_vm4 }
 0x3f1   : > { %vm6922_vm2 = vmmov %vm6921_vm1 }
 0x3f2   : > { %v2236_v3 = vsel %vm6916_vm10, %v4943_v47, %v4944_v63  ;;  %v2235_v21 = vsel %vm6917_vm12, %v4949_v8, %v4943_v47  ;;  %v2233_v22 = vsel %vm6918_vm14, %v4948_v20, %v4938_v7  ;;  %4521 = vmatpush2.bf16.msk.msra.mxu1 %vm5622_vm9, %v4520_v24  ;;  %vm6923_vm5 = vmmov %vm6921_vm1  ;;  %vm6927_vm10 = vcmask 261120  }
 0x3f3   : > { %v4526_v15 = vpack.c.bf16 %v2235_v21, %v2233_v22  ;;  %v4952_v1 = vpop.permute.xlu1 %4951  ;;  %v4957_v53 = vpop.permute.xlu0 %4956  ;;  %v4523_v6 = vpack.c.bf16 %v2236_v3, %v2234_v61  ;;  %vm6924_vm6 = vmmov %vm6921_vm1 }
 0x3f4   : > { %v4954_v62 = vunpack.i.h.bf16 %v4952_v1  ;;  %v4953_v43 = vunpack.i.l.bf16 %v4952_v1  ;;  %v4959_v28 = vunpack.i.h.bf16 %v4957_v53  ;;  %v4958_v5 = vunpack.i.l.bf16 %v4957_v53  ;;  %vm6925_vm8 = vmmov %vm6921_vm1 }
 0x3f5   : > { %4524 = vmatprep.subr.msk.bf16.mxu1 %vm5610_vm7, %v4523_v6  ;;  %vm6926_vm3 = vmmov %vm6921_vm1 }
 0x3f6   : > { %v2522_v14 = vsel %vm6919_vm4, %v4953_v43, %v4954_v62  ;;  %v2524_v2 = vsel %vm6920_vm15, %v4958_v5, %v4959_v28  ;;  %4527 = vmatpush2.bf16.msk.msra.mxu1 %vm5622_vm9, %v4526_v15  ;;  %vm6928_vm12 = vmmov %vm6927_vm10 }
 0x3f7   : > { %v4962_v4 = vpop.permute.xlu1 %4961  ;;  %v4967_v17 = vpop.permute.xlu0 %4966  ;;  %2881 = vmatprep.subr.bf16.mxu1 %v4455_v39  ;;  %v4529_v38 = vpack.c.bf16 %v2524_v2, %v2522_v14 }
 0x3f8   : > { %v4964_v58 = vunpack.i.h.bf16 %v4962_v4  ;;  %v4963_v11 = vunpack.i.l.bf16 %v4962_v4  ;;  %v4969_v23 = vunpack.i.h.bf16 %v4967_v17  ;;  %v4968_v54 = vunpack.i.l.bf16 %v4967_v17 }
 0x3f9   : > { %4530 = vmatprep.subr.msk.bf16.mxu0 %vm5610_vm7, %v4529_v38 }
 0x3fa   : > { %v2521_v16 = vsel %vm6921_vm1, %v4963_v11, %v4953_v43  ;;  %v2523_v35 = vsel %vm6922_vm2, %v4964_v58, %v4958_v5  ;;  %2882 = vmatpush2.bf16.msra.mxu1 %v4454_v40  ;;  %v2518_v56 = vsel %vm6923_vm5, %v4968_v54, %v4969_v23 }
 0x3fb   : > { %v4532_v55 = vpack.c.bf16 %v2523_v35, %v2521_v16  ;;  %v4972_v50 = vpop.permute.xlu1 %4971  ;;  %v4977_v31 = vpop.permute.xlu0 %4976  ;;  %2883 = vmatprep.subr.bf16.mxu1 %v4453_v41 }
 0x3fc   : > { %v4974_v36 = vunpack.i.h.bf16 %v4972_v50  ;;  %v4973_v39 = vunpack.i.l.bf16 %v4972_v50  ;;  %v4979_v27 = vunpack.i.h.bf16 %v4977_v31  ;;  %v4978_v13 = vunpack.i.l.bf16 %v4977_v31 }
 0x3fd   : > { %4533 = vmatpush1.bf16.msk.msra.mxu0 %vm5622_vm9, %v4532_v55 }
 0x3fe   : > { %v2520_v30 = vsel %vm6924_vm6, %v4973_v39, %v4974_v36  ;;  %v2519_v32 = vsel %vm6925_vm8, %v4979_v27, %v4973_v39  ;;  %v2517_v40 = vsel %vm6926_vm3, %v4978_v13, %v4968_v54  ;;  %2884 = vmatpush2.bf16.msra.mxu1 %v4452_v45  ;;  %vm6939_vm8 = vcmp.ge.s32.totalorder %v5564_v48, 0 }
 0x3ff   : > { %v4538_v26 = vpack.c.bf16 %v2519_v32, %v2517_v40  ;;  %v4535_v41 = vpack.c.bf16 %v2520_v30, %v2518_v56  ;;  %vm6940_vm3 = vmmov %vm6939_vm8 }
 0x401   : > { %2886 = vmatmul.mubr.bf16.vlgmr.msra.gmra.mxu1 %v5068_v52  ;;  %4536 = vmatprep.subr.msk.bf16.mxu0 %vm5610_vm7, %v4535_v41  ;;  %vm3047_vm7 = vcmask 15360  }
 0x402   : > { %4539 = vmatpush1.bf16.msk.msra.mxu0 %vm5622_vm9, %v4538_v26  ;;  %2895 = vmatprep.mubr.bf16.mxu1 %v5072_v19  ;;  %vm6931_vm9 = vmmov %vm6927_vm10 }
 0x403   : > { %vm6932_vm14 = vmmov %vm6931_vm9 }
 0x404   : > { %vm6933_vm4 = vmmov %vm6931_vm9 }
 0x405   : > { %4231 = vmatmul.mubr.msk.bf16.vlgmr.msra.gmra.mxu0 %vm6927_vm10, %v5071_v10  ;;  %vm6934_vm15 = vmmov %vm6933_vm4 }
 0x406   : > { %2948 = vmatprep.mubr.bf16.mxu0 %v5252_v33  ;;  %vm6935_vm1 = vmmov %vm6933_vm4 }
 0x407   : > { %vm6936_vm2 = vmmov %vm6935_vm1 }
 0x408   : > { %v2620_v57 = vpop.permute.xlu1 %2619  ;;  %v2625_v49 = vpop.permute.xlu0 %2624  ;;  %vm6937_vm5 = vmmov %vm6935_vm1 }
 0x409   : > { %2896 = vmatmul.mubr.bf16.gmra.mxu1 %v5074_v9  ;;  %vm6938_vm6 = vmmov %vm6935_vm1 }
 0x40a   : > { %vm6941_vm10 = vmmov %vm6940_vm3 }
 0x40c   : > { %v2630_v15 = vpop.permute.xlu1 %2629  ;;  %v2635_v38 = vpop.permute.xlu0 %2634 }
 0x40d   : > { %4232 = vmatmul.mubr.msk.bf16.gmra.mxu0 %vm6928_vm12, %v5075_v18 }
 0x4c1   : > { %v2887_v25 = vpop.f32.mrf.mxu1 }
 0x4c2   : > { %v2888_v7 = vadd.f32 %v2887_v25, %v2620_v57 }
 0x4c3   : > { %v2889_v45 = vpop.f32.mrf.mxu1 }
 0x4c4   : > { %v2890_v24 = vadd.f32 %v2889_v45, %v2620_v57 }
 0x4c5   : > { %v2891_v59 = vpop.f32.mrf.mxu1  ;;  %v2940_v37 = vpop.f32.mrf.mxu0 }
 0x4c6   : > { %v2941_v63 = vadd.f32 %v2940_v37, %v2888_v7  ;;  %v2892_v61 = vadd.f32 %v2891_v59, %v2625_v49 }
 0x4c7   : > { %v2893_v12 = vpop.f32.mrf.mxu1  ;;  %v2942_v51 = vpop.f32.mrf.mxu0 }
 0x4c8   : > { %v2943_v47 = vadd.f32 %v2942_v51, %v2890_v24  ;;  %v2894_v33 = vadd.f32 %v2893_v12, %v2625_v49 }
 0x4c9   : > { %v2897_v8 = vpop.f32.mrf.mxu1  ;;  %v2944_v20 = vpop.f32.mrf.mxu0 }
 0x4ca   : > { %v2959_v3 = vadd.f32 %v2943_v47, %v2941_v63  ;;  %v2945_v1 = vadd.f32 %v2944_v20, %v2892_v61  ;;  %v2898_v43 = vadd.f32 %v2897_v8, %v2630_v15 }
 0x4cb   : > { %v2899_v21 = vpop.f32.mrf.mxu1  ;;  %v2946_v22 = vpop.f32.mrf.mxu0 }
 0x4cc   : > { %v2947_v53 = vadd.f32 %v2946_v22, %v2894_v33  ;;  %2960 = vadd.xlane.f32.xlu1 %v2959_v3  ;;  %v2900_v28 = vadd.f32 %v2899_v21, %v2630_v15 }
 0x4cd   : > { %v2901_v6 = vpop.f32.mrf.mxu1  ;;  %v2950_v62 = vpop.f32.mrf.mxu0 }
 0x4ce   : > { %v2962_v5 = vadd.f32 %v2947_v53, %v2945_v1  ;;  %v2951_v4 = vadd.f32 %v2950_v62, %v2898_v43  ;;  %v2902_v11 = vadd.f32 %v2901_v6, %v2635_v38 }
 0x4cf   : > { %v2903_v14 = vpop.f32.mrf.mxu1  ;;  %v2952_v2 = vpop.f32.mrf.mxu0 }
 0x4d0   : > { %v2953_v17 = vadd.f32 %v2952_v2, %v2900_v28  ;;  %2963 = vadd.xlane.f32.xlu0 %v2962_v5  ;;  %v2904_v16 = vadd.f32 %v2903_v14, %v2635_v38 }
 0x4d1   : > { %v2954_v58 = vpop.f32.mrf.mxu0 }
 0x4d2   : > { %v2965_v35 = vadd.f32 %v2953_v17, %v2951_v4  ;;  %v2955_v54 = vadd.f32 %v2954_v58, %v2902_v11 }
 0x4d3   : > { %v2956_v23 = vpop.f32.mrf.mxu0 }
 0x4d4   : > { %v2957_v55 = vadd.f32 %v2956_v23, %v2904_v16  ;;  %2966 = vadd.xlane.f32.xlu0 %v2965_v35 }
 0x4d6   : > { %v2968_v50 = vadd.f32 %v2957_v55, %v2955_v54 }
 0x4d8   : > { %2969 = vadd.xlane.f32.xlu1 %v2968_v50 }
 0x555   : > { %v2961_v31 = vpop.xlane.xlu1 %2960 }
 0x556   : > { %v2971_v36 = vmul.f32 0.00390625, %v2961_v31 }
 0x558   : > { %v2975_v39 = vsub.f32 %v2941_v63, %v2971_v36  ;;  %v2976_v27 = vsub.f32 %v2943_v47, %v2971_v36  ;;  %v3040_v36 = vld [vmem:[%s6846_s5 + $0x8] sm:$0xff] }
 0x559   : > { %v2964_v13 = vpop.xlane.xlu0 %2963 }
 0x55a   : > { %v2983_v52 = vmul.f32 %v2975_v39, %v2975_v39  ;;  %v2984_v56 = vmul.f32 %v2976_v27, %v2976_v27  ;;  %v2972_v30 = vmul.f32 0.00390625, %v2964_v13 }
 0x55c   : > { %v2977_v32 = vsub.f32 %v2945_v1, %v2972_v30  ;;  %v2978_v40 = vsub.f32 %v2947_v53, %v2972_v30  ;;  %v2991_v19 = vadd.f32 %v2984_v56, %v2983_v52  ;;  %v3039_v52 = vld [vmem:[%s6846_s5] sm:$0xff]  ;;  %v3041_v30 = vld [vmem:[%s6846_s5 + $0x10] sm:$0xff] }
 0x55d   : > { %v2967_v26 = vpop.xlane.xlu0 %2966 }
 0x55e   : > { %v2985_v41 = vmul.f32 %v2977_v32, %v2977_v32  ;;  %v2986_v10 = vmul.f32 %v2978_v40, %v2978_v40  ;;  %v2973_v9 = vmul.f32 0.00390625, %v2967_v26  ;;  %2992 = vadd.xlane.f32.xlu0 %v2991_v19 }
 0x560   : > { %v2979_v18 = vsub.f32 %v2951_v4, %v2973_v9  ;;  %v2980_v25 = vsub.f32 %v2953_v17, %v2973_v9  ;;  %v2994_v45 = vadd.f32 %v2986_v10, %v2985_v41  ;;  %v3042_v10 = vld [vmem:[%s6846_s5 + $0x18] sm:$0xff] }
 0x561   : > { %v2970_v57 = vpop.xlane.xlu1 %2969 }
 0x562   : > { %v2987_v59 = vmul.f32 %v2979_v18, %v2979_v18  ;;  %v2988_v37 = vmul.f32 %v2980_v25, %v2980_v25  ;;  %v2974_v7 = vmul.f32 0.00390625, %v2970_v57  ;;  %2995 = vadd.xlane.f32.xlu1 %v2994_v45 }
 0x564   : > { %v2981_v24 = vsub.f32 %v2955_v54, %v2974_v7  ;;  %v2982_v12 = vsub.f32 %v2957_v55, %v2974_v7  ;;  %v2997_v51 = vadd.f32 %v2988_v37, %v2987_v59 }
 0x566   : > { %v2989_v49 = vmul.f32 %v2981_v24, %v2981_v24  ;;  %v2990_v63 = vmul.f32 %v2982_v12, %v2982_v12  ;;  %2998 = vadd.xlane.f32.xlu0 %v2997_v51 }
 0x568   : > { %v3000_v47 = vadd.f32 %v2990_v63, %v2989_v49 }
 0x56a   : > { %3001 = vadd.xlane.f32.xlu1 %v3000_v47  ;;  %v6126_v47 = vshrl.u32 %v389_v34, 7  ;;  %v3064_v34 = vld [vmem:[%s6848_s7] sm:$0xff] }
 0x5e7   : > { %v2993_v8 = vpop.xlane.xlu0 %2992 }
 0x5e8   : > { %v3003_v20 = vmul.f32 0.00390625, %v2993_v8 }
 0x5ea   : > { %v3007_v61 = vadd.f32 1e-05, %v3003_v20  ;;  %v3061_v20 = vld [vmem:[%s6847_s6] sm:$0x1] }
 0x5eb   : > { %v2996_v33 = vpop.xlane.xlu1 %2995 }
 0x5ec   : > { %5084 = vrsqrt.f32 %v3007_v61  ;;  %v3004_v3 = vmul.f32 0.00390625, %v2996_v33  ;;  %v6132_v33 = vsub.s32 0, %v6126_v47 }
 0x5ee   : > { %v3008_v21 = vadd.f32 1e-05, %v3004_v3 }
 0x5ef   : > { %v2999_v22 = vpop.xlane.xlu0 %2998 }
 0x5f0   : > { %5086 = vrsqrt.f32 %v3008_v21  ;;  %v3005_v15 = vmul.f32 0.00390625, %v2999_v22  ;;  %v3065_v22 = vld [vmem:[%s6848_s7 + $0x8] sm:$0xff] }
 0x5f2   : > { %v3009_v1 = vadd.f32 1e-05, %v3005_v15 }
 0x5f3   : > { %v3002_v53 = vpop.xlane.xlu1 %3001 }
 0x5f4   : > { %5088 = vrsqrt.f32 %v3009_v1  ;;  %v3006_v6 = vmul.f32 0.00390625, %v3002_v53  ;;  %v3067_v1 = vld [vmem:[%s6848_s7 + $0x18] sm:$0xff]  ;;  %v3066_v53 = vld [vmem:[%s6848_s7 + $0x10] sm:$0xff] }
 0x5f6   : > { %v3010_v62 = vadd.f32 1e-05, %v3006_v6 }
 0x5f8   : > { %5090 = vrsqrt.f32 %v3010_v62 }
 0x5f9   : > { %v5085_v43 = vpop.eup %5084 }
 0x5fa   : > { %v6085_v28 = vmul.f32 %v5085_v43, %v2975_v39  ;;  %v6087_v5 = vmul.f32 %v5085_v43, %v2976_v27 }
 0x5fc   : > { %v3023_v14 = vadd.f32 %v6087_v5, %v6085_v28 }
 0x5fd   : > { %v5087_v2 = vpop.eup %5086 }
 0x5fe   : > { %3024 = vadd.xlane.f32.xlu0 %v3023_v14  ;;  %v6091_v4 = vmul.f32 %v5087_v2, %v2977_v32  ;;  %v6093_v17 = vmul.f32 %v5087_v2, %v2978_v40 }
 0x600   : > { %v3026_v38 = vadd.f32 %v6093_v17, %v6091_v4 }
 0x601   : > { %v5089_v58 = vpop.eup %5088 }
 0x602   : > { %3027 = vadd.xlane.f32.xlu1 %v3026_v38  ;;  %v6097_v11 = vmul.f32 %v5089_v58, %v2979_v18  ;;  %v6099_v16 = vmul.f32 %v5089_v58, %v2980_v25 }
 0x604   : > { %v3029_v35 = vadd.f32 %v6099_v16, %v6097_v11 }
 0x605   : > { %v5091_v23 = vpop.eup %5090 }
 0x606   : > { %3030 = vadd.xlane.f32.xlu0 %v3029_v35  ;;  %v6103_v54 = vmul.f32 %v5091_v23, %v2981_v24  ;;  %v6105_v55 = vmul.f32 %v5091_v23, %v2982_v12  ;;  %v3089_v23 = vld [vmem:[%s6849_s8 + $0x8] sm:$0xff] }
 0x608   : > { %v3032_v50 = vadd.f32 %v6105_v55, %v6103_v54 }
 0x60a   : > { %3033 = vadd.xlane.f32.xlu1 %v3032_v50  ;;  %v3088_v50 = vld [vmem:[%s6849_s8] sm:$0xff] }
 0x687   : > { %v3025_v31 = vpop.xlane.xlu0 %3024 }
 0x688   : > { %v3035_v27 = vmul.f32 0.00390625, %v3025_v31 }
 0x68a   : > { %v3043_v40 = vmul.f32 %v3039_v52, %v3035_v27  ;;  %v3090_v52 = vld [vmem:[%s6849_s8 + $0x10] sm:$0xff] }
 0x68b   : > { %v3028_v39 = vpop.xlane.xlu1 %3027 }
 0x68c   : > { %v3036_v13 = vmul.f32 0.00390625, %v3028_v39  ;;  %v3048_v18 = vsel %vm3047_vm7, %v3043_v40, 0.0 }
 0x68e   : > { %v3044_v56 = vmul.f32 %v3040_v36, %v3036_v13  ;;  %v3091_v13 = vld [vmem:[%s6849_s8 + $0x18] sm:$0xff] }
 0x68f   : > { %v3031_v32 = vpop.xlane.xlu0 %3030 }
 0x690   : > { %v3037_v19 = vmul.f32 0.00390625, %v3031_v32  ;;  %v3049_v26 = vsel %vm3047_vm7, %v3044_v56, 0.0 }
 0x691   : > { %v3050_v57 = vadd.f32 %v3049_v26, %v3048_v18 }
 0x692   : > { %v3045_v41 = vmul.f32 %v3041_v30, %v3037_v19 }
 0x693   : > { %v3034_v9 = vpop.xlane.xlu1 %3033 }
 0x694   : > { %v3051_v25 = vsel %vm3047_vm7, %v3045_v41, 0.0  ;;  %v3038_v45 = vmul.f32 0.00390625, %v3034_v9 }
 0x695   : > { %v3052_v37 = vadd.f32 %v3051_v25, %v3050_v57 }
 0x696   : > { %v3046_v59 = vmul.f32 %v3042_v10, %v3038_v45 }
 0x698   : > { %v3053_v7 = vsel %vm3047_vm7, %v3046_v59, 0.0 }
 0x699   : > { %v3054_v24 = vadd.f32 %v3053_v7, %v3052_v37 }
 0x69b   : > { %v3055_v12 = vrot.slane %v3054_v24, 4 }
 0x69d   : > { %v3056_v51 = vadd.f32 %v3055_v12, %v3054_v24 }
 0x69f   : > { %v3057_v49 = vrot.slane %v3056_v51, 2 }
 0x6a1   : > { %v3058_v63 = vadd.f32 %v3057_v49, %v3056_v51 }
 0x6a3   : > { %v3059_v8 = vrot.slane %v3058_v63, 1 }
 0x6a5   : > { %v3060_v61 = vadd.f32 %v3059_v8, %v3058_v63 }
 0x6a7   : > { %v3062_v3 = vadd.f32 %v3061_v20, %v3060_v61 }
 0x6a9   : > { %v3063_v21 = vmax.f32 %v3062_v3, 0.0 }
 0x6ab   : > { %v3071_v15 = vrot.slane %v3063_v21, %v6132_v33 }
 0x6ad   : > { %v3073_v6 = vmul.f32 %v3071_v15, %v3065_v22  ;;  %v3072_v62 = vmul.f32 %v3071_v15, %v3064_v34  ;;  %v3075_v2 = vmul.f32 %v3071_v15, %v3067_v1  ;;  %v3074_v38 = vmul.f32 %v3071_v15, %v3066_v53 }
 0x6af   : > { %v3079_v43 = vsel %vm3047_vm7, %v3073_v6, 0.0  ;;  %v3076_v14 = vsel %vm3047_vm7, %v3072_v62, 0.0  ;;  %v3085_v58 = vsel %vm3047_vm7, %v3075_v2, 0.0  ;;  %v3082_v35 = vsel %vm3047_vm7, %v3074_v38, 0.0  ;;  %v5109_v38 = vld [vmem:[%s5410_s18 + $0x8] sm:$0xff] }
 0x6b0   : > { %3080 = vadd.xlane.f32.xlu1 %v3079_v43  ;;  %3077 = vadd.xlane.f32.xlu0 %v3076_v14  ;;  %v5108_v14 = vld [vmem:[%s5410_s18] sm:$0xff] }
 0x6b4   : > { %3086 = vadd.xlane.f32.xlu1 %v3085_v58  ;;  %3083 = vadd.xlane.f32.xlu0 %v3082_v35 }
 0x6c5   : > { %4981 = vrot.lane.b32.xlu1 %v5242_v0, %s6875_s0 }
 0x6c9   : > { %4991 = vrot.lane.b32.xlu1 %v5242_v0, %s6898_s21 }
 0x6ca   : > { %4986 = vrot.lane.b32.xlu0 %v5242_v0, %s6875_s0  ;;  %s5255_s0 = smov 2  }
 0x6cd   : > { %5001 = vrot.lane.b32.xlu1 %v5242_v0, %s6900_s29 }
 0x6ce   : > { %4996 = vrot.lane.b32.xlu0 %v5242_v0, %s6898_s21 }
 0x6d1   : > { %5011 = vrot.lane.b32.xlu1 %v5242_v0, %s5254_s1 }
 0x6d2   : > { %5006 = vrot.lane.b32.xlu0 %v5242_v0, %s6900_s29 }
 0x6d6   : > { %5016 = vrot.lane.b32.xlu0 %v5242_v0, %s5254_s1 }
 0x739   : > { %v3081_v31 = vpop.xlane.xlu1 %3080  ;;  %v3078_v36 = vpop.xlane.xlu0 %3077 }
 0x73a   : > { %v3093_v39 = vadd.f32 %v3089_v23, %v3081_v31  ;;  %v3092_v27 = vadd.f32 %v3088_v50, %v3078_v36 }
 0x73c   : > { %v4234_v56 = vmul.f32 -1.442695, %v3093_v39  ;;  %v4233_v30 = vmul.f32 -1.442695, %v3092_v27  ;;  %v5112_v39 = vld [vmem:[%s5410_s18 + $0x20] sm:$0xff] }
 0x73d   : > { %v3087_v32 = vpop.xlane.xlu1 %3086  ;;  %v3084_v40 = vpop.xlane.xlu0 %3083 }
 0x73e   : > { %5092 = vpow2.f32 %v4234_v56  ;;  %v3095_v19 = vadd.f32 %v3091_v13, %v3087_v32  ;;  %v3094_v26 = vadd.f32 %v3090_v52, %v3084_v40  ;;  %v5113_v13 = vld [vmem:[%s5410_s18 + $0x28] sm:$0xff]  ;;  %v5115_v32 = vld [vmem:[%s5410_s18 + $0x38] sm:$0xff] }
 0x73f   : > { %5094 = vpow2.f32 %v4233_v30 }
 0x740   : > { %v4236_v41 = vmul.f32 -1.442695, %v3095_v19  ;;  %v4235_v10 = vmul.f32 -1.442695, %v3094_v26 }
 0x741   : > { %v6187_v63 = vpop.permute.xlu1 %4981  ;;  %v6189_v8 = vpop.permute.xlu0 %4986 }
 0x742   : > { %5096 = vpow2.f32 %v4236_v41 }
 0x743   : > { %5098 = vpow2.f32 %v4235_v10 }
 0x745   : > { %v6191_v20 = vpop.permute.xlu1 %4991  ;;  %v6193_v61 = vpop.permute.xlu0 %4996 }
 0x749   : > { %v6195_v3 = vpop.permute.xlu1 %5001  ;;  %v6197_v21 = vpop.permute.xlu0 %5006 }
 0x74b   : > { %v5093_v9 = vpop.eup %5092 }
 0x74c   : > { %v5095_v18 = vpop.eup %5094  ;;  %v3109_v25 = vadd.f32 1.0, %v5093_v9 }
 0x74d   : > { %v3108_v45 = vadd.f32 1.0, %v5095_v18  ;;  %v6199_v22 = vpop.permute.xlu1 %5011  ;;  %v6201_v34 = vpop.permute.xlu0 %5016 }
 0x74e   : > { %5100 = vrcp.f32 %v3109_v25 }
 0x74f   : > { %v5097_v57 = vpop.eup %5096  ;;  %5102 = vrcp.f32 %v3108_v45  ;;  %v3164_v45 = vld [vmem:[%s6850_s9] ss:$8 sm:$0x3] }
 0x750   : > { %v5099_v59 = vpop.eup %5098  ;;  %v3111_v7 = vadd.f32 1.0, %v5097_v57 }
 0x751   : > { %v3110_v37 = vadd.f32 1.0, %v5099_v59 }
 0x753   : > { %5104 = vrcp.f32 %v3110_v37  ;;  %v4983_v37 = vunpack.i.l.bf16 %v6187_v63 }
 0x754   : > { %5106 = vrcp.f32 %v3111_v7  ;;  %v4238_v7 = vld [vmem:[%s6850_s9 + $0x2] ss:$8 sm:$0x3] }
 0x75b   : > { %v5101_v24 = vpop.eup %5100 }
 0x75c   : > { %v5103_v12 = vpop.eup %5102  ;;  %3127 = vperm.xlu1 %4799, %v5101_v24   ;;  %v3181_v24 = vrot.slane %v3164_v45, %v6132_v33 }
 0x75d   : > { %3122 = vperm.xlu0 %4798, %v5103_v12  }
 0x760   : > { %v5105_v51 = vpop.eup %5104 }
 0x761   : > { %5026 = vrot.lane.b32.xlu0 %v5242_v0, %s5255_s0  ;;  %3132 = vperm.xlu1 %4799, %v5105_v51   ;;  %v5107_v49 = vpop.eup %5106  ;;  %v4993_v51 = vunpack.i.l.bf16 %v6191_v20 }
 0x765   : > { %3137 = vperm.xlu0 %4798, %v5107_v49   ;;  %5021 = vrot.lane.b32.xlu1 %v5242_v0, %s5255_s0 }
 0x769   : > { %5036 = vrot.lane.b32.xlu0 %v5242_v0, %s6929_s28  ;;  %5031 = vrot.lane.b32.xlu1 %v5242_v0, %s6929_s28 }
 0x7d7   : > { %v3128_v15 = vpop.permute.xlu1 %3127 }
 0x7d8   : > { %v3123_v1 = vpop.permute.xlu0 %3122  ;;  %v3142_v62 = vmul.f32 %v3128_v15, %v6091_v4  ;;  %v3143_v43 = vmul.f32 %v3128_v15, %v6093_v17  ;;  %v5111_v4 = vld [vmem:[%s5410_s18 + $0x18] sm:$0xff] }
 0x7d9   : > { %v3140_v53 = vmul.f32 %v3123_v1, %v6085_v28  ;;  %v3141_v6 = vmul.f32 %v3123_v1, %v6087_v5  ;;  %v5110_v28 = vld [vmem:[%s5410_s18 + $0x10] sm:$0xff] }
 0x7da   : > { %v6220_v5 = vadd.f32 %v5110_v28, %v3142_v62  ;;  %v6223_v17 = vadd.f32 %v5111_v4, %v3143_v43 }
 0x7db   : > { %v6208_v2 = vadd.f32 %v5108_v14, %v3140_v53  ;;  %v6211_v58 = vadd.f32 %v5109_v38, %v3141_v6  ;;  %v3324_v53 = vrot.slane %v4238_v7, %v6132_v33  ;;  %v4984_v6 = vunpack.i.h.bf16 %v6187_v63 }
 0x7dc   : > { %v3133_v35 = vpop.permute.xlu1 %3132  ;;  %v6213_v23 = vpop.permute.xlu0 %5026  ;;  %v6341_v38 = vsub.s32 1, %v6126_v47 }
 0x7dd   : > { %3204 = vrot.lane.b32.xlu1 %v6211_v58, %s6930_s25  ;;  %3202 = vrot.lane.b32.xlu0 %v6208_v2, %s6930_s25  ;;  %v3144_v50 = vmul.f32 %v3133_v35, %v6097_v11  ;;  %v3145_v31 = vmul.f32 %v3133_v35, %v6099_v16  ;;  %v5114_v11 = vld [vmem:[%s5410_s18 + $0x30] sm:$0xff]  ;;  %s5256_s18 = smov 126   ;;  %v4994_v35 = vunpack.i.h.bf16 %v6191_v20  ;;  %v4998_v20 = vunpack.i.l.bf16 %v6193_v61 }
 0x7df   : > { %v6232_v27 = vadd.f32 %v5112_v39, %v3144_v50  ;;  %v6235_v52 = vadd.f32 %v5113_v13, %v3145_v31  ;;  %v4988_v39 = vunpack.i.l.bf16 %v6189_v8 }
 0x7e0   : > { %v3138_v36 = vpop.permute.xlu0 %3137 }
 0x7e1   : > { %3210 = vrot.lane.b32.xlu1 %v6223_v17, %s6930_s25  ;;  %3208 = vrot.lane.b32.xlu0 %v6220_v5, %s6930_s25  ;;  %v3146_v56 = vmul.f32 %v3138_v36, %v6103_v54  ;;  %v3147_v30 = vmul.f32 %v3138_v36, %v6105_v55  ;;  %v6309_v54 = vpop.permute.xlu1 %5021  ;;  %v3331_v36 = vmul.f32 %v3324_v53, %v6208_v2 }
 0x7e3   : > { %v6244_v16 = vadd.f32 %v5114_v11, %v3146_v56  ;;  %v6247_v40 = vadd.f32 %v5115_v32, %v3147_v30  ;;  %v3185_v32 = vrot.slane %v3164_v45, %v6341_v38 }
 0x7e4   : > { %v6313_v19 = vpop.permute.xlu0 %5036 }
 0x7e5   : > { %3214 = vrot.lane.b32.xlu1 %v6232_v27, %s6930_s25  ;;  %3216 = vrot.lane.b32.xlu0 %v6235_v52, %s6930_s25  ;;  %v6311_v55 = vpop.permute.xlu1 %5031 }
 0x7e9   : > { %3222 = vrot.lane.b32.xlu0 %v6247_v40, %s6930_s25  ;;  %3220 = vrot.lane.b32.xlu1 %v6244_v16, %s6930_s25  ;;  %s5174_s25 = scalar_lea.vmem %s5173_s11, 2048 }
 0x7ed   : > { %3263 = vrot.lane.b32.xlu0 %v6208_v2, %s6898_s21  ;;  %3265 = vrot.lane.b32.xlu1 %v6211_v58, %s6898_s21 }
 0x7f1   : > { %3269 = vrot.lane.b32.xlu0 %v6220_v5, %s6898_s21  ;;  %3271 = vrot.lane.b32.xlu1 %v6223_v17, %s6898_s21 }
 0x7f5   : > { %3277 = vrot.lane.b32.xlu0 %v6235_v52, %s6898_s21  ;;  %3275 = vrot.lane.b32.xlu1 %v6232_v27, %s6898_s21 }
 0x7f9   : > { %3283 = vrot.lane.b32.xlu0 %v6247_v40, %s6898_s21  ;;  %3281 = vrot.lane.b32.xlu1 %v6244_v16, %s6898_s21 }
 0x7fd   : > { %3386 = vrot.lane.b32.xlu0 %v6211_v58, %s6900_s29  ;;  %3384 = vrot.lane.b32.xlu1 %v6208_v2, %s6900_s29 }
 0x801   : > { %3390 = vrot.lane.b32.xlu0 %v6220_v5, %s6900_s29  ;;  %3392 = vrot.lane.b32.xlu1 %v6223_v17, %s6900_s29 }
 0x805   : > { %3396 = vrot.lane.b32.xlu0 %v6232_v27, %s6900_s29  ;;  %3398 = vrot.lane.b32.xlu1 %v6235_v52, %s6900_s29 }
 0x809   : > { %3404 = vrot.lane.b32.xlu0 %v6247_v40, %s6900_s29  ;;  %3402 = vrot.lane.b32.xlu1 %v6244_v16, %s6900_s29  ;;  %s380_s29 = sand.u32 1, %s5228_s14  }
 0x80d   : > { %3456 = vrot.lane.b32.xlu0 %v6211_v58, %s5254_s1  ;;  %3454 = vrot.lane.b32.xlu1 %v6208_v2, %s5254_s1 }
 0x811   : > { %3460 = vrot.lane.b32.xlu0 %v6220_v5, %s5254_s1  ;;  %3462 = vrot.lane.b32.xlu1 %v6223_v17, %s5254_s1 }
 0x815   : > { %3466 = vrot.lane.b32.xlu0 %v6232_v27, %s5254_s1  ;;  %3468 = vrot.lane.b32.xlu1 %v6235_v52, %s5254_s1 }
 0x819   : > { %3474 = vrot.lane.b32.xlu0 %v6247_v40, %s5254_s1  ;;  %3472 = vrot.lane.b32.xlu1 %v6244_v16, %s5254_s1  ;;  %s6733_s1 = sshll.u32 %s380_s29, 6 }
 0x81d   : > { %5046 = vrot.lane.b32.xlu0 %v5242_v0, %s6902_s27  ;;  %5041 = vrot.lane.b32.xlu1 %v5242_v0, %s6902_s27 }
 0x821   : > { %5056 = vrot.lane.b32.xlu0 %v5242_v0, %s5256_s18  ;;  %5051 = vrot.lane.b32.xlu1 %v5242_v0, %s5256_s18  ;;  %v4237_v0 = vld [vmem:[%s6850_s9 + $0x1] ss:$8 sm:$0x3] }
 0x822   : > { %v3254_v12 = vrot.slane %v4237_v0, %v6132_v33  ;;  %v6348_v63 = vrot.slane %v4237_v0, %v6341_v38 }
 0x84f   : > { %v3205_v26 = vpop.permute.xlu1 %3204  ;;  %v3203_v41 = vpop.permute.xlu0 %3202 }
 0x850   : > { %v3224_v49 = vsel %vm6931_vm9, %v4983_v37, %v3203_v41  ;;  %v3225_v37 = vsel %vm6934_vm15, %v3203_v41, %v3205_v26  ;;  %vm6942_vm9 = vmmov %vm6940_vm3 }
 0x851   : > { %v3240_v43 = vmul.f32 %v3224_v49, %v3181_v24  ;;  %v3241_v41 = vmul.f32 %v3225_v37, %v3185_v32 }
 0x853   : > { %v3211_v10 = vpop.permute.xlu1 %3210  ;;  %v3209_v9 = vpop.permute.xlu0 %3208 }
 0x854   : > { %v3226_v28 = vsel %vm6932_vm14, %v4984_v6, %v3209_v9  ;;  %v3333_v6 = vmul.f32 %v3324_v53, %v6220_v5  ;;  %vm6943_vm14 = vcmp.ge.s32.totalorder %v5561_v46, 0 }
 0x855   : > { %v3242_v56 = vmul.f32 %v3226_v28, %v3181_v24  ;;  %v3328_v28 = vrot.slane %v4238_v7, %v6341_v38  ;;  %v5003_v7 = vunpack.i.l.bf16 %v6195_v3 }
 0x857   : > { %v6315_v18 = vpop.permute.xlu1 %3214  ;;  %v6317_v25 = vpop.permute.xlu0 %3216 }
 0x858   : > { %v3228_v2 = vsel %vm6933_vm4, %v4988_v39, %v6315_v18  ;;  %vm6944_vm4 = vmmov %vm6943_vm14 }
 0x859   : > { %vm6945_vm15 = vmmov %vm6944_vm4 }
 0x85b   : > { %v6325_v57 = vpop.permute.xlu1 %3220  ;;  %v6327_v59 = vpop.permute.xlu0 %3222 }
 0x85f   : > { %v3266_v15 = vpop.permute.xlu1 %3265  ;;  %v3264_v1 = vpop.permute.xlu0 %3263 }
 0x860   : > { %v3286_v62 = vsel %vm623_vm11, %v4993_v51, %v3264_v1  ;;  %v3287_v47 = vsel %vm623_vm11, %v3264_v1, %v3266_v15 }
 0x861   : > { %v3302_v14 = vmul.f32 %v3286_v62, %v3254_v12  ;;  %v4989_v62 = vunpack.i.h.bf16 %v6189_v8  ;;  %v3303_v15 = vmul.f32 %v3287_v47, %v6348_v63 }
 0x863   : > { %v3310_v4 = vadd.f32 %v3302_v14, %v3240_v43  ;;  %v3272_v50 = vpop.permute.xlu1 %3271  ;;  %v3270_v31 = vpop.permute.xlu0 %3269  ;;  %v4999_v43 = vunpack.i.h.bf16 %v6193_v61  ;;  %v3244_v14 = vmul.f32 %v3228_v2, %v3181_v24  ;;  %v3230_v5 = vsel %vm6935_vm1, %v4989_v62, %v6325_v57 }
 0x864   : > { %v3288_v13 = vsel %vm623_vm11, %v4994_v35, %v3270_v31  ;;  %v4239_v35 = vld [vmem:[%s6850_s9 + $0x3] ss:$8 sm:$0x3]  ;;  %v3289_v8 = vsel %vm623_vm11, %v3270_v31, %v3272_v50  ;;  %v3335_v61 = vmul.f32 %v3324_v53, %v6232_v27  ;;  %v3332_v31 = vmul.f32 %v3328_v28, %v6211_v58 }
 0x865   : > { %v3304_v30 = vmul.f32 %v3288_v13, %v3254_v12  ;;  %v6352_v11 = vadd.f32 %v3331_v36, %v3310_v4  ;;  %v3227_v13 = vsel %vm6936_vm2, %v3209_v9, %v3211_v10  ;;  %v3305_v2 = vmul.f32 %v3289_v8, %v6348_v63 }
 0x866   : > { %v3243_v27 = vmul.f32 %v3227_v13, %v3185_v32  ;;  %v3337_v62 = vmul.f32 %v3324_v53, %v6244_v16  ;;  %v5004_v58 = vunpack.i.h.bf16 %v6195_v3  ;;  %v3334_v16 = vmul.f32 %v3328_v28, %v6223_v17 }
 0x867   : > { %v3312_v51 = vadd.f32 %v3304_v30, %v3242_v56  ;;  %v3276_v0 = vpop.permute.xlu1 %3275  ;;  %v3278_v49 = vpop.permute.xlu0 %3277  ;;  %v3311_v56 = vadd.f32 %v3303_v15, %v3241_v41  ;;  %v3369_v30 = vrot.slane %v4239_v35, %v6341_v38  ;;  %v5008_v3 = vunpack.i.l.bf16 %v6197_v21 }
 0x868   : > { %v3290_v1 = vsel %vm623_vm11, %v4998_v20, %v3276_v0  ;;  %v3246_v20 = vmul.f32 %v3230_v5, %v3181_v24  ;;  %v3291_v50 = vsel %vm623_vm11, %v3276_v0, %v3278_v49  ;;  %v3229_v24 = vsel %vm6937_vm5, %v6315_v18, %v6317_v25 }
 0x869   : > { %v3306_v45 = vmul.f32 %v3290_v1, %v3254_v12  ;;  %v6367_v26 = vadd.f32 %v3333_v6, %v3312_v51  ;;  %v3340_v15 = vadd.f32 %v3332_v31, %v3311_v56  ;;  %v3313_v1 = vadd.f32 %v3305_v2, %v3243_v27 }
 0x86a   : > { %v3231_v18 = vsel %vm6938_vm6, %v6325_v57, %v6327_v59  ;;  %v3336_v56 = vmul.f32 %v3328_v28, %v6235_v52  ;;  %v3338_v52 = vmul.f32 %v3328_v28, %v6247_v40  ;;  %vm3864_vm1 = vcmask 1031168  }
 0x86b   : > { %v3314_v4 = vadd.f32 %v3306_v45, %v3244_v14  ;;  %v3282_v36 = vpop.permute.xlu1 %3281  ;;  %v3284_v39 = vpop.permute.xlu0 %3283  ;;  %v3245_v45 = vmul.f32 %v3229_v24, %v3185_v32  ;;  %vm6946_vm2 = vcmask 1039360   ;;  %vm6950_vm6 = vcmp.le.s32.totalorder %v5569_v60, 15 }
 0x86c   : > { %v3292_v47 = vsel %vm623_vm11, %v4999_v43, %v3282_v36  ;;  %v3307_v43 = vmul.f32 %v3291_v50, %v6348_v63  ;;  %v3293_v49 = vsel %vm623_vm11, %v3282_v36, %v3284_v39  ;;  %v3247_v36 = vmul.f32 %v3231_v18, %v3185_v32  ;;  %v4240_v32 = vld [vmem:[%s6850_s9 + $0x4] ss:$8 sm:$0x3]  ;;  %vm6949_vm5 = vmmov %vm6946_vm2 }
 0x86d   : > { %v3308_v37 = vmul.f32 %v3292_v47, %v3254_v12  ;;  %v6378_v51 = vadd.f32 %v3335_v61, %v3314_v4  ;;  %v3309_v4 = vmul.f32 %v3293_v49, %v6348_v63  ;;  %v3342_v61 = vadd.f32 %v3334_v16, %v3313_v1 }
 0x86e   : > { %v3315_v8 = vadd.f32 %v3307_v43, %v3245_v45  ;;  %v5009_v63 = vunpack.i.h.bf16 %v6197_v21  ;;  %vm3478_vm11 = vcmask 785408   ;;  %v5013_v21 = vunpack.i.l.bf16 %v6199_v22 }
 0x86f   : > { %v3316_v6 = vadd.f32 %v3308_v37, %v3246_v20  ;;  %v3385_v10 = vpop.permute.xlu1 %3384  ;;  %v3387_v9 = vpop.permute.xlu0 %3386  ;;  %v3365_v20 = vrot.slane %v4239_v35, %v6132_v33  ;;  %v3317_v57 = vadd.f32 %v3309_v4, %v3247_v36  ;;  %v5014_v16 = vunpack.i.h.bf16 %v6199_v22 }
 0x870   : > { %v3410_v12 = vsel %vm1160_vm13, %v3387_v9, %v5003_v7  ;;  %v3409_v59 = vsel %vm1160_vm13, %v3385_v10, %v3387_v9  ;;  %v3344_v37 = vadd.f32 %v3336_v56, %v3315_v8  ;;  %v3447_v10 = vrot.slane %v4240_v32, %v6132_v33 }
 0x871   : > { %v3426_v14 = vmul.f32 %v3410_v12, %v3369_v30  ;;  %v6389_v0 = vadd.f32 %v3337_v62, %v3316_v6  ;;  %v3425_v6 = vmul.f32 %v3409_v59, %v3365_v20  ;;  %v3346_v62 = vadd.f32 %v3338_v52, %v3317_v57 }
 0x872   : > { %v3451_v9 = vrot.slane %v4240_v32, %v6341_v38  ;;  %v5018_v22 = vunpack.i.l.bf16 %v6201_v34 }
 0x873   : > { %v3434_v41 = vadd.f32 %v3426_v14, %v3340_v15  ;;  %v3393_v53 = vpop.permute.xlu1 %3392  ;;  %v3391_v5 = vpop.permute.xlu0 %3390  ;;  %v3433_v40 = vadd.f32 %v3425_v6, %v6352_v11 }
 0x874   : > { %v3412_v25 = vsel %vm1160_vm13, %v3393_v53, %v5004_v58  ;;  %v3411_v15 = vsel %vm1160_vm13, %v3391_v5, %v3393_v53 }
 0x875   : > { %v3428_v13 = vmul.f32 %v3412_v25, %v3369_v30  ;;  %v3427_v58 = vmul.f32 %v3411_v15, %v3365_v20 }
 0x877   : > { %v3436_v39 = vadd.f32 %v3428_v13, %v3342_v61  ;;  %v3399_v17 = vpop.permute.xlu1 %3398  ;;  %v3397_v47 = vpop.permute.xlu0 %3396  ;;  %v3435_v61 = vadd.f32 %v3427_v58, %v6367_v26 }
 0x878   : > { %v3414_v2 = vsel %vm1160_vm13, %v3399_v17, %v5008_v3 }
 0x879   : > { %v3430_v7 = vmul.f32 %v3414_v2, %v3369_v30 }
 0x87b   : > { %v3438_v50 = vadd.f32 %v3430_v7, %v3344_v37  ;;  %v3403_v31 = vpop.permute.xlu1 %3402  ;;  %v3405_v27 = vpop.permute.xlu0 %3404 }
 0x87c   : > { %v3416_v35 = vsel %vm1160_vm13, %v3405_v27, %v5009_v63 }
 0x87d   : > { %v3432_v24 = vmul.f32 %v3416_v35, %v3369_v30  ;;  %v3413_v30 = vsel %vm1160_vm13, %v3397_v47, %v3399_v17 }
 0x87e   : > { %v3429_v8 = vmul.f32 %v3413_v30, %v3365_v20 }
 0x87f   : > { %v3440_v12 = vadd.f32 %v3432_v24, %v3346_v62  ;;  %v3455_v1 = vpop.permute.xlu1 %3454  ;;  %v3457_v43 = vpop.permute.xlu0 %3456 }
 0x880   : > { %v3479_v28 = vsel %vm3478_vm11, %v3455_v1, %v3457_v43  ;;  %v3480_v14 = vsel %vm3478_vm11, %v3457_v43, %v5013_v21  ;;  %v3437_v26 = vadd.f32 %v3429_v8, %v6378_v51 }
 0x881   : > { %v3495_v49 = vmul.f32 %v3479_v28, %v3447_v10  ;;  %v3496_v45 = vmul.f32 %v3480_v14, %v3451_v9  ;;  %v5023_v28 = vunpack.i.l.bf16 %v6309_v54  ;;  %v3519_v14 = vld [vmem:[%s6850_s9] ss:$8 sm:$0x3] }
 0x882   : > { %v3608_v8 = vrot.slane %v3519_v14, %v6132_v33 }
 0x883   : > { %v6419_v18 = vadd.f32 %v3495_v49, %v3433_v40  ;;  %v6421_v25 = vadd.f32 %v3496_v45, %v3434_v41  ;;  %v3463_v53 = vpop.permute.xlu1 %3462  ;;  %v3461_v5 = vpop.permute.xlu0 %3460  ;;  %v3415_v41 = vsel %vm1160_vm13, %v3403_v31, %v3405_v27  ;;  %v3532_v40 = vadd.s32 4294967294, %v5558_v44  ;;  %v4241_v49 = vld [vmem:[%s6850_s9 + $0x1] ss:$8 sm:$0x3] }
 0x884   : > { %v3482_v11 = vsel %vm3478_vm11, %v3463_v53, %v5014_v16  ;;  %v3481_v4 = vsel %vm3478_vm11, %v3461_v5, %v3463_v53  ;;  %v3431_v59 = vmul.f32 %v3415_v41, %v3365_v20  ;;  %v4242_v16 = vld [vmem:[%s6850_s9 + $0x2] ss:$8 sm:$0x3]  ;;  %v5024_v53 = vunpack.i.h.bf16 %v6309_v54 }
 0x885   : > { %v3498_v13 = vmul.f32 %v3482_v11, %v3451_v9  ;;  %v3497_v3 = vmul.f32 %v3481_v4, %v3447_v10  ;;  %3560 = vrot.lane.b32.xlu1 %v6421_v25, %s5255_s0  ;;  %3558 = vrot.lane.b32.xlu0 %v6419_v18, %s5255_s0  ;;  %vm3534_vm13 = vcmp.ge.s32.totalorder %v3532_v40, 0  ;;  %v5033_v5 = vunpack.i.l.bf16 %v6311_v55 }
 0x886   : > { %v3439_v27 = vadd.f32 %v3431_v59, %v6389_v0  ;;  %v3676_v11 = vrot.slane %v4241_v49, %v6132_v33  ;;  %v3704_v41 = vrot.slane %v4242_v16, %v6132_v33 }
 0x887   : > { %v6432_v36 = vadd.f32 %v3498_v13, %v3436_v39  ;;  %v6434_v56 = vadd.f32 %v3497_v3, %v3435_v61  ;;  %v3469_v17 = vpop.permute.xlu1 %3468  ;;  %v3467_v47 = vpop.permute.xlu0 %3466  ;;  %v5019_v39 = vunpack.i.h.bf16 %v6201_v34 }
 0x888   : > { %v3484_v2 = vsel %vm3478_vm11, %v3469_v17, %v5018_v22  ;;  %v3483_v57 = vsel %vm3478_vm11, %v3467_v47, %v3469_v17  ;;  %v5028_v17 = vunpack.i.l.bf16 %v6213_v23  ;;  %v5034_v47 = vunpack.i.h.bf16 %v6311_v55 }
 0x889   : > { %v3500_v37 = vmul.f32 %v3484_v2, %v3451_v9  ;;  %v3499_v7 = vmul.f32 %v3483_v57, %v3447_v10  ;;  %3566 = vrot.lane.b32.xlu1 %v6432_v36, %s5255_s0  ;;  %3564 = vrot.lane.b32.xlu0 %v6434_v56, %s5255_s0  ;;  %v5038_v55 = vunpack.i.l.bf16 %v6313_v19 }
 0x88b   : > { %v6444_v63 = vadd.f32 %v3500_v37, %v3438_v50  ;;  %v6446_v32 = vadd.f32 %v3499_v7, %v3437_v26  ;;  %v3473_v51 = vpop.permute.xlu1 %3472  ;;  %v3475_v31 = vpop.permute.xlu0 %3474 }
 0x88c   : > { %v3485_v52 = vsel %vm3478_vm11, %v3473_v51, %v3475_v31  ;;  %v3486_v20 = vsel %vm3478_vm11, %v3475_v31, %v5019_v39  ;;  %v3711_v31 = vmul.f32 %v3704_v41, %v6419_v18 }
 0x88d   : > { %v3501_v6 = vmul.f32 %v3485_v52, %v3447_v10  ;;  %v3502_v35 = vmul.f32 %v3486_v20, %v3451_v9  ;;  %3572 = vrot.lane.b32.xlu0 %v6444_v63, %s5255_s0  ;;  %3570 = vrot.lane.b32.xlu1 %v6446_v32, %s5255_s0  ;;  %v5029_v52 = vunpack.i.h.bf16 %v6213_v23 }
 0x88f   : > { %v6455_v34 = vadd.f32 %v3501_v6, %v3439_v27  ;;  %v6457_v50 = vadd.f32 %v3502_v35, %v3440_v12  ;;  %v6511_v0 = vpop.permute.xlu1 %5041  ;;  %v6513_v62 = vpop.permute.xlu0 %5046 }
 0x890   : > { %v5049_v48 = vunpack.i.h.bf16 %v6513_v62 }
 0x891   : > { %3578 = vrot.lane.b32.xlu0 %v6457_v50, %s5255_s0  ;;  %3576 = vrot.lane.b32.xlu1 %v6455_v34, %s5255_s0  ;;  %s4339_s0 = sshll.u32 %s5335_s17, 10  ;;  %s6800_s17 = scalar_lea.sflag [#allocation6], %s380_s29 }
 0x892   : > { %s6792_s12 = scalar_lea.hbm %s6851_s10, %s4339_s0 }
 0x893   : > { %v6515_v24 = vpop.permute.xlu1 %5051  ;;  %v6517_v10 = vpop.permute.xlu0 %5056 }
 0x895   : > { %3626 = vrot.lane.b32.xlu0 %v6419_v18, %s6929_s28  ;;  %3628 = vrot.lane.b32.xlu1 %v6421_v25, %s6929_s28 }
 0x899   : > { %3632 = vrot.lane.b32.xlu0 %v6434_v56, %s6929_s28  ;;  %3634 = vrot.lane.b32.xlu1 %v6432_v36, %s6929_s28 }
 0x89d   : > { %3640 = vrot.lane.b32.xlu0 %v6444_v63, %s6929_s28  ;;  %3638 = vrot.lane.b32.xlu1 %v6446_v32, %s6929_s28 }
 0x8a1   : > { %3646 = vrot.lane.b32.xlu0 %v6457_v50, %s6929_s28  ;;  %3644 = vrot.lane.b32.xlu1 %v6455_v34, %s6929_s28 }
 0x8a5   : > { %3754 = vrot.lane.b32.xlu0 %v6421_v25, %s6902_s27  ;;  %3752 = vrot.lane.b32.xlu1 %v6419_v18, %s6902_s27 }
 0x8a9   : > { %3758 = vrot.lane.b32.xlu0 %v6434_v56, %s6902_s27  ;;  %3760 = vrot.lane.b32.xlu1 %v6432_v36, %s6902_s27 }
 0x8ad   : > { %3764 = vrot.lane.b32.xlu0 %v6446_v32, %s6902_s27  ;;  %3766 = vrot.lane.b32.xlu1 %v6444_v63, %s6902_s27 }
 0x8b1   : > { %3772 = vrot.lane.b32.xlu0 %v6457_v50, %s6902_s27  ;;  %3770 = vrot.lane.b32.xlu1 %v6455_v34, %s6902_s27  ;;  %s6760_s27 = scalar_lea.vmem [#allocation9], %s6733_s1 }
 0x8b2   : > { %s3962_s28 = sshll.u32 %s6760_s27, 4  ;;  %s6794_s28 = int_to_ptr.vmem [resolvable:$true] %s3962_s28 }
 0x8b3   : > { %s5168_s20 = scalar_lea.vmem %s6794_s28, 1024  ;;  %p5175_p11 = scmp.lt.s32.totalorder %s6794_s28, %s5173_s11 }
 0x8b4   : > { %p5169_p10 = scmp.ne.s32.totalorder %s6794_s28, %s5168_s20  ;;  %p5176_p0 = scmp.lt.s32.totalorder %s5174_s25, %s5168_s20 }
 0x8b5   : > { %3842 = vrot.lane.b32.xlu0 %v6421_v25, %s5256_s18  ;;  %3840 = vrot.lane.b32.xlu1 %v6419_v18, %s5256_s18 }
 0x8b6   : > { %p5170_p12 = pnand %p5169_p10, %p5352_p5  ;;  %p5177_p1 = por %p5176_p0, %p5175_p11 }
 0x8b8   : > { %p5171_p8 = pneg %p5170_p12 }
 0x8b9   : > { %3846 = vrot.lane.b32.xlu0 %v6434_v56, %s5256_s18  ;;  %3848 = vrot.lane.b32.xlu1 %v6432_v36, %s5256_s18 }
 0x8ba   : > { %p5178_p3 = pnand %p5177_p1, %p5171_p8 }
 0x8bd   : > { %3852 = vrot.lane.b32.xlu0 %v6446_v32, %s5256_s18  ;;  %3854 = vrot.lane.b32.xlu1 %v6444_v63, %s5256_s18 }
 0x8c1   : > { %3860 = vrot.lane.b32.xlu0 %v6457_v50, %s5256_s18  ;;  %3858 = vrot.lane.b32.xlu1 %v6455_v34, %s5256_s18 }
 0x8f7   : > { %v6519_v9 = vpop.permute.xlu1 %3560  ;;  %v6521_v21 = vpop.permute.xlu0 %3558 }
 0x8f8   : > { %v3580_v45 = vsel %vm3047_vm7, %v5023_v28, %v6521_v21  ;;  %v6573_v28 = vadd.s32 4294967294, %v5556_v42 }
 0x8f9   : > { %v3596_v4 = vsel %vm3534_vm13, %v3580_v45, 0.0 }
 0x8fa   : > { %v3615_v26 = vmul.f32 %v3608_v8, %v3596_v4  ;;  %vm3535_vm12 = vcmp.ge.s32.totalorder %v6573_v28, 0 }
 0x8fb   : > { %v6523_v15 = vpop.permute.xlu1 %3566  ;;  %v6525_v12 = vpop.permute.xlu0 %3564 }
 0x8fc   : > { %v3582_v3 = vsel %vm3047_vm7, %v5024_v53, %v6525_v12 }
 0x8fd   : > { %v3598_v57 = vsel %vm3534_vm13, %v3582_v3, 0.0  ;;  %v3713_v3 = vmul.f32 %v3704_v41, %v6434_v56 }
 0x8fe   : > { %v3617_v27 = vmul.f32 %v3608_v8, %v3598_v57  ;;  %v6587_v57 = vrot.slane %v3519_v14, %v6341_v38 }
 0x8ff   : > { %v6527_v1 = vpop.permute.xlu0 %3572  ;;  %v6529_v43 = vpop.permute.xlu1 %3570 }
 0x900   : > { %v3584_v7 = vsel %vm3047_vm7, %v5028_v17, %v6529_v43  ;;  %v5039_v17 = vunpack.i.h.bf16 %v6313_v19  ;;  %v6594_v19 = vrot.slane %v4241_v49, %v6341_v38  ;;  %v5043_v49 = vunpack.i.l.bf16 %v6511_v0 }
 0x901   : > { %v3600_v45 = vsel %vm3534_vm13, %v3584_v7, 0.0 }
 0x903   : > { %v6536_v58 = vpop.permute.xlu0 %3578  ;;  %v6538_v30 = vpop.permute.xlu1 %3576 }
 0x904   : > { %v3586_v18 = vsel %vm3047_vm7, %v5029_v52, %v6538_v30 }
 0x905   : > { %v3602_v7 = vsel %vm3534_vm13, %v3586_v18, 0.0  ;;  %vm6951_vm13 = vcmp.le.s32.totalorder %v5599_v29, 15 }
 0x907   : > { %v3627_v61 = vpop.permute.xlu0 %3626  ;;  %v3629_v13 = vpop.permute.xlu1 %3628 }
 0x908   : > { %v3648_v22 = vsel %vm800_vm0, %v5033_v5, %v3627_v61 }
 0x909   : > { %v3664_v54 = vsel %vm6939_vm8, %v3648_v22, 0.0  ;;  %vm6952_vm8 = vmmov %vm6946_vm2 }
 0x90a   : > { %v3683_v2 = vmul.f32 %v3676_v11, %v3664_v54  ;;  %v3708_v54 = vrot.slane %v4242_v16, %v6341_v38  ;;  %v3715_v16 = vmul.f32 %v3704_v41, %v6446_v32  ;;  %v5044_v32 = vunpack.i.h.bf16 %v6511_v0 }
 0x90b   : > { %v3633_v59 = vpop.permute.xlu0 %3632  ;;  %v3635_v37 = vpop.permute.xlu1 %3634 }
 0x90c   : > { %v3691_v39 = vadd.f32 %v3683_v2, %v3615_v26  ;;  %v3650_v51 = vsel %vm800_vm0, %v5034_v47, %v3633_v59  ;;  %v3619_v47 = vmul.f32 %v3608_v8, %v3600_v45  ;;  %v6599_v14 = vmul.f32 %v3708_v54, %v6421_v25 }
 0x90d   : > { %v3666_v20 = vsel %vm6940_vm3, %v3650_v51, 0.0  ;;  %v6602_v40 = vmul.f32 %v3708_v54, %v6432_v36  ;;  %v3649_v45 = vsel %vm800_vm0, %v3627_v61, %v3629_v13  ;;  %v5048_v36 = vunpack.i.l.bf16 %v6513_v62  ;;  %v4243_v61 = vld [vmem:[%s6850_s9 + $0x3] ss:$8 sm:$0x3]  ;;  %vm6953_vm3 = vmmov %vm6951_vm13 }
 0x90e   : > { %v3685_v6 = vmul.f32 %v3676_v11, %v3666_v20  ;;  %v6570_v35 = vadd.f32 %v3711_v31, %v3691_v39  ;;  %v3621_v20 = vmul.f32 %v3608_v8, %v3602_v7  ;;  %v3651_v0 = vsel %vm800_vm0, %v3633_v59, %v3635_v37 }
 0x90f   : > { %v3641_v53 = vpop.permute.xlu0 %3640  ;;  %v3639_v5 = vpop.permute.xlu1 %3638  ;;  %v3718_v13 = vmul.f32 %v3708_v54, %v6457_v50  ;;  %v3583_v59 = vsel %vm3047_vm7, %v6525_v12, %v6523_v15  ;;  %v4244_v15 = vld [vmem:[%s6850_s9 + $0x4] ss:$8 sm:$0x3] }
 0x910   : > { %v3693_v23 = vadd.f32 %v3685_v6, %v3617_v27  ;;  %v3652_v4 = vsel %vm800_vm0, %v5038_v55, %v3639_v5  ;;  %v6605_v27 = vmul.f32 %v3708_v54, %v6444_v63  ;;  %v3717_v63 = vmul.f32 %v3704_v41, %v6455_v34 }
 0x911   : > { %v3668_v22 = vsel %vm6941_vm10, %v3652_v4, 0.0  ;;  %v3581_v4 = vsel %vm3047_vm7, %v6521_v21, %v6519_v9  ;;  %v3587_v34 = vsel %vm3047_vm7, %v6538_v30, %v6536_v58  ;;  %v3665_v41 = vsel %vm6943_vm14, %v3649_v45, 0.0  ;;  %vm6954_vm10 = vmmov %vm6946_vm2 }
 0x912   : > { %v3687_v26 = vmul.f32 %v3676_v11, %v3668_v22  ;;  %v6584_v2 = vadd.f32 %v3713_v3, %v3693_v23  ;;  %v5054_v23 = vunpack.i.h.bf16 %v6515_v24  ;;  %v5053_v3 = vunpack.i.l.bf16 %v6515_v24  ;;  %vm6956_vm14 = vmmov %vm6950_vm6 }
 0x913   : > { %v3647_v39 = vpop.permute.xlu0 %3646  ;;  %v3645_v51 = vpop.permute.xlu1 %3644  ;;  %v5059_v9 = vunpack.i.h.bf16 %v6517_v10  ;;  %v5058_v21 = vunpack.i.l.bf16 %v6517_v10  ;;  %v3597_v58 = vsel %vm3535_vm12, %v3581_v4, 0.0  ;;  %v3667_v30 = vsel %vm6945_vm15, %v3651_v0, 0.0  ;;  %vm6958_vm15 = vmmov %vm6946_vm2 }
 0x914   : > { %v3695_v56 = vadd.f32 %v3687_v26, %v3619_v47  ;;  %v3654_v31 = vsel %vm800_vm0, %v5039_v17, %v3645_v51  ;;  %v3655_v8 = vsel %vm800_vm0, %v3645_v51, %v3647_v39  ;;  %v6645_v17 = vrot.slane %v4243_v61, %v6341_v38 }
 0x915   : > { %v3670_v52 = vsel %vm6942_vm9, %v3654_v31, 0.0  ;;  %v3671_v50 = vsel %vm6944_vm4, %v3655_v8, 0.0  ;;  %v6648_v47 = vrot.slane %v4243_v61, %v6132_v33  ;;  %v3603_v12 = vsel %vm3535_vm12, %v3587_v34, 0.0  ;;  %vm6955_vm9 = vmmov %vm6946_vm2 }
 0x916   : > { %v3689_v55 = vmul.f32 %v3676_v11, %v3670_v52  ;;  %v6607_v6 = vadd.f32 %v3715_v16, %v3695_v56  ;;  %v3684_v26 = vmul.f32 %v6594_v19, %v3665_v41  ;;  %v3653_v7 = vsel %vm800_vm0, %v3639_v5, %v3641_v53  ;;  %vm6947_vm0 = vmmov %vm6944_vm4 }
 0x917   : > { %v3755_v25 = vpop.permute.xlu0 %3754  ;;  %v3753_v18 = vpop.permute.xlu1 %3752  ;;  %v6658_v39 = vadd.s32 2, %v5556_v42  ;;  %v3599_v51 = vsel %vm3535_vm12, %v3583_v59, 0.0  ;;  %v3585_v56 = vsel %vm3047_vm7, %v6529_v43, %v6527_v1  ;;  %v3690_v31 = vmul.f32 %v6594_v19, %v3671_v50  ;;  %vm6948_vm7 = vmmov %vm6946_vm2 }
 0x918   : > { %v3697_v11 = vadd.f32 %v3689_v55, %v3621_v20  ;;  %v3616_v16 = vmul.f32 %v6587_v57, %v3597_v58  ;;  %v3686_v52 = vmul.f32 %v6594_v19, %v3667_v30  ;;  %v3777_v20 = vsel %vm6946_vm2, %v3755_v25, %v5043_v49  ;;  %vm6957_vm4 = vmmov %vm6950_vm6 }
 0x919   : > { %v6670_v42 = vrot.slane %v4244_v15, %v6341_v38  ;;  %v3622_v55 = vmul.f32 %v6587_v57, %v3603_v12  ;;  %v3669_v45 = vsel %vm6947_vm0, %v3653_v7, 0.0  ;;  %v3776_v1 = vsel %vm6948_vm7, %v3753_v18, %v3755_v25  ;;  %vm6959_vm2 = vmmov %vm6953_vm3 }
 0x91a   : > { %v6631_v22 = vadd.f32 %v3717_v63, %v3697_v11  ;;  %v6677_v43 = vadd.s32 2, %v5558_v44  ;;  %v3618_v8 = vmul.f32 %v6587_v57, %v3599_v51  ;;  %v3601_v49 = vsel %vm3535_vm12, %v3585_v56, 0.0  ;;  %vm6960_vm0 = vmmov %vm6957_vm4 }
 0x91b   : > { %v3759_v37 = vpop.permute.xlu0 %3758  ;;  %v3761_v54 = vpop.permute.xlu1 %3760  ;;  %v3692_v11 = vadd.f32 %v3684_v26, %v3616_v16  ;;  %v3698_v38 = vadd.f32 %v3690_v31, %v3622_v55  ;;  %v3793_v4 = vsel %vm6950_vm6, %v3777_v20, 0.0  ;;  %vm3833_vm11 = vcmp.le.s32.totalorder %v6658_v39, 15  ;;  %vm6961_vm7 = vmmov %vm6949_vm5 }
 0x91c   : > { %v3778_v63 = vsel %vm6949_vm5, %v3759_v37, %v3761_v54  ;;  %v6687_v46 = vrot.slane %v4244_v15, %v6132_v33  ;;  %v3694_v25 = vadd.f32 %v3686_v52, %v3618_v8  ;;  %v3688_v44 = vmul.f32 %v6594_v19, %v3669_v45 }
 0x91d   : > { %v3792_v18 = vsel %vm6951_vm13, %v3776_v1, 0.0  ;;  %v3779_v28 = vsel %vm6952_vm8, %v3761_v54, %v5044_v32  ;;  %v3620_v34 = vmul.f32 %v6587_v57, %v3601_v49  ;;  %v3794_v41 = vsel %vm6953_vm3, %v3778_v63, 0.0  ;;  %vm6962_vm13 = vmmov %vm6959_vm2 }
 0x91e   : > { %vm3832_vm12 = vcmp.le.s32.totalorder %v6677_v43, 15  ;;  %v3720_v19 = vadd.f32 %v6599_v14, %v3692_v11  ;;  %v3812_v59 = vmul.f32 %v6645_v17, %v3793_v4  ;;  %v3811_v57 = vmul.f32 %v6648_v47, %v3792_v18 }
 0x91f   : > { %v3765_v53 = vpop.permute.xlu0 %3764  ;;  %v3767_v5 = vpop.permute.xlu1 %3766  ;;  %v3795_v37 = vsel %vm6957_vm4, %v3779_v28, 0.0  ;;  %v3726_v54 = vadd.f32 %v3718_v13, %v3698_v38  ;;  %v3722_v30 = vadd.f32 %v6602_v40, %v3694_v25  ;;  %v3813_v14 = vmul.f32 %v6648_v47, %v3794_v41 }
 0x920   : > { %v3780_v32 = vsel %vm6955_vm9, %v3765_v53, %v3767_v5  ;;  %v3781_v15 = vsel %vm6958_vm15, %v3767_v5, %v5048_v36  ;;  %v3820_v56 = vadd.f32 %v3812_v59, %v3720_v19  ;;  %v3814_v31 = vmul.f32 %v6645_v17, %v3795_v37 }
 0x921   : > { %v3796_v7 = vsel %vm6959_vm2, %v3780_v32, 0.0  ;;  %v3819_v16 = vadd.f32 %v3811_v57, %v6570_v35  ;;  %v3797_v52 = vsel %vm6960_vm0, %v3781_v15, 0.0  ;;  %v3821_v53 = vadd.f32 %v3813_v14, %v6584_v2 }
 0x922   : > { %v3815_v55 = vmul.f32 %v6648_v47, %v3796_v7  ;;  %v3822_v63 = vadd.f32 %v3814_v31, %v3722_v30  ;;  %v3816_v38 = vmul.f32 %v6645_v17, %v3797_v52 }
 0x923   : > { %v3773_v0 = vpop.permute.xlu0 %3772  ;;  %v3771_v61 = vpop.permute.xlu1 %3770 }
 0x924   : > { %v3783_v33 = vsel %vm6954_vm10, %v3773_v0, %v5049_v48  ;;  %v3696_v48 = vadd.f32 %v3688_v44, %v3620_v34  ;;  %v3782_v45 = vsel %vm6961_vm7, %v3771_v61, %v3773_v0  ;;  %v3823_v44 = vadd.f32 %v3815_v55, %v6607_v6 }
 0x925   : > { %v3799_v50 = vsel %vm6956_vm14, %v3783_v33, 0.0  ;;  %v3798_v24 = vsel %vm6962_vm13, %v3782_v45, 0.0 }
 0x926   : > { %v3818_v58 = vmul.f32 %v6645_v17, %v3799_v50  ;;  %v3724_v5 = vadd.f32 %v6605_v27, %v3696_v48  ;;  %v3817_v32 = vmul.f32 %v6648_v47, %v3798_v24 }
 0x927   : > { %v3843_v12 = vpop.permute.xlu0 %3842  ;;  %v3841_v26 = vpop.permute.xlu1 %3840 }
 0x928   : > { %v6717_v51 = vadd.f32 %v3818_v58, %v3726_v54  ;;  %v3866_v13 = vsel %vm3864_vm1, %v3843_v12, %v5053_v3  ;;  %v3865_v40 = vsel %vm3864_vm1, %v3841_v26, %v3843_v12  ;;  %v3824_v59 = vadd.f32 %v3816_v38, %v3724_v5 }
 0x929   : > { %v3882_v62 = vsel %vm3833_vm11, %v3866_v13, 0.0  ;;  %v3881_v36 = vsel %vm3832_vm12, %v3865_v40, 0.0  ;;  %v3825_v13 = vadd.f32 %v3817_v32, %v6631_v22 }
 0x92a   : > { %v3901_v3 = vmul.f32 %v6670_v42, %v3882_v62  ;;  %v3900_v20 = vmul.f32 %v6687_v46, %v3881_v36 }
 0x92b   : > { %v3847_v1 = vpop.permute.xlu0 %3846  ;;  %v3849_v35 = vpop.permute.xlu1 %3848 }
 0x92c   : > { %v3909_v8 = vadd.f32 %v3901_v3, %v3820_v56  ;;  %v3908_v60 = vadd.f32 %v3900_v20, %v3819_v16  ;;  %v3867_v49 = vsel %vm3864_vm1, %v3847_v1, %v3849_v35  ;;  %v3868_v11 = vsel %vm3864_vm1, %v3849_v35, %v5054_v23 }
 0x92d   : > { %v3883_v2 = vsel %vm3832_vm12, %v3867_v49, 0.0  ;;  %v3884_v27 = vsel %vm3833_vm11, %v3868_v11, 0.0 }
 0x92e   : > { %vm3917_vm5 = vcmp.gt.f32.partialorder %v3909_v8, 0.0  ;;  %v3925_v4 = vmul.f32 0.2, %v3909_v8  ;;  %vm3916_vm6 = vcmp.gt.f32.partialorder %v3908_v60, 0.0  ;;  %v3924_v25 = vmul.f32 0.2, %v3908_v60 }
 0x92f   : > { %v3902_v23 = vmul.f32 %v6687_v46, %v3883_v2  ;;  %v3903_v17 = vmul.f32 %v6670_v42, %v3884_v27  ;;  %v3853_v18 = vpop.permute.xlu0 %3852  ;;  %v3855_v28 = vpop.permute.xlu1 %3854 }
 0x930   : > { %v3933_v0 = vsel %vm3917_vm5, %v3909_v8, %v3925_v4  ;;  %v3932_v61 = vsel %vm3916_vm6, %v3908_v60, %v3924_v25  ;;  %v3869_v34 = vsel %vm3864_vm1, %v3853_v18, %v3855_v28  ;;  %v3870_v41 = vsel %vm3864_vm1, %v3855_v28, %v5058_v21 }
 0x931   : > { %3941 = vst [vmem:[%s6760_s27 + $0x8] sm:$0xff] %v3933_v0  ;;  %3940 = vst [vmem:[%s6760_s27] sm:$0xff] %v3932_v61  ;;  %v3910_v29 = vadd.f32 %v3902_v23, %v3821_v53  ;;  %v3911_v6 = vadd.f32 %v3903_v17, %v3822_v63  ;;  %v3885_v33 = vsel %vm3832_vm12, %v3869_v34, 0.0  ;;  %v3886_v19 = vsel %vm3833_vm11, %v3870_v41, 0.0 }
 0x932   : > { %v3904_v50 = vmul.f32 %v6687_v46, %v3885_v33  ;;  %v3905_v21 = vmul.f32 %v6670_v42, %v3886_v19 }
 0x933   : > { %vm3918_vm8 = vcmp.gt.f32.partialorder %v3910_v29, 0.0  ;;  %vm3919_vm3 = vcmp.gt.f32.partialorder %v3911_v6, 0.0  ;;  %v3926_v57 = vmul.f32 0.2, %v3910_v29  ;;  %v3927_v37 = vmul.f32 0.2, %v3911_v6  ;;  %v3861_v54 = vpop.permute.xlu0 %3860  ;;  %v3859_v58 = vpop.permute.xlu1 %3858 }
 0x934   : > { %v3912_v48 = vadd.f32 %v3904_v50, %v3823_v44  ;;  %v3913_v30 = vadd.f32 %v3905_v21, %v3824_v59  ;;  %v3872_v14 = vsel %vm3864_vm1, %v3861_v54, %v5059_v9  ;;  %v3871_v47 = vsel %vm3864_vm1, %v3859_v58, %v3861_v54 }
 0x935   : > { %v3934_v15 = vsel %vm3918_vm8, %v3910_v29, %v3926_v57  ;;  %v3935_v12 = vsel %vm3919_vm3, %v3911_v6, %v3927_v37  ;;  %v3888_v26 = vsel %vm3833_vm11, %v3872_v14, 0.0  ;;  %v3887_v7 = vsel %vm3832_vm12, %v3871_v47, 0.0 }
 0x936   : > { %3942 = vst [vmem:[%s6760_s27 + $0x10] sm:$0xff] %v3934_v15  ;;  %3943 = vst [vmem:[%s6760_s27 + $0x18] sm:$0xff] %v3935_v12  ;;  %vm3920_vm10 = vcmp.gt.f32.partialorder %v3912_v48, 0.0  ;;  %vm3921_vm9 = vcmp.gt.f32.partialorder %v3913_v30, 0.0  ;;  %v3928_v10 = vmul.f32 0.2, %v3912_v48  ;;  %v3907_v40 = vmul.f32 %v6670_v42, %v3888_v26 }
 0x937   : > { %v3929_v9 = vmul.f32 0.2, %v3913_v30  ;;  %v3906_v56 = vmul.f32 %v6687_v46, %v3887_v7 }
 0x938   : > { %v3936_v31 = vsel %vm3920_vm10, %v3912_v48, %v3928_v10  ;;  %v3915_v43 = vadd.f32 %v3907_v40, %v6717_v51 }
 0x939   : > { %v3937_v39 = vsel %vm3921_vm9, %v3913_v30, %v3929_v9  ;;  %3944 = vst [vmem:[%s6760_s27 + $0x20] sm:$0xff] %v3936_v31  ;;  %v3914_v62 = vadd.f32 %v3906_v56, %v3825_v13 }
 0x93a   : > { %3945 = vst [vmem:[%s6760_s27 + $0x28] sm:$0xff] %v3937_v39  ;;  %vm3923_vm1 = vcmp.gt.f32.partialorder %v3915_v43, 0.0  ;;  %v3931_v36 = vmul.f32 0.2, %v3915_v43 }
 0x93b   : > { %vm3922_vm11 = vcmp.gt.f32.partialorder %v3914_v62, 0.0  ;;  %v3930_v22 = vmul.f32 0.2, %v3914_v62 }
 0x93c   : > { %v3939_v42 = vsel %vm3923_vm1, %v3915_v43, %v3931_v36 }
 0x93d   : > { %v3938_v46 = vsel %vm3922_vm11, %v3914_v62, %v3930_v22  ;;  %3947 = vst [vmem:[%s6760_s27 + $0x38] sm:$0xff] %v3939_v42 }
 0x93e   : > { %3946 = vst [vmem:[%s6760_s27 + $0x30] sm:$0xff] %v3938_v46 }
 0x93f   : > { %5181 = shalt.err (!%p5178_p3)
}
 0x940   : > { %s5182_s29 = scalar_lea.hbm %s6792_s12, 1024  ;;  %s5186_s0 = scalar_lea.hbm %s6851_s10, 2048 }
 0x941   : > { %p5183_p2 = scmp.ne.s32.totalorder %s6792_s12, %s5182_s29  ;;  %p5187_p7 = scmp.lt.s32.totalorder %s6792_s12, %s6851_s10 }
 0x942   : > { %p5188_p6 = scmp.lt.s32.totalorder %s5186_s0, %s5182_s29 }
 0x943   : > { %p5184_p4 = pnand %p5183_p2, %p5352_p5 }
 0x944   : > { %p5189_p9 = por %p5188_p6, %p5187_p7 }
 0x945   : > { %p5185_p13 = pneg %p5184_p4 }
 0x947   : > { %p5190_p10 = pnand %p5189_p9, %p5185_p13 }
 0x949   : > { %5193 = shalt.err (!%p5190_p10)
}
 0x94a   : > { %s5258_s20 = smov 256  }
 0x94b   : > { %4548 = dma.vmem_to_hbm [thread:$0]  (%p5352_p5), %s6794_s28, 1024, %s6792_s12, %s6800_s17, %s5258_s20, %s5258_s20, %s6898_s21  }
 0x94c PF: > { %p4565_p12 = scmp.ge.s32.totalorder %s5236_s16, 2  ;;  %s3977_s26 = sand.u32 1, %s5224_s13  }
 0x94d   : > { %p6963_p8 = scmp.ne.s32.totalorder %s6880_s24, 0  ;;  %s3978_s11 = scalar_lea.sflag [#allocation6], %s3977_s26 }
 0x94f   : > { %p4558_p11 = pnand %p4565_p12, %p6963_p8 }
 0x951   : > { %p4559_p0 = pneg %p4558_p11 }
 0x953   : > { %5219 = dma.done.wait (%p4559_p0), %s3978_s11, 1024  }
 0x954   : > { %5221 = vsyncadd (%p4559_p0), %s3978_s11, 4294966272  ;;  %p22_p1 = scmp.ge.s32.totalorder %s5339_s19, 4   ;;  %s6964_s13 = smov %s5228_s14 }
 0x955   : > { %s6965_s14 = smov %s5232_s15  ;;  %s6966_s15 = smov %s5350_s22 }
 0x956   : > { %s6967_s16 = smov %s5339_s19  ;;  %24 = sbr.rel (!%p22_p1) target bundleno = 8 (0x8), region = 108 }
 0x95b   :  { %3983 = vsyncpa [#allocation5], 1 }
 0x95c   :  { %3985 = vsyncpa [#allocation5 + $0x1], 1 }
 0x95d   :  { %3986 = vsyncpa [#allocation8], 1 }
 0x95e   :  { %3987 = vsyncpa [#allocation6], 1 }
 0x95f   :  { %3989 = vsyncpa [#allocation6 + $0x1], 1 }

</bundles_post_ra>
